<compile_context>
chip_gen: v6e
topology: v6e:2x2x1
jax: 0.10.0
libtpu: 0.0.40
codegen_flags: <defaults>
</compile_context>

<pallas_src>
import functools

import jax
import jax.numpy as jnp
import numpy as np
from jax import lax
from jax.experimental import pallas as pl
from jax.experimental.pallas import tpu as pltpu


# ----------------------------------------------------------------------------
# Fused stem kernel: 3x (conv3x3 + folded BN [+ ReLU]) for one batch element
# ----------------------------------------------------------------------------
def _stem_kernel(x_ref, w1_ref, w2_ref, w3_ref, b1_ref, b2_ref, b3_ref,
                 o_ref, l2_scr, l3_scr, *,
                 wp1, ho1, wo1, t1, wp2, ho2, wo2, t2, wp3, t3, c1, c2):
    f32 = jnp.float32
    bf16 = jnp.bfloat16

    # The zero-padding ring of each intermediate activation is represented by
    # scratch positions that are never written -> zero the scratches first.
    l2_scr[...] = jnp.zeros_like(l2_scr)
    l3_scr[...] = jnp.zeros_like(l3_scr)

    # ------------------------------------------------------------------
    # layer 1: 3x3 conv, stride 2, folded BN, ReLU
    # x_ref[0, p, k, :] = xpad_flat[4k + p]   (padded input, flat width wp1,
    # de-interleaved by 4).  "Wide output" half `rho` holds conv results for
    # flat output positions r = 2t + rho (r = wp1*ho + wo); only wo < wo1 is
    # valid, the wrap-around junk columns are simply never stored.
    # ------------------------------------------------------------------
    wq = wo1 // 2                               # valid outputs per row per half
    for rho in (0, 1):
        acc = jnp.zeros((t1, c1), f32)
        for kh in range(3):
            for kw in range(3):
                s = 2 * rho + wp1 * kh + kw
                a = x_ref[0, s % 4, s // 4:s // 4 + t1, :]
                acc = acc + jnp.dot(a.astype(bf16), w1_ref[3 * kh + kw, :, :],
                                    preferred_element_type=f32)
        y1 = jnp.maximum(acc + b1_ref[...], 0.0)            # (t1, c1) f32
        # Scatter each row's valid outputs into layer-2's de-interleaved
        # padded-input scratch (output parity rho -> scratch phase (1+rho)%2).
        ph = (1 + rho) % 2
        for ho in range(ho1):
            src = (wp1 * ho) // 2
            dst = (wp2 * (ho + 1) + 1 + rho) // 2
            l2_scr[ph, dst:dst + wq, :] = y1[src:src + wq, :]

    # ------------------------------------------------------------------
    # layer 2: 3x3 conv, stride 2, folded BN, ReLU
    # l2_scr[p, k, :] = y1pad_flat[2k + p]    (flat width wp2)
    # ------------------------------------------------------------------
    acc = jnp.zeros((t2, c2), f32)
    for kh in range(3):
        for kw in range(3):
            s = wp2 * kh + kw
            a = l2_scr[s % 2, s // 2:s // 2 + t2, :]
            acc = acc + jnp.dot(a.astype(bf16), w2_ref[3 * kh + kw, :, :],
                                preferred_element_type=f32)
    y2 = jnp.maximum(acc + b2_ref[...], 0.0)                # (t2, c2) f32
    for ho in range(ho2):
        dst = wp3 * (ho + 1) + 1
        l3_scr[dst:dst + wo2, :] = y2[wp2 * ho:wp2 * ho + wo2, :]

    # ------------------------------------------------------------------
    # layer 3: 3x3 conv, stride 1, folded BN (no activation)
    # l3_scr[k, :] = y2pad_flat[k]            (flat width wp3)
    # ------------------------------------------------------------------
    acc = jnp.zeros((t3, c2), f32)
    for kh in range(3):
        for kw in range(3):
            s = wp3 * kh + kw
            a = l3_scr[s:s + t3, :]
            acc = acc + jnp.dot(a.astype(bf16), w3_ref[3 * kh + kw, :, :],
                                preferred_element_type=f32)
    y3 = acc + b3_ref[...]                                  # (t3, c2) f32
    for ho in range(ho2):
        o_ref[0, ho, :, :] = y3[wp3 * ho:wp3 * ho + wo2, :].astype(o_ref.dtype)


# ----------------------------------------------------------------------------
# Stem_pyramid forward (NCHW in / NCHW out, matching PyTorch)
# ----------------------------------------------------------------------------
def stem_pyramid_forward(x_nchw, params, *, eps=1e-5):
    N, cin, H, W = x_nchw.shape
    assert H % 4 == 0 and W % 4 == 0, "fused stem kernel assumes H, W % 4 == 0"
    c1 = params["l1"]["w"].shape[0]
    c2 = params["l2"]["w"].shape[0]

    # ---- geometry of the flattened, zero-padded activations ---------------
    wp1, hp1 = W + 2, H + 4          # pad 1 top / 3 bottom (slack for junk reads)
    k1 = (wp1 * hp1) // 4            # de-interleave-by-4 phase length
    ho1, wo1 = H // 2, W // 2
    t1 = (ho1 * wp1) // 2            # layer-1 wide-output length per parity half

    wp2, hp2 = wo1 + 2, ho1 + 4
    k2 = (wp2 * hp2) // 2            # de-interleave-by-2 phase length
    ho2, wo2 = ho1 // 2, wo1 // 2
    t2 = ho2 * wp2                   # layer-2 wide-output length

    wp3, hp3 = wo2 + 2, ho2 + 3
    m3 = wp3 * hp3
    t3 = ho2 * wp3                   # layer-3 wide-output length

    # ---- layer-1 input: NHWC, pad, flatten, de-interleave by 4 ------------
    x = jnp.transpose(x_nchw, (0, 2, 3, 1)).astype(jnp.float32)      # NHWC
    xp = jnp.pad(x, ((0, 0), (1, hp1 - H - 1), (1, 1), (0, 0)))      # (N,hp1,wp1,cin)
    xf = xp.reshape(N, hp1 * wp1, cin)
    x1d = xf.reshape(N, k1, 4, cin).transpose(0, 2, 1, 3)            # (N,4,k1,cin)

    # ---- fold BN (running stats) into conv weights / bias -----------------
    def fold(p, cout):
        scale = p["gamma"] / jnp.sqrt(p["var"] + eps)
        bias = p["beta"] - p["mean"] * scale + p["b"] * scale
        w = jnp.transpose(p["w"], (2, 3, 1, 0)).reshape(9, -1, cout)  # (9,cin,cout)
        return ((w * scale[None, None, :]).astype(jnp.bfloat16),
                bias.reshape(1, cout).astype(jnp.float32))

    w1, b1 = fold(params["l1"], c1)
    w2, b2 = fold(params["l2"], c2)
    w3, b3 = fold(params["l3"], c2)

    kernel = functools.partial(
        _stem_kernel, wp1=wp1, ho1=ho1, wo1=wo1, t1=t1,
        wp2=wp2, ho2=ho2, wo2=wo2, t2=t2, wp3=wp3, t3=t3, c1=c1, c2=c2)

    out = pl.pallas_call(
        kernel,
        out_shape=jax.ShapeDtypeStruct((N, ho2, wo2, c2), jnp.float32),
        grid=(N,),
        in_specs=[
            pl.BlockSpec((1, 4, k1, cin), lambda b: (b, 0, 0, 0)),
            pl.BlockSpec((9, cin, c1), lambda b: (0, 0, 0)),
            pl.BlockSpec((9, c1, c2), lambda b: (0, 0, 0)),
            pl.BlockSpec((9, c2, c2), lambda b: (0, 0, 0)),
            pl.BlockSpec((1, c1), lambda b: (0, 0)),
            pl.BlockSpec((1, c2), lambda b: (0, 0)),
            pl.BlockSpec((1, c2), lambda b: (0, 0)),
        ],
        out_specs=pl.BlockSpec((1, ho2, wo2, c2), lambda b: (b, 0, 0, 0)),
        scratch_shapes=[
            pltpu.VMEM((2, k2, c1), jnp.float32),   # layer-2 padded input (de-interleaved by 2)
            pltpu.VMEM((m3, c2), jnp.float32),      # layer-3 padded input
        ],
        compiler_params=pltpu.CompilerParams(
            dimension_semantics=("parallel",),
            vmem_limit_bytes=16 * 1024 * 1024,      # actual use ~1 MiB; ample headroom
        ),
    )(x1d, w1, w2, w3, b1, b2, b3)

    return jnp.transpose(out, (0, 3, 1, 2))         # NHWC -> NCHW


# ----------------------------------------------------------------------------
# Pure-JAX reference (silent correctness check)
# ----------------------------------------------------------------------------
def _ref_layer(x_nchw, p, stride, relu, eps=1e-5):
    y = lax.conv_general_dilated(
        x_nchw, p["w"], window_strides=(stride, stride),
        padding=((1, 1), (1, 1)),
        dimension_numbers=("NCHW", "OIHW", "NCHW"))
    y = y + p["b"][None, :, None, None]
    scale = p["gamma"] / jnp.sqrt(p["var"] + eps)
    y = (y - p["mean"][None, :, None, None]) * scale[None, :, None, None] \
        + p["beta"][None, :, None, None]
    if relu:
        y = jnp.maximum(y, 0.0)
    return y


def stem_pyramid_ref(x_nchw, params):
    x = _ref_layer(x_nchw, params["l1"], 2, True)
    x = _ref_layer(x, params["l2"], 2, True)
    x = _ref_layer(x, params["l3"], 1, False)
    return x


# ----------------------------------------------------------------------------
# Deterministic parameter init
# ----------------------------------------------------------------------------
def make_params(key, in_dim, out_dim):
    mid = out_dim // 2

    def layer(k, cin, cout):
        kw, kb, kg, kbe, km, kv = jax.random.split(k, 6)
        fan_in = cin * 9
        return {
            "w": jax.random.normal(kw, (cout, cin, 3, 3), jnp.float32) / np.sqrt(fan_in),
            "b": 0.01 * jax.random.normal(kb, (cout,), jnp.float32),
            "gamma": 1.0 + 0.1 * jax.random.normal(kg, (cout,), jnp.float32),
            "beta": 0.1 * jax.random.normal(kbe, (cout,), jnp.float32),
            "mean": 0.1 * jax.random.normal(km, (cout,), jnp.float32),
            "var": 0.5 + jnp.abs(jax.random.normal(kv, (cout,), jnp.float32)),
        }

    k1, k2, k3 = jax.random.split(key, 3)
    return {
        "l1": layer(k1, in_dim, mid),
        "l2": layer(k2, mid, out_dim),
        "l3": layer(k3, out_dim, out_dim),
    }


if __name__ == "__main__":
    key = jax.random.PRNGKey(0)
    k_x, k_p = jax.random.split(key)

    # Small shapes consistent with the module: N=2, in_dim=3, img=16, out_dim=32.
    N, C_IN, IMG, OUT_DIM = 2, 3, 16, 32
    x = jax.random.normal(k_x, (N, C_IN, IMG, IMG), jnp.float32)
    params = make_params(k_p, C_IN, OUT_DIM)

    fwd = jax.jit(stem_pyramid_forward)
    out = jax.block_until_ready(fwd(x, params))

    # Silent correctness check against a pure-JAX (f32) reference.
    # Tolerance accounts for bf16 MXU operands inside the kernel.
    ref = jax.block_until_ready(stem_pyramid_ref(x, params))
    assert out.shape == (N, OUT_DIM, IMG // 4, IMG // 4), out.shape
    np.testing.assert_allclose(np.asarray(out), np.asarray(ref), rtol=2e-2, atol=2e-2)

    print("KERNEL_OK")
</pallas_src>

<mosaic_0001>
module attributes {stable_mosaic.version = 11 : i64} {
  func.func @_stem_kernel(%arg0: i32, %arg1: memref<1x4x90x3xf32, #tpu.memory_space<vmem>>, %arg2: memref<9x3x16xbf16, #tpu.memory_space<vmem>>, %arg3: memref<9x16x32xbf16, #tpu.memory_space<vmem>>, %arg4: memref<9x32x32xbf16, #tpu.memory_space<vmem>>, %arg5: memref<1x16xf32, #tpu.memory_space<vmem>>, %arg6: memref<1x32xf32, #tpu.memory_space<vmem>>, %arg7: memref<1x32xf32, #tpu.memory_space<vmem>>, %arg8: memref<1x4x4x32xf32, #tpu.memory_space<vmem>>, %arg9: memref<2x60x16xf32, #tpu.memory_space<vmem>>, %arg10: memref<42x32xf32, #tpu.memory_space<vmem>>) attributes {dimension_semantics = [#tpu.dimension_semantics<parallel>], iteration_bounds = array<i64: 2>, scalar_prefetch = 0 : i64, scratch_operands = 2 : i64, tpu.core_type = #tpu.core_type<tc>, window_params = [{transform_indices = @transform_0, window_bounds = array<i64: 1, 4, 90, 3>}, {pipeline_mode = #tpu.pipeline_mode<synchronous>, transform_indices = @transform_1, window_bounds = array<i64: 9, 3, 16>}, {pipeline_mode = #tpu.pipeline_mode<synchronous>, transform_indices = @transform_2, window_bounds = array<i64: 9, 16, 32>}, {pipeline_mode = #tpu.pipeline_mode<synchronous>, transform_indices = @transform_3, window_bounds = array<i64: 9, 32, 32>}, {pipeline_mode = #tpu.pipeline_mode<synchronous>, transform_indices = @transform_4, window_bounds = array<i64: 1, 16>}, {pipeline_mode = #tpu.pipeline_mode<synchronous>, transform_indices = @transform_5, window_bounds = array<i64: 1, 32>}, {pipeline_mode = #tpu.pipeline_mode<synchronous>, transform_indices = @transform_6, window_bounds = array<i64: 1, 32>}, {transform_indices = @transform_7, window_bounds = array<i64: 1, 4, 4, 32>}]} {
    %cst = arith.constant 0.000000e+00 : f32
    %0 = vector.broadcast %cst : f32 to vector<2x60x16xf32>
    %c0 = arith.constant 0 : index
    %c0_0 = arith.constant 0 : index
    %c0_1 = arith.constant 0 : index
    %1 = vector.load %arg9[%c0, %c0_0, %c0_1] : memref<2x60x16xf32, #tpu.memory_space<vmem>>, vector<2x60x16xf32>
    tpu.vector_store %arg9[%c0, %c0_0, %c0_1], %0 {strides = array<i32>} : memref<2x60x16xf32, #tpu.memory_space<vmem>>, vector<2x60x16xf32>,
    %cst_2 = arith.constant 0.000000e+00 : f32
    %2 = vector.broadcast %cst_2 : f32 to vector<42x32xf32>
    %c0_3 = arith.constant 0 : index
    %c0_4 = arith.constant 0 : index
    %3 = vector.load %arg10[%c0_3, %c0_4] : memref<42x32xf32, #tpu.memory_space<vmem>>, vector<42x32xf32>
    tpu.vector_store %arg10[%c0_3, %c0_4], %2 {strides = array<i32>} : memref<42x32xf32, #tpu.memory_space<vmem>>, vector<42x32xf32>,
    %cst_5 = arith.constant 0.000000e+00 : f32
    %4 = vector.broadcast %cst_5 : f32 to vector<72x16xf32>
    %c0_6 = arith.constant 0 : index
    %c0_7 = arith.constant 0 : index
    %c0_8 = arith.constant 0 : index
    %c0_9 = arith.constant 0 : index
    %5 = vector.load %arg1[%c0_6, %c0_7, %c0_8, %c0_9] : memref<1x4x90x3xf32, #tpu.memory_space<vmem>>, vector<1x1x72x3xf32>
    %6 = vector.shape_cast %5 : vector<1x1x72x3xf32> to vector<72x3xf32>
    %7 = arith.truncf %6 : vector<72x3xf32> to vector<72x3xbf16>
    %c0_10 = arith.constant 0 : index
    %c0_11 = arith.constant 0 : index
    %c0_12 = arith.constant 0 : index
    %8 = vector.load %arg2[%c0_10, %c0_11, %c0_12] : memref<9x3x16xbf16, #tpu.memory_space<vmem>>, vector<1x3x16xbf16>
    %9 = vector.shape_cast %8 : vector<1x3x16xbf16> to vector<3x16xbf16>
    %cst_13 = arith.constant dense<0.000000e+00> : vector<72x16xf32>
    %10 = tpu.matmul %7, %9, %cst_13 {dimension_numbers = #tpu.dot_dimension_numbers<[1], [0], [0], [1], [0, 0, 1, 1], [], []>} : vector<72x3xbf16>, vector<3x16xbf16>, vector<72x16xf32> -> vector<72x16xf32>
    %11 = arith.addf %4, %10 : vector<72x16xf32>
    %c0_14 = arith.constant 0 : index
    %c1 = arith.constant 1 : index
    %c0_15 = arith.constant 0 : index
    %c0_16 = arith.constant 0 : index
    %12 = vector.load %arg1[%c0_14, %c1, %c0_15, %c0_16] : memref<1x4x90x3xf32, #tpu.memory_space<vmem>>, vector<1x1x72x3xf32>
    %13 = vector.shape_cast %12 : vector<1x1x72x3xf32> to vector<72x3xf32>
    %14 = arith.truncf %13 : vector<72x3xf32> to vector<72x3xbf16>
    %c1_17 = arith.constant 1 : index
    %c0_18 = arith.constant 0 : index
    %c0_19 = arith.constant 0 : index
    %15 = vector.load %arg2[%c1_17, %c0_18, %c0_19] : memref<9x3x16xbf16, #tpu.memory_space<vmem>>, vector<1x3x16xbf16>
    %16 = vector.shape_cast %15 : vector<1x3x16xbf16> to vector<3x16xbf16>
    %cst_20 = arith.constant dense<0.000000e+00> : vector<72x16xf32>
    %17 = tpu.matmul %14, %16, %cst_20 {dimension_numbers = #tpu.dot_dimension_numbers<[1], [0], [0], [1], [0, 0, 1, 1], [], []>} : vector<72x3xbf16>, vector<3x16xbf16>, vector<72x16xf32> -> vector<72x16xf32>
    %18 = arith.addf %11, %17 : vector<72x16xf32>
    %c0_21 = arith.constant 0 : index
    %c2 = arith.constant 2 : index
    %c0_22 = arith.constant 0 : index
    %c0_23 = arith.constant 0 : index
    %19 = vector.load %arg1[%c0_21, %c2, %c0_22, %c0_23] : memref<1x4x90x3xf32, #tpu.memory_space<vmem>>, vector<1x1x72x3xf32>
    %20 = vector.shape_cast %19 : vector<1x1x72x3xf32> to vector<72x3xf32>
    %21 = arith.truncf %20 : vector<72x3xf32> to vector<72x3xbf16>
    %c2_24 = arith.constant 2 : index
    %c0_25 = arith.constant 0 : index
    %c0_26 = arith.constant 0 : index
    %22 = vector.load %arg2[%c2_24, %c0_25, %c0_26] : memref<9x3x16xbf16, #tpu.memory_space<vmem>>, vector<1x3x16xbf16>
    %23 = vector.shape_cast %22 : vector<1x3x16xbf16> to vector<3x16xbf16>
    %cst_27 = arith.constant dense<0.000000e+00> : vector<72x16xf32>
    %24 = tpu.matmul %21, %23, %cst_27 {dimension_numbers = #tpu.dot_dimension_numbers<[1], [0], [0], [1], [0, 0, 1, 1], [], []>} : vector<72x3xbf16>, vector<3x16xbf16>, vector<72x16xf32> -> vector<72x16xf32>
    %25 = arith.addf %18, %24 : vector<72x16xf32>
    %c0_28 = arith.constant 0 : index
    %c2_29 = arith.constant 2 : index
    %c4 = arith.constant 4 : index
    %c0_30 = arith.constant 0 : index
    %26 = vector.load %arg1[%c0_28, %c2_29, %c4, %c0_30] : memref<1x4x90x3xf32, #tpu.memory_space<vmem>>, vector<1x1x72x3xf32>
    %27 = vector.shape_cast %26 : vector<1x1x72x3xf32> to vector<72x3xf32>
    %28 = arith.truncf %27 : vector<72x3xf32> to vector<72x3xbf16>
    %c3 = arith.constant 3 : index
    %c0_31 = arith.constant 0 : index
    %c0_32 = arith.constant 0 : index
    %29 = vector.load %arg2[%c3, %c0_31, %c0_32] : memref<9x3x16xbf16, #tpu.memory_space<vmem>>, vector<1x3x16xbf16>
    %30 = vector.shape_cast %29 : vector<1x3x16xbf16> to vector<3x16xbf16>
    %cst_33 = arith.constant dense<0.000000e+00> : vector<72x16xf32>
    %31 = tpu.matmul %28, %30, %cst_33 {dimension_numbers = #tpu.dot_dimension_numbers<[1], [0], [0], [1], [0, 0, 1, 1], [], []>} : vector<72x3xbf16>, vector<3x16xbf16>, vector<72x16xf32> -> vector<72x16xf32>
    %32 = arith.addf %25, %31 : vector<72x16xf32>
    %c0_34 = arith.constant 0 : index
    %c3_35 = arith.constant 3 : index
    %c4_36 = arith.constant 4 : index
    %c0_37 = arith.constant 0 : index
    %33 = vector.load %arg1[%c0_34, %c3_35, %c4_36, %c0_37] : memref<1x4x90x3xf32, #tpu.memory_space<vmem>>, vector<1x1x72x3xf32>
    %34 = vector.shape_cast %33 : vector<1x1x72x3xf32> to vector<72x3xf32>
    %35 = arith.truncf %34 : vector<72x3xf32> to vector<72x3xbf16>
    %c4_38 = arith.constant 4 : index
    %c0_39 = arith.constant 0 : index
    %c0_40 = arith.constant 0 : index
    %36 = vector.load %arg2[%c4_38, %c0_39, %c0_40] : memref<9x3x16xbf16, #tpu.memory_space<vmem>>, vector<1x3x16xbf16>
    %37 = vector.shape_cast %36 : vector<1x3x16xbf16> to vector<3x16xbf16>
    %cst_41 = arith.constant dense<0.000000e+00> : vector<72x16xf32>
    %38 = tpu.matmul %35, %37, %cst_41 {dimension_numbers = #tpu.dot_dimension_numbers<[1], [0], [0], [1], [0, 0, 1, 1], [], []>} : vector<72x3xbf16>, vector<3x16xbf16>, vector<72x16xf32> -> vector<72x16xf32>
    %39 = arith.addf %32, %38 : vector<72x16xf32>
    %c0_42 = arith.constant 0 : index
    %c0_43 = arith.constant 0 : index
    %c5 = arith.constant 5 : index
    %c0_44 = arith.constant 0 : index
    %40 = vector.load %arg1[%c0_42, %c0_43, %c5, %c0_44] : memref<1x4x90x3xf32, #tpu.memory_space<vmem>>, vector<1x1x72x3xf32>
    %41 = vector.shape_cast %40 : vector<1x1x72x3xf32> to vector<72x3xf32>
    %42 = arith.truncf %41 : vector<72x3xf32> to vector<72x3xbf16>
    %c5_45 = arith.constant 5 : index
    %c0_46 = arith.constant 0 : index
    %c0_47 = arith.constant 0 : index
    %43 = vector.load %arg2[%c5_45, %c0_46, %c0_47] : memref<9x3x16xbf16, #tpu.memory_space<vmem>>, vector<1x3x16xbf16>
    %44 = vector.shape_cast %43 : vector<1x3x16xbf16> to vector<3x16xbf16>
    %cst_48 = arith.constant dense<0.000000e+00> : vector<72x16xf32>
    %45 = tpu.matmul %42, %44, %cst_48 {dimension_numbers = #tpu.dot_dimension_numbers<[1], [0], [0], [1], [0, 0, 1, 1], [], []>} : vector<72x3xbf16>, vector<3x16xbf16>, vector<72x16xf32> -> vector<72x16xf32>
    %46 = arith.addf %39, %45 : vector<72x16xf32>
    %c0_49 = arith.constant 0 : index
    %c0_50 = arith.constant 0 : index
    %c9 = arith.constant 9 : index
    %c0_51 = arith.constant 0 : index
    %47 = vector.load %arg1[%c0_49, %c0_50, %c9, %c0_51] : memref<1x4x90x3xf32, #tpu.memory_space<vmem>>, vector<1x1x72x3xf32>
    %48 = vector.shape_cast %47 : vector<1x1x72x3xf32> to vector<72x3xf32>
    %49 = arith.truncf %48 : vector<72x3xf32> to vector<72x3xbf16>
    %c6 = arith.constant 6 : index
    %c0_52 = arith.constant 0 : index
    %c0_53 = arith.constant 0 : index
    %50 = vector.load %arg2[%c6, %c0_52, %c0_53] : memref<9x3x16xbf16, #tpu.memory_space<vmem>>, vector<1x3x16xbf16>
    %51 = vector.shape_cast %50 : vector<1x3x16xbf16> to vector<3x16xbf16>
    %cst_54 = arith.constant dense<0.000000e+00> : vector<72x16xf32>
    %52 = tpu.matmul %49, %51, %cst_54 {dimension_numbers = #tpu.dot_dimension_numbers<[1], [0], [0], [1], [0, 0, 1, 1], [], []>} : vector<72x3xbf16>, vector<3x16xbf16>, vector<72x16xf32> -> vector<72x16xf32>
    %53 = arith.addf %46, %52 : vector<72x16xf32>
    %c0_55 = arith.constant 0 : index
    %c1_56 = arith.constant 1 : index
    %c9_57 = arith.constant 9 : index
    %c0_58 = arith.constant 0 : index
    %54 = vector.load %arg1[%c0_55, %c1_56, %c9_57, %c0_58] : memref<1x4x90x3xf32, #tpu.memory_space<vmem>>, vector<1x1x72x3xf32>
    %55 = vector.shape_cast %54 : vector<1x1x72x3xf32> to vector<72x3xf32>
    %56 = arith.truncf %55 : vector<72x3xf32> to vector<72x3xbf16>
    %c7 = arith.constant 7 : index
    %c0_59 = arith.constant 0 : index
    %c0_60 = arith.constant 0 : index
    %57 = vector.load %arg2[%c7, %c0_59, %c0_60] : memref<9x3x16xbf16, #tpu.memory_space<vmem>>, vector<1x3x16xbf16>
    %58 = vector.shape_cast %57 : vector<1x3x16xbf16> to vector<3x16xbf16>
    %cst_61 = arith.constant dense<0.000000e+00> : vector<72x16xf32>
    %59 = tpu.matmul %56, %58, %cst_61 {dimension_numbers = #tpu.dot_dimension_numbers<[1], [0], [0], [1], [0, 0, 1, 1], [], []>} : vector<72x3xbf16>, vector<3x16xbf16>, vector<72x16xf32> -> vector<72x16xf32>
    %60 = arith.addf %53, %59 : vector<72x16xf32>
    %c0_62 = arith.constant 0 : index
    %c2_63 = arith.constant 2 : index
    %c9_64 = arith.constant 9 : index
    %c0_65 = arith.constant 0 : index
    %61 = vector.load %arg1[%c0_62, %c2_63, %c9_64, %c0_65] : memref<1x4x90x3xf32, #tpu.memory_space<vmem>>, vector<1x1x72x3xf32>
    %62 = vector.shape_cast %61 : vector<1x1x72x3xf32> to vector<72x3xf32>
    %63 = arith.truncf %62 : vector<72x3xf32> to vector<72x3xbf16>
    %c8 = arith.constant 8 : index
    %c0_66 = arith.constant 0 : index
    %c0_67 = arith.constant 0 : index
    %64 = vector.load %arg2[%c8, %c0_66, %c0_67] : memref<9x3x16xbf16, #tpu.memory_space<vmem>>, vector<1x3x16xbf16>
    %65 = vector.shape_cast %64 : vector<1x3x16xbf16> to vector<3x16xbf16>
    %cst_68 = arith.constant dense<0.000000e+00> : vector<72x16xf32>
    %66 = tpu.matmul %63, %65, %cst_68 {dimension_numbers = #tpu.dot_dimension_numbers<[1], [0], [0], [1], [0, 0, 1, 1], [], []>} : vector<72x3xbf16>, vector<3x16xbf16>, vector<72x16xf32> -> vector<72x16xf32>
    %67 = arith.addf %60, %66 : vector<72x16xf32>
    %c0_69 = arith.constant 0 : index
    %c0_70 = arith.constant 0 : index
    %68 = vector.load %arg5[%c0_69, %c0_70] : memref<1x16xf32, #tpu.memory_space<vmem>>, vector<1x16xf32>
    %69 = vector.broadcast %68 : vector<1x16xf32> to vector<72x16xf32>
    %70 = arith.addf %67, %69 : vector<72x16xf32>
    %cst_71 = arith.constant 0.000000e+00 : f32
    %71 = vector.broadcast %cst_71 : f32 to vector<72x16xf32>
    %72 = arith.maximumf %70, %71 : vector<72x16xf32>
    %73 = vector.extract_strided_slice %72 {offsets = [0, 0], sizes = [4, 16], strides = [1, 1]} : vector<72x16xf32> to vector<4x16xf32>
    %c1_72 = arith.constant 1 : index
    %c5_73 = arith.constant 5 : index
    %c0_74 = arith.constant 0 : index
    %74 = vector.load %arg9[%c1_72, %c5_73, %c0_74] : memref<2x60x16xf32, #tpu.memory_space<vmem>>, vector<1x4x16xf32>
    %75 = vector.shape_cast %74 : vector<1x4x16xf32> to vector<4x16xf32>
    %76 = vector.shape_cast %73 : vector<4x16xf32> to vector<1x4x16xf32>
    tpu.vector_store %arg9[%c1_72, %c5_73, %c0_74], %76 {strides = array<i32>} : memref<2x60x16xf32, #tpu.memory_space<vmem>>, vector<1x4x16xf32>,
    %77 = vector.extract_strided_slice %72 {offsets = [9, 0], sizes = [4, 16], strides = [1, 1]} : vector<72x16xf32> to vector<4x16xf32>
    %c1_75 = arith.constant 1 : index
    %c10 = arith.constant 10 : index
    %c0_76 = arith.constant 0 : index
    %78 = vector.load %arg9[%c1_75, %c10, %c0_76] : memref<2x60x16xf32, #tpu.memory_space<vmem>>, vector<1x4x16xf32>
    %79 = vector.shape_cast %78 : vector<1x4x16xf32> to vector<4x16xf32>
    %80 = vector.shape_cast %77 : vector<4x16xf32> to vector<1x4x16xf32>
    tpu.vector_store %arg9[%c1_75, %c10, %c0_76], %80 {strides = array<i32>} : memref<2x60x16xf32, #tpu.memory_space<vmem>>, vector<1x4x16xf32>,
    %81 = vector.extract_strided_slice %72 {offsets = [18, 0], sizes = [4, 16], strides = [1, 1]} : vector<72x16xf32> to vector<4x16xf32>
    %c1_77 = arith.constant 1 : index
    %c15 = arith.constant 15 : index
    %c0_78 = arith.constant 0 : index
    %82 = vector.load %arg9[%c1_77, %c15, %c0_78] : memref<2x60x16xf32, #tpu.memory_space<vmem>>, vector<1x4x16xf32>
    %83 = vector.shape_cast %82 : vector<1x4x16xf32> to vector<4x16xf32>
    %84 = vector.shape_cast %81 : vector<4x16xf32> to vector<1x4x16xf32>
    tpu.vector_store %arg9[%c1_77, %c15, %c0_78], %84 {strides = array<i32>} : memref<2x60x16xf32, #tpu.memory_space<vmem>>, vector<1x4x16xf32>,
    %85 = vector.extract_strided_slice %72 {offsets = [27, 0], sizes = [4, 16], strides = [1, 1]} : vector<72x16xf32> to vector<4x16xf32>
    %c1_79 = arith.constant 1 : index
    %c20 = arith.constant 20 : index
    %c0_80 = arith.constant 0 : index
    %86 = vector.load %arg9[%c1_79, %c20, %c0_80] : memref<2x60x16xf32, #tpu.memory_space<vmem>>, vector<1x4x16xf32>
    %87 = vector.shape_cast %86 : vector<1x4x16xf32> to vector<4x16xf32>
    %88 = vector.shape_cast %85 : vector<4x16xf32> to vector<1x4x16xf32>
    tpu.vector_store %arg9[%c1_79, %c20, %c0_80], %88 {strides = array<i32>} : memref<2x60x16xf32, #tpu.memory_space<vmem>>, vector<1x4x16xf32>,
    %89 = vector.extract_strided_slice %72 {offsets = [36, 0], sizes = [4, 16], strides = [1, 1]} : vector<72x16xf32> to vector<4x16xf32>
    %c1_81 = arith.constant 1 : index
    %c25 = arith.constant 25 : index
    %c0_82 = arith.constant 0 : index
    %90 = vector.load %arg9[%c1_81, %c25, %c0_82] : memref<2x60x16xf32, #tpu.memory_space<vmem>>, vector<1x4x16xf32>
    %91 = vector.shape_cast %90 : vector<1x4x16xf32> to vector<4x16xf32>
    %92 = vector.shape_cast %89 : vector<4x16xf32> to vector<1x4x16xf32>
    tpu.vector_store %arg9[%c1_81, %c25, %c0_82], %92 {strides = array<i32>} : memref<2x60x16xf32, #tpu.memory_space<vmem>>, vector<1x4x16xf32>,
    %93 = vector.extract_strided_slice %72 {offsets = [45, 0], sizes = [4, 16], strides = [1, 1]} : vector<72x16xf32> to vector<4x16xf32>
    %c1_83 = arith.constant 1 : index
    %c30 = arith.constant 30 : index
    %c0_84 = arith.constant 0 : index
    %94 = vector.load %arg9[%c1_83, %c30, %c0_84] : memref<2x60x16xf32, #tpu.memory_space<vmem>>, vector<1x4x16xf32>
    %95 = vector.shape_cast %94 : vector<1x4x16xf32> to vector<4x16xf32>
    %96 = vector.shape_cast %93 : vector<4x16xf32> to vector<1x4x16xf32>
    tpu.vector_store %arg9[%c1_83, %c30, %c0_84], %96 {strides = array<i32>} : memref<2x60x16xf32, #tpu.memory_space<vmem>>, vector<1x4x16xf32>,
    %97 = vector.extract_strided_slice %72 {offsets = [54, 0], sizes = [4, 16], strides = [1, 1]} : vector<72x16xf32> to vector<4x16xf32>
    %c1_85 = arith.constant 1 : index
    %c35 = arith.constant 35 : index
    %c0_86 = arith.constant 0 : index
    %98 = vector.load %arg9[%c1_85, %c35, %c0_86] : memref<2x60x16xf32, #tpu.memory_space<vmem>>, vector<1x4x16xf32>
    %99 = vector.shape_cast %98 : vector<1x4x16xf32> to vector<4x16xf32>
    %100 = vector.shape_cast %97 : vector<4x16xf32> to vector<1x4x16xf32>
    tpu.vector_store %arg9[%c1_85, %c35, %c0_86], %100 {strides = array<i32>} : memref<2x60x16xf32, #tpu.memory_space<vmem>>, vector<1x4x16xf32>,
    %101 = vector.extract_strided_slice %72 {offsets = [63, 0], sizes = [4, 16], strides = [1, 1]} : vector<72x16xf32> to vector<4x16xf32>
    %c1_87 = arith.constant 1 : index
    %c40 = arith.constant 40 : index
    %c0_88 = arith.constant 0 : index
    %102 = vector.load %arg9[%c1_87, %c40, %c0_88] : memref<2x60x16xf32, #tpu.memory_space<vmem>>, vector<1x4x16xf32>
    %103 = vector.shape_cast %102 : vector<1x4x16xf32> to vector<4x16xf32>
    %104 = vector.shape_cast %101 : vector<4x16xf32> to vector<1x4x16xf32>
    tpu.vector_store %arg9[%c1_87, %c40, %c0_88], %104 {strides = array<i32>} : memref<2x60x16xf32, #tpu.memory_space<vmem>>, vector<1x4x16xf32>,
    %cst_89 = arith.constant 0.000000e+00 : f32
    %105 = vector.broadcast %cst_89 : f32 to vector<72x16xf32>
    %c0_90 = arith.constant 0 : index
    %c2_91 = arith.constant 2 : index
    %c0_92 = arith.constant 0 : index
    %c0_93 = arith.constant 0 : index
    %106 = vector.load %arg1[%c0_90, %c2_91, %c0_92, %c0_93] : memref<1x4x90x3xf32, #tpu.memory_space<vmem>>, vector<1x1x72x3xf32>
    %107 = vector.shape_cast %106 : vector<1x1x72x3xf32> to vector<72x3xf32>
    %108 = arith.truncf %107 : vector<72x3xf32> to vector<72x3xbf16>
    %c0_94 = arith.constant 0 : index
    %c0_95 = arith.constant 0 : index
    %c0_96 = arith.constant 0 : index
    %109 = vector.load %arg2[%c0_94, %c0_95, %c0_96] : memref<9x3x16xbf16, #tpu.memory_space<vmem>>, vector<1x3x16xbf16>
    %110 = vector.shape_cast %109 : vector<1x3x16xbf16> to vector<3x16xbf16>
    %cst_97 = arith.constant dense<0.000000e+00> : vector<72x16xf32>
    %111 = tpu.matmul %108, %110, %cst_97 {dimension_numbers = #tpu.dot_dimension_numbers<[1], [0], [0], [1], [0, 0, 1, 1], [], []>} : vector<72x3xbf16>, vector<3x16xbf16>, vector<72x16xf32> -> vector<72x16xf32>
    %112 = arith.addf %105, %111 : vector<72x16xf32>
    %c0_98 = arith.constant 0 : index
    %c3_99 = arith.constant 3 : index
    %c0_100 = arith.constant 0 : index
    %c0_101 = arith.constant 0 : index
    %113 = vector.load %arg1[%c0_98, %c3_99, %c0_100, %c0_101] : memref<1x4x90x3xf32, #tpu.memory_space<vmem>>, vector<1x1x72x3xf32>
    %114 = vector.shape_cast %113 : vector<1x1x72x3xf32> to vector<72x3xf32>
    %115 = arith.truncf %114 : vector<72x3xf32> to vector<72x3xbf16>
    %c1_102 = arith.constant 1 : index
    %c0_103 = arith.constant 0 : index
    %c0_104 = arith.constant 0 : index
    %116 = vector.load %arg2[%c1_102, %c0_103, %c0_104] : memref<9x3x16xbf16, #tpu.memory_space<vmem>>, vector<1x3x16xbf16>
    %117 = vector.shape_cast %116 : vector<1x3x16xbf16> to vector<3x16xbf16>
    %cst_105 = arith.constant dense<0.000000e+00> : vector<72x16xf32>
    %118 = tpu.matmul %115, %117, %cst_105 {dimension_numbers = #tpu.dot_dimension_numbers<[1], [0], [0], [1], [0, 0, 1, 1], [], []>} : vector<72x3xbf16>, vector<3x16xbf16>, vector<72x16xf32> -> vector<72x16xf32>
    %119 = arith.addf %112, %118 : vector<72x16xf32>
    %c0_106 = arith.constant 0 : index
    %c0_107 = arith.constant 0 : index
    %c1_108 = arith.constant 1 : index
    %c0_109 = arith.constant 0 : index
    %120 = vector.load %arg1[%c0_106, %c0_107, %c1_108, %c0_109] : memref<1x4x90x3xf32, #tpu.memory_space<vmem>>, vector<1x1x72x3xf32>
    %121 = vector.shape_cast %120 : vector<1x1x72x3xf32> to vector<72x3xf32>
    %122 = arith.truncf %121 : vector<72x3xf32> to vector<72x3xbf16>
    %c2_110 = arith.constant 2 : index
    %c0_111 = arith.constant 0 : index
    %c0_112 = arith.constant 0 : index
    %123 = vector.load %arg2[%c2_110, %c0_111, %c0_112] : memref<9x3x16xbf16, #tpu.memory_space<vmem>>, vector<1x3x16xbf16>
    %124 = vector.shape_cast %123 : vector<1x3x16xbf16> to vector<3x16xbf16>
    %cst_113 = arith.constant dense<0.000000e+00> : vector<72x16xf32>
    %125 = tpu.matmul %122, %124, %cst_113 {dimension_numbers = #tpu.dot_dimension_numbers<[1], [0], [0], [1], [0, 0, 1, 1], [], []>} : vector<72x3xbf16>, vector<3x16xbf16>, vector<72x16xf32> -> vector<72x16xf32>
    %126 = arith.addf %119, %125 : vector<72x16xf32>
    %c0_114 = arith.constant 0 : index
    %c0_115 = arith.constant 0 : index
    %c5_116 = arith.constant 5 : index
    %c0_117 = arith.constant 0 : index
    %127 = vector.load %arg1[%c0_114, %c0_115, %c5_116, %c0_117] : memref<1x4x90x3xf32, #tpu.memory_space<vmem>>, vector<1x1x72x3xf32>
    %128 = vector.shape_cast %127 : vector<1x1x72x3xf32> to vector<72x3xf32>
    %129 = arith.truncf %128 : vector<72x3xf32> to vector<72x3xbf16>
    %c3_118 = arith.constant 3 : index
    %c0_119 = arith.constant 0 : index
    %c0_120 = arith.constant 0 : index
    %130 = vector.load %arg2[%c3_118, %c0_119, %c0_120] : memref<9x3x16xbf16, #tpu.memory_space<vmem>>, vector<1x3x16xbf16>
    %131 = vector.shape_cast %130 : vector<1x3x16xbf16> to vector<3x16xbf16>
    %cst_121 = arith.constant dense<0.000000e+00> : vector<72x16xf32>
    %132 = tpu.matmul %129, %131, %cst_121 {dimension_numbers = #tpu.dot_dimension_numbers<[1], [0], [0], [1], [0, 0, 1, 1], [], []>} : vector<72x3xbf16>, vector<3x16xbf16>, vector<72x16xf32> -> vector<72x16xf32>
    %133 = arith.addf %126, %132 : vector<72x16xf32>
    %c0_122 = arith.constant 0 : index
    %c1_123 = arith.constant 1 : index
    %c5_124 = arith.constant 5 : index
    %c0_125 = arith.constant 0 : index
    %134 = vector.load %arg1[%c0_122, %c1_123, %c5_124, %c0_125] : memref<1x4x90x3xf32, #tpu.memory_space<vmem>>, vector<1x1x72x3xf32>
    %135 = vector.shape_cast %134 : vector<1x1x72x3xf32> to vector<72x3xf32>
    %136 = arith.truncf %135 : vector<72x3xf32> to vector<72x3xbf16>
    %c4_126 = arith.constant 4 : index
    %c0_127 = arith.constant 0 : index
    %c0_128 = arith.constant 0 : index
    %137 = vector.load %arg2[%c4_126, %c0_127, %c0_128] : memref<9x3x16xbf16, #tpu.memory_space<vmem>>, vector<1x3x16xbf16>
    %138 = vector.shape_cast %137 : vector<1x3x16xbf16> to vector<3x16xbf16>
    %cst_129 = arith.constant dense<0.000000e+00> : vector<72x16xf32>
    %139 = tpu.matmul %136, %138, %cst_129 {dimension_numbers = #tpu.dot_dimension_numbers<[1], [0], [0], [1], [0, 0, 1, 1], [], []>} : vector<72x3xbf16>, vector<3x16xbf16>, vector<72x16xf32> -> vector<72x16xf32>
    %140 = arith.addf %133, %139 : vector<72x16xf32>
    %c0_130 = arith.constant 0 : index
    %c2_131 = arith.constant 2 : index
    %c5_132 = arith.constant 5 : index
    %c0_133 = arith.constant 0 : index
    %141 = vector.load %arg1[%c0_130, %c2_131, %c5_132, %c0_133] : memref<1x4x90x3xf32, #tpu.memory_space<vmem>>, vector<1x1x72x3xf32>
    %142 = vector.shape_cast %141 : vector<1x1x72x3xf32> to vector<72x3xf32>
    %143 = arith.truncf %142 : vector<72x3xf32> to vector<72x3xbf16>
    %c5_134 = arith.constant 5 : index
    %c0_135 = arith.constant 0 : index
    %c0_136 = arith.constant 0 : index
    %144 = vector.load %arg2[%c5_134, %c0_135, %c0_136] : memref<9x3x16xbf16, #tpu.memory_space<vmem>>, vector<1x3x16xbf16>
    %145 = vector.shape_cast %144 : vector<1x3x16xbf16> to vector<3x16xbf16>
    %cst_137 = arith.constant dense<0.000000e+00> : vector<72x16xf32>
    %146 = tpu.matmul %143, %145, %cst_137 {dimension_numbers = #tpu.dot_dimension_numbers<[1], [0], [0], [1], [0, 0, 1, 1], [], []>} : vector<72x3xbf16>, vector<3x16xbf16>, vector<72x16xf32> -> vector<72x16xf32>
    %147 = arith.addf %140, %146 : vector<72x16xf32>
    %c0_138 = arith.constant 0 : index
    %c2_139 = arith.constant 2 : index
    %c9_140 = arith.constant 9 : index
    %c0_141 = arith.constant 0 : index
    %148 = vector.load %arg1[%c0_138, %c2_139, %c9_140, %c0_141] : memref<1x4x90x3xf32, #tpu.memory_space<vmem>>, vector<1x1x72x3xf32>
    %149 = vector.shape_cast %148 : vector<1x1x72x3xf32> to vector<72x3xf32>
    %150 = arith.truncf %149 : vector<72x3xf32> to vector<72x3xbf16>
    %c6_142 = arith.constant 6 : index
    %c0_143 = arith.constant 0 : index
    %c0_144 = arith.constant 0 : index
    %151 = vector.load %arg2[%c6_142, %c0_143, %c0_144] : memref<9x3x16xbf16, #tpu.memory_space<vmem>>, vector<1x3x16xbf16>
    %152 = vector.shape_cast %151 : vector<1x3x16xbf16> to vector<3x16xbf16>
    %cst_145 = arith.constant dense<0.000000e+00> : vector<72x16xf32>
    %153 = tpu.matmul %150, %152, %cst_145 {dimension_numbers = #tpu.dot_dimension_numbers<[1], [0], [0], [1], [0, 0, 1, 1], [], []>} : vector<72x3xbf16>, vector<3x16xbf16>, vector<72x16xf32> -> vector<72x16xf32>
    %154 = arith.addf %147, %153 : vector<72x16xf32>
    %c0_146 = arith.constant 0 : index
    %c3_147 = arith.constant 3 : index
    %c9_148 = arith.constant 9 : index
    %c0_149 = arith.constant 0 : index
    %155 = vector.load %arg1[%c0_146, %c3_147, %c9_148, %c0_149] : memref<1x4x90x3xf32, #tpu.memory_space<vmem>>, vector<1x1x72x3xf32>
    %156 = vector.shape_cast %155 : vector<1x1x72x3xf32> to vector<72x3xf32>
    %157 = arith.truncf %156 : vector<72x3xf32> to vector<72x3xbf16>
    %c7_150 = arith.constant 7 : index
    %c0_151 = arith.constant 0 : index
    %c0_152 = arith.constant 0 : index
    %158 = vector.load %arg2[%c7_150, %c0_151, %c0_152] : memref<9x3x16xbf16, #tpu.memory_space<vmem>>, vector<1x3x16xbf16>
    %159 = vector.shape_cast %158 : vector<1x3x16xbf16> to vector<3x16xbf16>
    %cst_153 = arith.constant dense<0.000000e+00> : vector<72x16xf32>
    %160 = tpu.matmul %157, %159, %cst_153 {dimension_numbers = #tpu.dot_dimension_numbers<[1], [0], [0], [1], [0, 0, 1, 1], [], []>} : vector<72x3xbf16>, vector<3x16xbf16>, vector<72x16xf32> -> vector<72x16xf32>
    %161 = arith.addf %154, %160 : vector<72x16xf32>
    %c0_154 = arith.constant 0 : index
    %c0_155 = arith.constant 0 : index
    %c10_156 = arith.constant 10 : index
    %c0_157 = arith.constant 0 : index
    %162 = vector.load %arg1[%c0_154, %c0_155, %c10_156, %c0_157] : memref<1x4x90x3xf32, #tpu.memory_space<vmem>>, vector<1x1x72x3xf32>
    %163 = vector.shape_cast %162 : vector<1x1x72x3xf32> to vector<72x3xf32>
    %164 = arith.truncf %163 : vector<72x3xf32> to vector<72x3xbf16>
    %c8_158 = arith.constant 8 : index
    %c0_159 = arith.constant 0 : index
    %c0_160 = arith.constant 0 : index
    %165 = vector.load %arg2[%c8_158, %c0_159, %c0_160] : memref<9x3x16xbf16, #tpu.memory_space<vmem>>, vector<1x3x16xbf16>
    %166 = vector.shape_cast %165 : vector<1x3x16xbf16> to vector<3x16xbf16>
    %cst_161 = arith.constant dense<0.000000e+00> : vector<72x16xf32>
    %167 = tpu.matmul %164, %166, %cst_161 {dimension_numbers = #tpu.dot_dimension_numbers<[1], [0], [0], [1], [0, 0, 1, 1], [], []>} : vector<72x3xbf16>, vector<3x16xbf16>, vector<72x16xf32> -> vector<72x16xf32>
    %168 = arith.addf %161, %167 : vector<72x16xf32>
    %c0_162 = arith.constant 0 : index
    %c0_163 = arith.constant 0 : index
    %169 = vector.load %arg5[%c0_162, %c0_163] : memref<1x16xf32, #tpu.memory_space<vmem>>, vector<1x16xf32>
    %170 = vector.broadcast %169 : vector<1x16xf32> to vector<72x16xf32>
    %171 = arith.addf %168, %170 : vector<72x16xf32>
    %cst_164 = arith.constant 0.000000e+00 : f32
    %172 = vector.broadcast %cst_164 : f32 to vector<72x16xf32>
    %173 = arith.maximumf %171, %172 : vector<72x16xf32>
    %174 = vector.extract_strided_slice %173 {offsets = [0, 0], sizes = [4, 16], strides = [1, 1]} : vector<72x16xf32> to vector<4x16xf32>
    %c0_165 = arith.constant 0 : index
    %c6_166 = arith.constant 6 : index
    %c0_167 = arith.constant 0 : index
    %175 = vector.load %arg9[%c0_165, %c6_166, %c0_167] : memref<2x60x16xf32, #tpu.memory_space<vmem>>, vector<1x4x16xf32>
    %176 = vector.shape_cast %175 : vector<1x4x16xf32> to vector<4x16xf32>
    %177 = vector.shape_cast %174 : vector<4x16xf32> to vector<1x4x16xf32>
    tpu.vector_store %arg9[%c0_165, %c6_166, %c0_167], %177 {strides = array<i32>} : memref<2x60x16xf32, #tpu.memory_space<vmem>>, vector<1x4x16xf32>,
    %178 = vector.extract_strided_slice %173 {offsets = [9, 0], sizes = [4, 16], strides = [1, 1]} : vector<72x16xf32> to vector<4x16xf32>
    %c0_168 = arith.constant 0 : index
    %c11 = arith.constant 11 : index
    %c0_169 = arith.constant 0 : index
    %179 = vector.load %arg9[%c0_168, %c11, %c0_169] : memref<2x60x16xf32, #tpu.memory_space<vmem>>, vector<1x4x16xf32>
    %180 = vector.shape_cast %179 : vector<1x4x16xf32> to vector<4x16xf32>
    %181 = vector.shape_cast %178 : vector<4x16xf32> to vector<1x4x16xf32>
    tpu.vector_store %arg9[%c0_168, %c11, %c0_169], %181 {strides = array<i32>} : memref<2x60x16xf32, #tpu.memory_space<vmem>>, vector<1x4x16xf32>,
    %182 = vector.extract_strided_slice %173 {offsets = [18, 0], sizes = [4, 16], strides = [1, 1]} : vector<72x16xf32> to vector<4x16xf32>
    %c0_170 = arith.constant 0 : index
    %c16 = arith.constant 16 : index
    %c0_171 = arith.constant 0 : index
    %183 = vector.load %arg9[%c0_170, %c16, %c0_171] : memref<2x60x16xf32, #tpu.memory_space<vmem>>, vector<1x4x16xf32>
    %184 = vector.shape_cast %183 : vector<1x4x16xf32> to vector<4x16xf32>
    %185 = vector.shape_cast %182 : vector<4x16xf32> to vector<1x4x16xf32>
    tpu.vector_store %arg9[%c0_170, %c16, %c0_171], %185 {strides = array<i32>} : memref<2x60x16xf32, #tpu.memory_space<vmem>>, vector<1x4x16xf32>,
    %186 = vector.extract_strided_slice %173 {offsets = [27, 0], sizes = [4, 16], strides = [1, 1]} : vector<72x16xf32> to vector<4x16xf32>
    %c0_172 = arith.constant 0 : index
    %c21 = arith.constant 21 : index
    %c0_173 = arith.constant 0 : index
    %187 = vector.load %arg9[%c0_172, %c21, %c0_173] : memref<2x60x16xf32, #tpu.memory_space<vmem>>, vector<1x4x16xf32>
    %188 = vector.shape_cast %187 : vector<1x4x16xf32> to vector<4x16xf32>
    %189 = vector.shape_cast %186 : vector<4x16xf32> to vector<1x4x16xf32>
    tpu.vector_store %arg9[%c0_172, %c21, %c0_173], %189 {strides = array<i32>} : memref<2x60x16xf32, #tpu.memory_space<vmem>>, vector<1x4x16xf32>,
    %190 = vector.extract_strided_slice %173 {offsets = [36, 0], sizes = [4, 16], strides = [1, 1]} : vector<72x16xf32> to vector<4x16xf32>
    %c0_174 = arith.constant 0 : index
    %c26 = arith.constant 26 : index
    %c0_175 = arith.constant 0 : index
    %191 = vector.load %arg9[%c0_174, %c26, %c0_175] : memref<2x60x16xf32, #tpu.memory_space<vmem>>, vector<1x4x16xf32>
    %192 = vector.shape_cast %191 : vector<1x4x16xf32> to vector<4x16xf32>
    %193 = vector.shape_cast %190 : vector<4x16xf32> to vector<1x4x16xf32>
    tpu.vector_store %arg9[%c0_174, %c26, %c0_175], %193 {strides = array<i32>} : memref<2x60x16xf32, #tpu.memory_space<vmem>>, vector<1x4x16xf32>,
    %194 = vector.extract_strided_slice %173 {offsets = [45, 0], sizes = [4, 16], strides = [1, 1]} : vector<72x16xf32> to vector<4x16xf32>
    %c0_176 = arith.constant 0 : index
    %c31 = arith.constant 31 : index
    %c0_177 = arith.constant 0 : index
    %195 = vector.load %arg9[%c0_176, %c31, %c0_177] : memref<2x60x16xf32, #tpu.memory_space<vmem>>, vector<1x4x16xf32>
    %196 = vector.shape_cast %195 : vector<1x4x16xf32> to vector<4x16xf32>
    %197 = vector.shape_cast %194 : vector<4x16xf32> to vector<1x4x16xf32>
    tpu.vector_store %arg9[%c0_176, %c31, %c0_177], %197 {strides = array<i32>} : memref<2x60x16xf32, #tpu.memory_space<vmem>>, vector<1x4x16xf32>,
    %198 = vector.extract_strided_slice %173 {offsets = [54, 0], sizes = [4, 16], strides = [1, 1]} : vector<72x16xf32> to vector<4x16xf32>
    %c0_178 = arith.constant 0 : index
    %c36 = arith.constant 36 : index
    %c0_179 = arith.constant 0 : index
    %199 = vector.load %arg9[%c0_178, %c36, %c0_179] : memref<2x60x16xf32, #tpu.memory_space<vmem>>, vector<1x4x16xf32>
    %200 = vector.shape_cast %199 : vector<1x4x16xf32> to vector<4x16xf32>
    %201 = vector.shape_cast %198 : vector<4x16xf32> to vector<1x4x16xf32>
    tpu.vector_store %arg9[%c0_178, %c36, %c0_179], %201 {strides = array<i32>} : memref<2x60x16xf32, #tpu.memory_space<vmem>>, vector<1x4x16xf32>,
    %202 = vector.extract_strided_slice %173 {offsets = [63, 0], sizes = [4, 16], strides = [1, 1]} : vector<72x16xf32> to vector<4x16xf32>
    %c0_180 = arith.constant 0 : index
    %c41 = arith.constant 41 : index
    %c0_181 = arith.constant 0 : index
    %203 = vector.load %arg9[%c0_180, %c41, %c0_181] : memref<2x60x16xf32, #tpu.memory_space<vmem>>, vector<1x4x16xf32>
    %204 = vector.shape_cast %203 : vector<1x4x16xf32> to vector<4x16xf32>
    %205 = vector.shape_cast %202 : vector<4x16xf32> to vector<1x4x16xf32>
    tpu.vector_store %arg9[%c0_180, %c41, %c0_181], %205 {strides = array<i32>} : memref<2x60x16xf32, #tpu.memory_space<vmem>>, vector<1x4x16xf32>,
    %cst_182 = arith.constant 0.000000e+00 : f32
    %206 = vector.broadcast %cst_182 : f32 to vector<40x32xf32>
    %c0_183 = arith.constant 0 : index
    %c0_184 = arith.constant 0 : index
    %c0_185 = arith.constant 0 : index
    %207 = vector.load %arg9[%c0_183, %c0_184, %c0_185] : memref<2x60x16xf32, #tpu.memory_space<vmem>>, vector<1x40x16xf32>
    %208 = vector.shape_cast %207 : vector<1x40x16xf32> to vector<40x16xf32>
    %209 = arith.truncf %208 : vector<40x16xf32> to vector<40x16xbf16>
    %c0_186 = arith.constant 0 : index
    %c0_187 = arith.constant 0 : index
    %c0_188 = arith.constant 0 : index
    %210 = vector.load %arg3[%c0_186, %c0_187, %c0_188] : memref<9x16x32xbf16, #tpu.memory_space<vmem>>, vector<1x16x32xbf16>
    %211 = vector.shape_cast %210 : vector<1x16x32xbf16> to vector<16x32xbf16>
    %cst_189 = arith.constant dense<0.000000e+00> : vector<40x32xf32>
    %212 = tpu.matmul %209, %211, %cst_189 {dimension_numbers = #tpu.dot_dimension_numbers<[1], [0], [0], [1], [0, 0, 1, 1], [], []>} : vector<40x16xbf16>, vector<16x32xbf16>, vector<40x32xf32> -> vector<40x32xf32>
    %213 = arith.addf %206, %212 : vector<40x32xf32>
    %c1_190 = arith.constant 1 : index
    %c0_191 = arith.constant 0 : index
    %c0_192 = arith.constant 0 : index
    %214 = vector.load %arg9[%c1_190, %c0_191, %c0_192] : memref<2x60x16xf32, #tpu.memory_space<vmem>>, vector<1x40x16xf32>
    %215 = vector.shape_cast %214 : vector<1x40x16xf32> to vector<40x16xf32>
    %216 = arith.truncf %215 : vector<40x16xf32> to vector<40x16xbf16>
    %c1_193 = arith.constant 1 : index
    %c0_194 = arith.constant 0 : index
    %c0_195 = arith.constant 0 : index
    %217 = vector.load %arg3[%c1_193, %c0_194, %c0_195] : memref<9x16x32xbf16, #tpu.memory_space<vmem>>, vector<1x16x32xbf16>
    %218 = vector.shape_cast %217 : vector<1x16x32xbf16> to vector<16x32xbf16>
    %cst_196 = arith.constant dense<0.000000e+00> : vector<40x32xf32>
    %219 = tpu.matmul %216, %218, %cst_196 {dimension_numbers = #tpu.dot_dimension_numbers<[1], [0], [0], [1], [0, 0, 1, 1], [], []>} : vector<40x16xbf16>, vector<16x32xbf16>, vector<40x32xf32> -> vector<40x32xf32>
    %220 = arith.addf %213, %219 : vector<40x32xf32>
    %c0_197 = arith.constant 0 : index
    %c1_198 = arith.constant 1 : index
    %c0_199 = arith.constant 0 : index
    %221 = vector.load %arg9[%c0_197, %c1_198, %c0_199] : memref<2x60x16xf32, #tpu.memory_space<vmem>>, vector<1x40x16xf32>
    %222 = vector.shape_cast %221 : vector<1x40x16xf32> to vector<40x16xf32>
    %223 = arith.truncf %222 : vector<40x16xf32> to vector<40x16xbf16>
    %c2_200 = arith.constant 2 : index
    %c0_201 = arith.constant 0 : index
    %c0_202 = arith.constant 0 : index
    %224 = vector.load %arg3[%c2_200, %c0_201, %c0_202] : memref<9x16x32xbf16, #tpu.memory_space<vmem>>, vector<1x16x32xbf16>
    %225 = vector.shape_cast %224 : vector<1x16x32xbf16> to vector<16x32xbf16>
    %cst_203 = arith.constant dense<0.000000e+00> : vector<40x32xf32>
    %226 = tpu.matmul %223, %225, %cst_203 {dimension_numbers = #tpu.dot_dimension_numbers<[1], [0], [0], [1], [0, 0, 1, 1], [], []>} : vector<40x16xbf16>, vector<16x32xbf16>, vector<40x32xf32> -> vector<40x32xf32>
    %227 = arith.addf %220, %226 : vector<40x32xf32>
    %c0_204 = arith.constant 0 : index
    %c5_205 = arith.constant 5 : index
    %c0_206 = arith.constant 0 : index
    %228 = vector.load %arg9[%c0_204, %c5_205, %c0_206] : memref<2x60x16xf32, #tpu.memory_space<vmem>>, vector<1x40x16xf32>
    %229 = vector.shape_cast %228 : vector<1x40x16xf32> to vector<40x16xf32>
    %230 = arith.truncf %229 : vector<40x16xf32> to vector<40x16xbf16>
    %c3_207 = arith.constant 3 : index
    %c0_208 = arith.constant 0 : index
    %c0_209 = arith.constant 0 : index
    %231 = vector.load %arg3[%c3_207, %c0_208, %c0_209] : memref<9x16x32xbf16, #tpu.memory_space<vmem>>, vector<1x16x32xbf16>
    %232 = vector.shape_cast %231 : vector<1x16x32xbf16> to vector<16x32xbf16>
    %cst_210 = arith.constant dense<0.000000e+00> : vector<40x32xf32>
    %233 = tpu.matmul %230, %232, %cst_210 {dimension_numbers = #tpu.dot_dimension_numbers<[1], [0], [0], [1], [0, 0, 1, 1], [], []>} : vector<40x16xbf16>, vector<16x32xbf16>, vector<40x32xf32> -> vector<40x32xf32>
    %234 = arith.addf %227, %233 : vector<40x32xf32>
    %c1_211 = arith.constant 1 : index
    %c5_212 = arith.constant 5 : index
    %c0_213 = arith.constant 0 : index
    %235 = vector.load %arg9[%c1_211, %c5_212, %c0_213] : memref<2x60x16xf32, #tpu.memory_space<vmem>>, vector<1x40x16xf32>
    %236 = vector.shape_cast %235 : vector<1x40x16xf32> to vector<40x16xf32>
    %237 = arith.truncf %236 : vector<40x16xf32> to vector<40x16xbf16>
    %c4_214 = arith.constant 4 : index
    %c0_215 = arith.constant 0 : index
    %c0_216 = arith.constant 0 : index
    %238 = vector.load %arg3[%c4_214, %c0_215, %c0_216] : memref<9x16x32xbf16, #tpu.memory_space<vmem>>, vector<1x16x32xbf16>
    %239 = vector.shape_cast %238 : vector<1x16x32xbf16> to vector<16x32xbf16>
    %cst_217 = arith.constant dense<0.000000e+00> : vector<40x32xf32>
    %240 = tpu.matmul %237, %239, %cst_217 {dimension_numbers = #tpu.dot_dimension_numbers<[1], [0], [0], [1], [0, 0, 1, 1], [], []>} : vector<40x16xbf16>, vector<16x32xbf16>, vector<40x32xf32> -> vector<40x32xf32>
    %241 = arith.addf %234, %240 : vector<40x32xf32>
    %c0_218 = arith.constant 0 : index
    %c6_219 = arith.constant 6 : index
    %c0_220 = arith.constant 0 : index
    %242 = vector.load %arg9[%c0_218, %c6_219, %c0_220] : memref<2x60x16xf32, #tpu.memory_space<vmem>>, vector<1x40x16xf32>
    %243 = vector.shape_cast %242 : vector<1x40x16xf32> to vector<40x16xf32>
    %244 = arith.truncf %243 : vector<40x16xf32> to vector<40x16xbf16>
    %c5_221 = arith.constant 5 : index
    %c0_222 = arith.constant 0 : index
    %c0_223 = arith.constant 0 : index
    %245 = vector.load %arg3[%c5_221, %c0_222, %c0_223] : memref<9x16x32xbf16, #tpu.memory_space<vmem>>, vector<1x16x32xbf16>
    %246 = vector.shape_cast %245 : vector<1x16x32xbf16> to vector<16x32xbf16>
    %cst_224 = arith.constant dense<0.000000e+00> : vector<40x32xf32>
    %247 = tpu.matmul %244, %246, %cst_224 {dimension_numbers = #tpu.dot_dimension_numbers<[1], [0], [0], [1], [0, 0, 1, 1], [], []>} : vector<40x16xbf16>, vector<16x32xbf16>, vector<40x32xf32> -> vector<40x32xf32>
    %248 = arith.addf %241, %247 : vector<40x32xf32>
    %c0_225 = arith.constant 0 : index
    %c10_226 = arith.constant 10 : index
    %c0_227 = arith.constant 0 : index
    %249 = vector.load %arg9[%c0_225, %c10_226, %c0_227] : memref<2x60x16xf32, #tpu.memory_space<vmem>>, vector<1x40x16xf32>
    %250 = vector.shape_cast %249 : vector<1x40x16xf32> to vector<40x16xf32>
    %251 = arith.truncf %250 : vector<40x16xf32> to vector<40x16xbf16>
    %c6_228 = arith.constant 6 : index
    %c0_229 = arith.constant 0 : index
    %c0_230 = arith.constant 0 : index
    %252 = vector.load %arg3[%c6_228, %c0_229, %c0_230] : memref<9x16x32xbf16, #tpu.memory_space<vmem>>, vector<1x16x32xbf16>
    %253 = vector.shape_cast %252 : vector<1x16x32xbf16> to vector<16x32xbf16>
    %cst_231 = arith.constant dense<0.000000e+00> : vector<40x32xf32>
    %254 = tpu.matmul %251, %253, %cst_231 {dimension_numbers = #tpu.dot_dimension_numbers<[1], [0], [0], [1], [0, 0, 1, 1], [], []>} : vector<40x16xbf16>, vector<16x32xbf16>, vector<40x32xf32> -> vector<40x32xf32>
    %255 = arith.addf %248, %254 : vector<40x32xf32>
    %c1_232 = arith.constant 1 : index
    %c10_233 = arith.constant 10 : index
    %c0_234 = arith.constant 0 : index
    %256 = vector.load %arg9[%c1_232, %c10_233, %c0_234] : memref<2x60x16xf32, #tpu.memory_space<vmem>>, vector<1x40x16xf32>
    %257 = vector.shape_cast %256 : vector<1x40x16xf32> to vector<40x16xf32>
    %258 = arith.truncf %257 : vector<40x16xf32> to vector<40x16xbf16>
    %c7_235 = arith.constant 7 : index
    %c0_236 = arith.constant 0 : index
    %c0_237 = arith.constant 0 : index
    %259 = vector.load %arg3[%c7_235, %c0_236, %c0_237] : memref<9x16x32xbf16, #tpu.memory_space<vmem>>, vector<1x16x32xbf16>
    %260 = vector.shape_cast %259 : vector<1x16x32xbf16> to vector<16x32xbf16>
    %cst_238 = arith.constant dense<0.000000e+00> : vector<40x32xf32>
    %261 = tpu.matmul %258, %260, %cst_238 {dimension_numbers = #tpu.dot_dimension_numbers<[1], [0], [0], [1], [0, 0, 1, 1], [], []>} : vector<40x16xbf16>, vector<16x32xbf16>, vector<40x32xf32> -> vector<40x32xf32>
    %262 = arith.addf %255, %261 : vector<40x32xf32>
    %c0_239 = arith.constant 0 : index
    %c11_240 = arith.constant 11 : index
    %c0_241 = arith.constant 0 : index
    %263 = vector.load %arg9[%c0_239, %c11_240, %c0_241] : memref<2x60x16xf32, #tpu.memory_space<vmem>>, vector<1x40x16xf32>
    %264 = vector.shape_cast %263 : vector<1x40x16xf32> to vector<40x16xf32>
    %265 = arith.truncf %264 : vector<40x16xf32> to vector<40x16xbf16>
    %c8_242 = arith.constant 8 : index
    %c0_243 = arith.constant 0 : index
    %c0_244 = arith.constant 0 : index
    %266 = vector.load %arg3[%c8_242, %c0_243, %c0_244] : memref<9x16x32xbf16, #tpu.memory_space<vmem>>, vector<1x16x32xbf16>
    %267 = vector.shape_cast %266 : vector<1x16x32xbf16> to vector<16x32xbf16>
    %cst_245 = arith.constant dense<0.000000e+00> : vector<40x32xf32>
    %268 = tpu.matmul %265, %267, %cst_245 {dimension_numbers = #tpu.dot_dimension_numbers<[1], [0], [0], [1], [0, 0, 1, 1], [], []>} : vector<40x16xbf16>, vector<16x32xbf16>, vector<40x32xf32> -> vector<40x32xf32>
    %269 = arith.addf %262, %268 : vector<40x32xf32>
    %c0_246 = arith.constant 0 : index
    %c0_247 = arith.constant 0 : index
    %270 = vector.load %arg6[%c0_246, %c0_247] : memref<1x32xf32, #tpu.memory_space<vmem>>, vector<1x32xf32>
    %271 = vector.broadcast %270 : vector<1x32xf32> to vector<40x32xf32>
    %272 = arith.addf %269, %271 : vector<40x32xf32>
    %cst_248 = arith.constant 0.000000e+00 : f32
    %273 = vector.broadcast %cst_248 : f32 to vector<40x32xf32>
    %274 = arith.maximumf %272, %273 : vector<40x32xf32>
    %275 = vector.extract_strided_slice %274 {offsets = [0, 0], sizes = [4, 32], strides = [1, 1]} : vector<40x32xf32> to vector<4x32xf32>
    %c7_249 = arith.constant 7 : index
    %c0_250 = arith.constant 0 : index
    %276 = vector.load %arg10[%c7_249, %c0_250] : memref<42x32xf32, #tpu.memory_space<vmem>>, vector<4x32xf32>
    tpu.vector_store %arg10[%c7_249, %c0_250], %275 {strides = array<i32>} : memref<42x32xf32, #tpu.memory_space<vmem>>, vector<4x32xf32>,
    %277 = vector.extract_strided_slice %274 {offsets = [10, 0], sizes = [4, 32], strides = [1, 1]} : vector<40x32xf32> to vector<4x32xf32>
    %c13 = arith.constant 13 : index
    %c0_251 = arith.constant 0 : index
    %278 = vector.load %arg10[%c13, %c0_251] : memref<42x32xf32, #tpu.memory_space<vmem>>, vector<4x32xf32>
    tpu.vector_store %arg10[%c13, %c0_251], %277 {strides = array<i32>} : memref<42x32xf32, #tpu.memory_space<vmem>>, vector<4x32xf32>,
    %279 = vector.extract_strided_slice %274 {offsets = [20, 0], sizes = [4, 32], strides = [1, 1]} : vector<40x32xf32> to vector<4x32xf32>
    %c19 = arith.constant 19 : index
    %c0_252 = arith.constant 0 : index
    %280 = vector.load %arg10[%c19, %c0_252] : memref<42x32xf32, #tpu.memory_space<vmem>>, vector<4x32xf32>
    tpu.vector_store %arg10[%c19, %c0_252], %279 {strides = array<i32>} : memref<42x32xf32, #tpu.memory_space<vmem>>, vector<4x32xf32>,
    %281 = vector.extract_strided_slice %274 {offsets = [30, 0], sizes = [4, 32], strides = [1, 1]} : vector<40x32xf32> to vector<4x32xf32>
    %c25_253 = arith.constant 25 : index
    %c0_254 = arith.constant 0 : index
    %282 = vector.load %arg10[%c25_253, %c0_254] : memref<42x32xf32, #tpu.memory_space<vmem>>, vector<4x32xf32>
    tpu.vector_store %arg10[%c25_253, %c0_254], %281 {strides = array<i32>} : memref<42x32xf32, #tpu.memory_space<vmem>>, vector<4x32xf32>,
    %cst_255 = arith.constant 0.000000e+00 : f32
    %283 = vector.broadcast %cst_255 : f32 to vector<24x32xf32>
    %c0_256 = arith.constant 0 : index
    %c0_257 = arith.constant 0 : index
    %284 = vector.load %arg10[%c0_256, %c0_257] : memref<42x32xf32, #tpu.memory_space<vmem>>, vector<24x32xf32>
    %285 = arith.truncf %284 : vector<24x32xf32> to vector<24x32xbf16>
    %c0_258 = arith.constant 0 : index
    %c0_259 = arith.constant 0 : index
    %c0_260 = arith.constant 0 : index
    %286 = vector.load %arg4[%c0_258, %c0_259, %c0_260] : memref<9x32x32xbf16, #tpu.memory_space<vmem>>, vector<1x32x32xbf16>
    %287 = vector.shape_cast %286 : vector<1x32x32xbf16> to vector<32x32xbf16>
    %cst_261 = arith.constant dense<0.000000e+00> : vector<24x32xf32>
    %288 = tpu.matmul %285, %287, %cst_261 {dimension_numbers = #tpu.dot_dimension_numbers<[1], [0], [0], [1], [0, 0, 1, 1], [], []>} : vector<24x32xbf16>, vector<32x32xbf16>, vector<24x32xf32> -> vector<24x32xf32>
    %289 = arith.addf %283, %288 : vector<24x32xf32>
    %c1_262 = arith.constant 1 : index
    %c0_263 = arith.constant 0 : index
    %290 = vector.load %arg10[%c1_262, %c0_263] : memref<42x32xf32, #tpu.memory_space<vmem>>, vector<24x32xf32>
    %291 = arith.truncf %290 : vector<24x32xf32> to vector<24x32xbf16>
    %c1_264 = arith.constant 1 : index
    %c0_265 = arith.constant 0 : index
    %c0_266 = arith.constant 0 : index
    %292 = vector.load %arg4[%c1_264, %c0_265, %c0_266] : memref<9x32x32xbf16, #tpu.memory_space<vmem>>, vector<1x32x32xbf16>
    %293 = vector.shape_cast %292 : vector<1x32x32xbf16> to vector<32x32xbf16>
    %cst_267 = arith.constant dense<0.000000e+00> : vector<24x32xf32>
    %294 = tpu.matmul %291, %293, %cst_267 {dimension_numbers = #tpu.dot_dimension_numbers<[1], [0], [0], [1], [0, 0, 1, 1], [], []>} : vector<24x32xbf16>, vector<32x32xbf16>, vector<24x32xf32> -> vector<24x32xf32>
    %295 = arith.addf %289, %294 : vector<24x32xf32>
    %c2_268 = arith.constant 2 : index
    %c0_269 = arith.constant 0 : index
    %296 = vector.load %arg10[%c2_268, %c0_269] : memref<42x32xf32, #tpu.memory_space<vmem>>, vector<24x32xf32>
    %297 = arith.truncf %296 : vector<24x32xf32> to vector<24x32xbf16>
    %c2_270 = arith.constant 2 : index
    %c0_271 = arith.constant 0 : index
    %c0_272 = arith.constant 0 : index
    %298 = vector.load %arg4[%c2_270, %c0_271, %c0_272] : memref<9x32x32xbf16, #tpu.memory_space<vmem>>, vector<1x32x32xbf16>
    %299 = vector.shape_cast %298 : vector<1x32x32xbf16> to vector<32x32xbf16>
    %cst_273 = arith.constant dense<0.000000e+00> : vector<24x32xf32>
    %300 = tpu.matmul %297, %299, %cst_273 {dimension_numbers = #tpu.dot_dimension_numbers<[1], [0], [0], [1], [0, 0, 1, 1], [], []>} : vector<24x32xbf16>, vector<32x32xbf16>, vector<24x32xf32> -> vector<24x32xf32>
    %301 = arith.addf %295, %300 : vector<24x32xf32>
    %c6_274 = arith.constant 6 : index
    %c0_275 = arith.constant 0 : index
    %302 = vector.load %arg10[%c6_274, %c0_275] : memref<42x32xf32, #tpu.memory_space<vmem>>, vector<24x32xf32>
    %303 = arith.truncf %302 : vector<24x32xf32> to vector<24x32xbf16>
    %c3_276 = arith.constant 3 : index
    %c0_277 = arith.constant 0 : index
    %c0_278 = arith.constant 0 : index
    %304 = vector.load %arg4[%c3_276, %c0_277, %c0_278] : memref<9x32x32xbf16, #tpu.memory_space<vmem>>, vector<1x32x32xbf16>
    %305 = vector.shape_cast %304 : vector<1x32x32xbf16> to vector<32x32xbf16>
    %cst_279 = arith.constant dense<0.000000e+00> : vector<24x32xf32>
    %306 = tpu.matmul %303, %305, %cst_279 {dimension_numbers = #tpu.dot_dimension_numbers<[1], [0], [0], [1], [0, 0, 1, 1], [], []>} : vector<24x32xbf16>, vector<32x32xbf16>, vector<24x32xf32> -> vector<24x32xf32>
    %307 = arith.addf %301, %306 : vector<24x32xf32>
    %c7_280 = arith.constant 7 : index
    %c0_281 = arith.constant 0 : index
    %308 = vector.load %arg10[%c7_280, %c0_281] : memref<42x32xf32, #tpu.memory_space<vmem>>, vector<24x32xf32>
    %309 = arith.truncf %308 : vector<24x32xf32> to vector<24x32xbf16>
    %c4_282 = arith.constant 4 : index
    %c0_283 = arith.constant 0 : index
    %c0_284 = arith.constant 0 : index
    %310 = vector.load %arg4[%c4_282, %c0_283, %c0_284] : memref<9x32x32xbf16, #tpu.memory_space<vmem>>, vector<1x32x32xbf16>
    %311 = vector.shape_cast %310 : vector<1x32x32xbf16> to vector<32x32xbf16>
    %cst_285 = arith.constant dense<0.000000e+00> : vector<24x32xf32>
    %312 = tpu.matmul %309, %311, %cst_285 {dimension_numbers = #tpu.dot_dimension_numbers<[1], [0], [0], [1], [0, 0, 1, 1], [], []>} : vector<24x32xbf16>, vector<32x32xbf16>, vector<24x32xf32> -> vector<24x32xf32>
    %313 = arith.addf %307, %312 : vector<24x32xf32>
    %c8_286 = arith.constant 8 : index
    %c0_287 = arith.constant 0 : index
    %314 = vector.load %arg10[%c8_286, %c0_287] : memref<42x32xf32, #tpu.memory_space<vmem>>, vector<24x32xf32>
    %315 = arith.truncf %314 : vector<24x32xf32> to vector<24x32xbf16>
    %c5_288 = arith.constant 5 : index
    %c0_289 = arith.constant 0 : index
    %c0_290 = arith.constant 0 : index
    %316 = vector.load %arg4[%c5_288, %c0_289, %c0_290] : memref<9x32x32xbf16, #tpu.memory_space<vmem>>, vector<1x32x32xbf16>
    %317 = vector.shape_cast %316 : vector<1x32x32xbf16> to vector<32x32xbf16>
    %cst_291 = arith.constant dense<0.000000e+00> : vector<24x32xf32>
    %318 = tpu.matmul %315, %317, %cst_291 {dimension_numbers = #tpu.dot_dimension_numbers<[1], [0], [0], [1], [0, 0, 1, 1], [], []>} : vector<24x32xbf16>, vector<32x32xbf16>, vector<24x32xf32> -> vector<24x32xf32>
    %319 = arith.addf %313, %318 : vector<24x32xf32>
    %c12 = arith.constant 12 : index
    %c0_292 = arith.constant 0 : index
    %320 = vector.load %arg10[%c12, %c0_292] : memref<42x32xf32, #tpu.memory_space<vmem>>, vector<24x32xf32>
    %321 = arith.truncf %320 : vector<24x32xf32> to vector<24x32xbf16>
    %c6_293 = arith.constant 6 : index
    %c0_294 = arith.constant 0 : index
    %c0_295 = arith.constant 0 : index
    %322 = vector.load %arg4[%c6_293, %c0_294, %c0_295] : memref<9x32x32xbf16, #tpu.memory_space<vmem>>, vector<1x32x32xbf16>
    %323 = vector.shape_cast %322 : vector<1x32x32xbf16> to vector<32x32xbf16>
    %cst_296 = arith.constant dense<0.000000e+00> : vector<24x32xf32>
    %324 = tpu.matmul %321, %323, %cst_296 {dimension_numbers = #tpu.dot_dimension_numbers<[1], [0], [0], [1], [0, 0, 1, 1], [], []>} : vector<24x32xbf16>, vector<32x32xbf16>, vector<24x32xf32> -> vector<24x32xf32>
    %325 = arith.addf %319, %324 : vector<24x32xf32>
    %c13_297 = arith.constant 13 : index
    %c0_298 = arith.constant 0 : index
    %326 = vector.load %arg10[%c13_297, %c0_298] : memref<42x32xf32, #tpu.memory_space<vmem>>, vector<24x32xf32>
    %327 = arith.truncf %326 : vector<24x32xf32> to vector<24x32xbf16>
    %c7_299 = arith.constant 7 : index
    %c0_300 = arith.constant 0 : index
    %c0_301 = arith.constant 0 : index
    %328 = vector.load %arg4[%c7_299, %c0_300, %c0_301] : memref<9x32x32xbf16, #tpu.memory_space<vmem>>, vector<1x32x32xbf16>
    %329 = vector.shape_cast %328 : vector<1x32x32xbf16> to vector<32x32xbf16>
    %cst_302 = arith.constant dense<0.000000e+00> : vector<24x32xf32>
    %330 = tpu.matmul %327, %329, %cst_302 {dimension_numbers = #tpu.dot_dimension_numbers<[1], [0], [0], [1], [0, 0, 1, 1], [], []>} : vector<24x32xbf16>, vector<32x32xbf16>, vector<24x32xf32> -> vector<24x32xf32>
    %331 = arith.addf %325, %330 : vector<24x32xf32>
    %c14 = arith.constant 14 : index
    %c0_303 = arith.constant 0 : index
    %332 = vector.load %arg10[%c14, %c0_303] : memref<42x32xf32, #tpu.memory_space<vmem>>, vector<24x32xf32>
    %333 = arith.truncf %332 : vector<24x32xf32> to vector<24x32xbf16>
    %c8_304 = arith.constant 8 : index
    %c0_305 = arith.constant 0 : index
    %c0_306 = arith.constant 0 : index
    %334 = vector.load %arg4[%c8_304, %c0_305, %c0_306] : memref<9x32x32xbf16, #tpu.memory_space<vmem>>, vector<1x32x32xbf16>
    %335 = vector.shape_cast %334 : vector<1x32x32xbf16> to vector<32x32xbf16>
    %cst_307 = arith.constant dense<0.000000e+00> : vector<24x32xf32>
    %336 = tpu.matmul %333, %335, %cst_307 {dimension_numbers = #tpu.dot_dimension_numbers<[1], [0], [0], [1], [0, 0, 1, 1], [], []>} : vector<24x32xbf16>, vector<32x32xbf16>, vector<24x32xf32> -> vector<24x32xf32>
    %337 = arith.addf %331, %336 : vector<24x32xf32>
    %c0_308 = arith.constant 0 : index
    %c0_309 = arith.constant 0 : index
    %338 = vector.load %arg7[%c0_308, %c0_309] : memref<1x32xf32, #tpu.memory_space<vmem>>, vector<1x32xf32>
    %339 = vector.broadcast %338 : vector<1x32xf32> to vector<24x32xf32>
    %340 = arith.addf %337, %339 : vector<24x32xf32>
    %341 = vector.extract_strided_slice %340 {offsets = [0, 0], sizes = [4, 32], strides = [1, 1]} : vector<24x32xf32> to vector<4x32xf32>
    %c0_310 = arith.constant 0 : index
    %c0_311 = arith.constant 0 : index
    %c0_312 = arith.constant 0 : index
    %c0_313 = arith.constant 0 : index
    %342 = vector.load %arg8[%c0_310, %c0_311, %c0_312, %c0_313] : memref<1x4x4x32xf32, #tpu.memory_space<vmem>>, vector<1x1x4x32xf32>
    %343 = vector.shape_cast %342 : vector<1x1x4x32xf32> to vector<4x32xf32>
    %344 = vector.shape_cast %341 : vector<4x32xf32> to vector<1x1x4x32xf32>
    tpu.vector_store %arg8[%c0_310, %c0_311, %c0_312, %c0_313], %344 {strides = array<i32>} : memref<1x4x4x32xf32, #tpu.memory_space<vmem>>, vector<1x1x4x32xf32>,
    %345 = vector.extract_strided_slice %340 {offsets = [6, 0], sizes = [4, 32], strides = [1, 1]} : vector<24x32xf32> to vector<4x32xf32>
    %c0_314 = arith.constant 0 : index
    %c1_315 = arith.constant 1 : index
    %c0_316 = arith.constant 0 : index
    %c0_317 = arith.constant 0 : index
    %346 = vector.load %arg8[%c0_314, %c1_315, %c0_316, %c0_317] : memref<1x4x4x32xf32, #tpu.memory_space<vmem>>, vector<1x1x4x32xf32>
    %347 = vector.shape_cast %346 : vector<1x1x4x32xf32> to vector<4x32xf32>
    %348 = vector.shape_cast %345 : vector<4x32xf32> to vector<1x1x4x32xf32>
    tpu.vector_store %arg8[%c0_314, %c1_315, %c0_316, %c0_317], %348 {strides = array<i32>} : memref<1x4x4x32xf32, #tpu.memory_space<vmem>>, vector<1x1x4x32xf32>,
    %349 = vector.extract_strided_slice %340 {offsets = [12, 0], sizes = [4, 32], strides = [1, 1]} : vector<24x32xf32> to vector<4x32xf32>
    %c0_318 = arith.constant 0 : index
    %c2_319 = arith.constant 2 : index
    %c0_320 = arith.constant 0 : index
    %c0_321 = arith.constant 0 : index
    %350 = vector.load %arg8[%c0_318, %c2_319, %c0_320, %c0_321] : memref<1x4x4x32xf32, #tpu.memory_space<vmem>>, vector<1x1x4x32xf32>
    %351 = vector.shape_cast %350 : vector<1x1x4x32xf32> to vector<4x32xf32>
    %352 = vector.shape_cast %349 : vector<4x32xf32> to vector<1x1x4x32xf32>
    tpu.vector_store %arg8[%c0_318, %c2_319, %c0_320, %c0_321], %352 {strides = array<i32>} : memref<1x4x4x32xf32, #tpu.memory_space<vmem>>, vector<1x1x4x32xf32>,
    %353 = vector.extract_strided_slice %340 {offsets = [18, 0], sizes = [4, 32], strides = [1, 1]} : vector<24x32xf32> to vector<4x32xf32>
    %c0_322 = arith.constant 0 : index
    %c3_323 = arith.constant 3 : index
    %c0_324 = arith.constant 0 : index
    %c0_325 = arith.constant 0 : index
    %354 = vector.load %arg8[%c0_322, %c3_323, %c0_324, %c0_325] : memref<1x4x4x32xf32, #tpu.memory_space<vmem>>, vector<1x1x4x32xf32>
    %355 = vector.shape_cast %354 : vector<1x1x4x32xf32> to vector<4x32xf32>
    %356 = vector.shape_cast %353 : vector<4x32xf32> to vector<1x1x4x32xf32>
    tpu.vector_store %arg8[%c0_322, %c3_323, %c0_324, %c0_325], %356 {strides = array<i32>} : memref<1x4x4x32xf32, #tpu.memory_space<vmem>>, vector<1x1x4x32xf32>,
    return
  }
  func.func @transform_0(%arg0: i32) -> (i32, i32, i32, i32) {
    %c0_i32 = arith.constant 0 : i32
    %c0_i32_0 = arith.constant 0 : i32
    %c0_i32_1 = arith.constant 0 : i32
    %c0_i32_2 = arith.constant 0 : i32
    return %arg0, %c0_i32, %c0_i32_0, %c0_i32_1 : i32, i32, i32, i32
  }
  func.func @transform_1(%arg0: i32) -> (i32, i32, i32) {
    %c0_i32 = arith.constant 0 : i32
    %c0_i32_0 = arith.constant 0 : i32
    %c0_i32_1 = arith.constant 0 : i32
    %c0_i32_2 = arith.constant 0 : i32
    return %c0_i32, %c0_i32_0, %c0_i32_1 : i32, i32, i32
  }
  func.func @transform_2(%arg0: i32) -> (i32, i32, i32) {
    %c0_i32 = arith.constant 0 : i32
    %c0_i32_0 = arith.constant 0 : i32
    %c0_i32_1 = arith.constant 0 : i32
    %c0_i32_2 = arith.constant 0 : i32
    return %c0_i32, %c0_i32_0, %c0_i32_1 : i32, i32, i32
  }
  func.func @transform_3(%arg0: i32) -> (i32, i32, i32) {
    %c0_i32 = arith.constant 0 : i32
    %c0_i32_0 = arith.constant 0 : i32
    %c0_i32_1 = arith.constant 0 : i32
    %c0_i32_2 = arith.constant 0 : i32
    return %c0_i32, %c0_i32_0, %c0_i32_1 : i32, i32, i32
  }
  func.func @transform_4(%arg0: i32) -> (i32, i32) {
    %c0_i32 = arith.constant 0 : i32
    %c0_i32_0 = arith.constant 0 : i32
    %c0_i32_1 = arith.constant 0 : i32
    return %c0_i32, %c0_i32_0 : i32, i32
  }
  func.func @transform_5(%arg0: i32) -> (i32, i32) {
    %c0_i32 = arith.constant 0 : i32
    %c0_i32_0 = arith.constant 0 : i32
    %c0_i32_1 = arith.constant 0 : i32
    return %c0_i32, %c0_i32_0 : i32, i32
  }
  func.func @transform_6(%arg0: i32) -> (i32, i32) {
    %c0_i32 = arith.constant 0 : i32
    %c0_i32_0 = arith.constant 0 : i32
    %c0_i32_1 = arith.constant 0 : i32
    return %c0_i32, %c0_i32_0 : i32, i32
  }
  func.func @transform_7(%arg0: i32) -> (i32, i32, i32, i32) {
    %c0_i32 = arith.constant 0 : i32
    %c0_i32_0 = arith.constant 0 : i32
    %c0_i32_1 = arith.constant 0 : i32
    %c0_i32_2 = arith.constant 0 : i32
    return %arg0, %c0_i32, %c0_i32_0, %c0_i32_1 : i32, i32, i32, i32
  }
}

</mosaic_0001>

<bundles_post_ra>
// kernel: stem_pyramid_forward.1
= control target key start
LH: loop header
LB: loop body
LE: loop exit
PB: predicated region body
PF: predicated region fallthrough
CT: control target
= control target key end

     0   :  { %12 = vsyncpa [#allocation5], 0  ;;  %s6567_s0 = inlined_call_operand.vmem [shape: f32[2,4,90,3], index: 0, kind: input, shape index: {}]   ;;  %s6568_s1 = inlined_call_operand.vmem [shape: bf16[9,3,16], index: 1, kind: input, shape index: {}]   ;;  %s6569_s2 = inlined_call_operand.vmem [shape: bf16[9,16,32], index: 2, kind: input, shape index: {}]   ;;  %s6570_s3 = inlined_call_operand.vmem [shape: bf16[9,32,32], index: 3, kind: input, shape index: {}]   ;;  %s6571_s4 = inlined_call_operand.vmem [shape: f32[1,16], index: 4, kind: input, shape index: {}]   ;;  %s6572_s5 = inlined_call_operand.vmem [shape: f32[1,32], index: 5, kind: input, shape index: {}]   ;;  %s6573_s6 = inlined_call_operand.vmem [shape: f32[1,32], index: 6, kind: input, shape index: {}]   ;;  %s6574_s7 = inlined_call_operand.hbm [shape: f32[2,4,4,32], index: 7, kind: output, shape index: {}]  }
   0x1   :  { %14 = vsyncpa [#allocation5 + $0x1], 0  ;;  %s5323_s24 = smov 0   ;;  %s5325_s25 = smov 0  }
   0x2   :  { %s5327_s26 = smov 0   ;;  %s5329_s27 = smov 0  }
   0x3 LB: > { %s5344_s28 = sadd.s32 4294967295, %s5275_s27   ;;  %s4015_s29 = sadd.s32 4294967294, %s5275_s27   ;;  %s5275_s27 = sphi %s5329_s27, %s6580_s27   ;;  %s5271_s26 = sphi %s5327_s26, %s6579_s26   ;;  %s5267_s25 = sphi %s5325_s25, %s6578_s25   ;;  %s5263_s24 = sphi %s5323_s24, %s6577_s24  }
   0x4   : > { %s5348_s30 = sadd.s32 1, %s5275_s27   ;;  %s179_s8 = sadd.s32 1, %s5271_s26 }
   0x5   : > { %s176_s9 = ssub.s32 %s5275_s27, %s5348_s30  ;;  %p189_p0 = scmp.ne.s32.totalorder %s5271_s26, %s5267_s25 }
   0x6   : > { %p177_p1 = scmp.eq.s32.totalorder %s176_s9, 0  ;;  %p190_p2 = scmp.eq.s32.totalorder %s5344_s28, 1 }
   0x7   : > { %p195_p3 = scmp.ne.s32.totalorder %s5267_s25, %s5263_s24  ;;  %p196_p4 = scmp.eq.s32.totalorder %s4015_s29, 1 }
   0x8   : > { %s5359_s10 = scalar_select %p177_p1, %s5271_s26, %s179_s8  }
   0x9   : > { %p5361_p5 = por %p190_p2, %p189_p0  ;;  %p5365_p6 = por %p196_p4, %p195_p3 }
   0xa   : > { %p4018_p7 = scmp.ge.s32.totalorder %s5275_s27, 1  ;;  %p240_p8 = scmp.lt.s32.totalorder %s5275_s27, 3 }
   0xc   : > { %p241_p9 = pnand %p4018_p7, %p240_p8 }
   0xd   : > { %p272_p10 = scmp.lt.s32.totalorder (!%p241_p9), %s5344_s28, 1  ;;  %s269_s16 = sand.u32 (!%p241_p9), 1, %s5267_s25  }
   0xe   : > { %244 = sbr.rel (%p241_p9) target bundleno = 1120 (0x460), region = 48  ;;  %s5280_s13 = smov (!%p241_p9), [#allocation4]  }
   0xf   : > { %s5219_s14 = sshll.u32 (!%p241_p9), %s5280_s13, 4  ;;  %s5220_s14 = int_to_ptr.vmem [resolvable:$false] %s5219_s14 }
  0x10   : > { %s5221_s15 = scalar_lea.vmem (!%p241_p9), %s5220_s14, 512 }
  0x13   : > { %v4030_v0 = vld [vmem:[%s6568_s1 + $0x2] sm:$0x3]  ;;  %vm352_vm0 = vcmask 1040384   ;;  %vm353_vm1 = vcmask 1041408   ;;  %v5277_v1 = vmov 0.0   ;;  %v5278_v2 = vmov 65535  }
  0x14   : > { %4549 = vmatprep.subr.bf16.mxu0 %v5277_v1  ;;  %v354_v3 = vsel %vm352_vm0, 4294967295, %v5278_v2  ;;  %4571 = vmatprep.subr.bf16.mxu1 %v5277_v1  ;;  %v318_v4 = vld [vmem:[%s6568_s1] sm:$0x3]  ;;  %vm5279_vm2 = vmmov 0   ;;  %s273_s17 = scalar_select %p272_p10, %s5344_s28, 1  ;;  %vm336_vm3 = vcmask 23552  }
  0x15   : > { %v5380_v5 = vsel %vm353_vm1, %v354_v3, 0  ;;  %4551 = vmatprep.mubr.msk.bf16.mxu0 %vm5279_vm2, %v5277_v1  ;;  %4573 = vmatprep.mubr.msk.bf16.mxu1 %vm5279_vm2, %v5277_v1  ;;  %v4050_v8 = vld [vmem:[%s6568_s1 + $0x4] sm:$0x3]  ;;  %v4065_v9 = vld [vmem:[%s6568_s1 + $0x6] sm:$0x3]  ;;  %vm278_vm4 = vcmask 130048  }
  0x16   : > { %v357_v6 = vand.u32 %v4030_v0, %v5380_v5  ;;  %v447_v7 = vand.u32 %v5380_v5, %v318_v4  ;;  %s5143_s20 = smul.u32 384, %s273_s17  ;;  %v554_v13 = vand.u32 %v4050_v8, %v5380_v5  ;;  %v669_v16 = vand.u32 %v4065_v9, %v5380_v5  ;;  %v4080_v42 = vld [vmem:[%s6568_s1 + $0x8] sm:$0x3]  ;;  %v4086_v45 = vld [vmem:[%s6568_s1 + $0xa] sm:$0x3]  ;;  %288 = vst.msk [vmem:[#allocation2 + $0x40] sm:$0xff] %vm278_vm4, %v5277_v1 }
  0x17   : > { %v785_v48 = vand.u32 %v4080_v42, %v5380_v5  ;;  %v900_v49 = vand.u32 %v4086_v45, %v5380_v5  ;;  %vm286_vm5 = vcmask 125952   ;;  %289 = vst.msk [vmem:[#allocation2 + $0x48] sm:$0xff] %vm278_vm4, %v5277_v1  ;;  %279 = vst.msk [vmem:[#allocation2] sm:$0xff] %vm278_vm4, %v5277_v1  ;;  %vm1355_vm6 = vcmask 126977   ;;  %s4019_s17 = sshll.u32 %s269_s16, 4 }
  0x18   : > { %4550 = vmatpush3.bf16.msra.mxu0 %v357_v6  ;;  %4572 = vmatpush3.bf16.msra.mxu1 %v447_v7  ;;  %s5400_s8 = scalar_lea.vmem %s6567_s0, %s5143_s20  ;;  %280 = vst.msk [vmem:[#allocation2 + $0x8] sm:$0xff] %vm278_vm4, %v5277_v1  ;;  %281 = vst.msk [vmem:[#allocation2 + $0x10] sm:$0xff] %vm278_vm4, %v5277_v1  ;;  %vm1357_vm7 = vcmask 128002   ;;  %vm1359_vm8 = vcmask 129027   ;;  %vm1361_vm9 = vcmask 130052   ;;  %vm1363_vm10 = vcmask 130053  }
  0x19   : > { %4593 = vmatprep.subr.bf16.mxu0 %v5277_v1  ;;  %4615 = vmatprep.subr.bf16.mxu1 %v5277_v1  ;;  %v4021_v10 = vld [vmem:[%s5400_s8 + $0x60] sm:$0xff]  ;;  %v4022_v11 = vld [vmem:[%s5400_s8 + $0x68] sm:$0xff]  ;;  %v4023_v18 = vld [vmem:[%s5400_s8 + $0x70] sm:$0xff]  ;;  %282 = vst.msk [vmem:[#allocation2 + $0x18] sm:$0xff] %vm278_vm4, %v5277_v1  ;;  %vm1365_vm11 = vcmask 122880   ;;  %vm1367_vm12 = vcmask 130054  }
  0x1a   : > { %v304_v12 = vld [vmem:[%s5400_s8] sm:$0xff]  ;;  %v329_v14 = vpack.c.bf16 %v4022_v11, %v4021_v10  ;;  %v305_v15 = vld [vmem:[%s5400_s8 + $0x8] sm:$0xff]  ;;  %v4024_v19 = vld [vmem:[%s5400_s8 + $0x78] sm:$0xff]  ;;  %283 = vst.msk [vmem:[#allocation2 + $0x20] sm:$0xff] %vm278_vm4, %v5277_v1  ;;  %vm1369_vm13 = vcmask 123904   ;;  %vm1371_vm14 = vcmask 130055  }
  0x1b   : > { %v313_v17 = vpack.c.bf16 %v305_v15, %v304_v12  ;;  %v306_v20 = vld [vmem:[%s5400_s8 + $0x10] sm:$0xff]  ;;  %v307_v21 = vld [vmem:[%s5400_s8 + $0x18] sm:$0xff]  ;;  %v330_v22 = vpack.c.bf16 %v4024_v19, %v4023_v18  ;;  %v4025_v24 = vld [vmem:[%s5400_s8 + $0x80] sm:$0xff]  ;;  %284 = vst.msk [vmem:[#allocation2 + $0x28] sm:$0xff] %vm278_vm4, %v5277_v1  ;;  %vm1373_vm15 = vcmask 124928   ;;  %vm296_vm0 = vcmask 261120  }
  0x1c   : > { %4552 = vmatmul.mubr.msk.bf16.vlgmr.msra.gmra.mxu0 %vm336_vm3, %v329_v14  ;;  %v314_v23 = vpack.c.bf16 %v307_v21, %v306_v20  ;;  %v4026_v25 = vld [vmem:[%s5400_s8 + $0x88] sm:$0xff]  ;;  %v308_v26 = vld [vmem:[%s5400_s8 + $0x20] sm:$0xff]  ;;  %v4027_v30 = vld [vmem:[%s5400_s8 + $0x90] sm:$0xff]  ;;  %285 = vst.msk [vmem:[#allocation2 + $0x30] sm:$0xff] %vm278_vm4, %v5277_v1  ;;  %vm302_vm1 = vcmask 254976   ;;  %s271_s19 = scalar_lea.vmem [#allocation4], %s4019_s17 }
  0x1d   : > { %4574 = vmatmul.mubr.msk.bf16.vlgmr.msra.gmra.mxu1 %vm336_vm3, %v313_v17  ;;  %4594 = vmatpush3.bf16.msra.mxu0 %v554_v13  ;;  %v309_v27 = vld [vmem:[%s5400_s8 + $0x28] sm:$0xff]  ;;  %v331_v28 = vpack.c.bf16 %v4026_v25, %v4025_v24  ;;  %v4028_v31 = vld [vmem:[%s5400_s8 + $0x98] sm:$0xff]  ;;  %v310_v32 = vld [vmem:[%s5400_s8 + $0x30] sm:$0xff]  ;;  %290 = vst.msk [vmem:[#allocation2 + $0x50] sm:$0xff] %vm278_vm4, %v5277_v1  ;;  %s4368_s20 = sshll.u32 %s5344_s28, 8  ;;  %s3953_s21 = sshll.u32 %s271_s19, 4  ;;  %s6521_s21 = int_to_ptr.vmem [resolvable:$true] %s3953_s21 }
  0x1e   : > { %4616 = vmatpush3.bf16.msra.mxu1 %v669_v16  ;;  %4555 = vmatprep.mubr.msk.bf16.mxu0 %vm5279_vm2, %v5277_v1  ;;  %v315_v29 = vpack.c.bf16 %v309_v27, %v308_v26  ;;  %v311_v33 = vld [vmem:[%s5400_s8 + $0x38] sm:$0xff]  ;;  %v332_v34 = vpack.c.bf16 %v4028_v31, %v4027_v30  ;;  %v4029_v36 = vld [vmem:[%s5400_s8 + $0xa0] sm:$0xff]  ;;  %v4042_v41 = vld [vmem:[%s5400_s8 + $0xc8] sm:$0xff]  ;;  %291 = vst.msk [vmem:[#allocation2 + $0x58] sm:$0xff] %vm278_vm4, %v5277_v1  ;;  %s6519_s29 = scalar_lea.hbm %s6574_s7, %s4368_s20  ;;  %s6527_s28 = scalar_lea.sflag [#allocation5], %s269_s16 }
  0x1f   : > { %4577 = vmatprep.mubr.msk.bf16.mxu1 %vm5279_vm2, %v5277_v1  ;;  %4637 = vmatprep.subr.bf16.mxu0 %v5277_v1  ;;  %v316_v35 = vpack.c.bf16 %v311_v33, %v310_v32  ;;  %v312_v37 = vld [vmem:[%s5400_s8 + $0x40] sm:$0xff]  ;;  %v333_v38 = vpack.c.bf16 %v4029_v36, %v4029_v36  ;;  %v4057_v44 = vld [vmem:[%s5400_s8 + $0xcc] sm:$0xff]  ;;  %v4044_v51 = vld [vmem:[%s5400_s8 + $0xd8] sm:$0xff]  ;;  %292 = vst.msk [vmem:[#allocation2 + $0x60] sm:$0xff] %vm278_vm4, %v5277_v1  ;;  %s5215_s9 = scalar_lea.vmem %s6521_s21, 256  ;;  %p5222_p0 = scmp.lt.s32.totalorder %s6521_s21, %s5220_s14 }
  0x20   : > { %4659 = vmatprep.subr.bf16.mxu1 %v5277_v1  ;;  %v317_v39 = vpack.c.bf16 %v312_v37, %v312_v37  ;;  %v4041_v40 = vld [vmem:[%s5400_s8 + $0xc0] sm:$0xff]  ;;  %v4043_v50 = vld [vmem:[%s5400_s8 + $0xd0] sm:$0xff]  ;;  %v4046_v57 = vld [vmem:[%s5400_s8 + $0xe8] sm:$0xff]  ;;  %293 = vst.msk [vmem:[#allocation2 + $0x68] sm:$0xff] %vm278_vm4, %v5277_v1  ;;  %p5216_p11 = scmp.ne.s32.totalorder %s6521_s21, %s5215_s9  ;;  %p5223_p1 = scmp.lt.s32.totalorder %s5221_s15, %s5215_s9 }
  0x21   : > { %v4056_v43 = vld [vmem:[%s5400_s8 + $0xc4] sm:$0xff]  ;;  %v5464_v46 = vpack.c.bf16 %v4042_v41, %v4041_v40  ;;  %v4058_v52 = vld [vmem:[%s5400_s8 + $0xd4] sm:$0xff]  ;;  %v4059_v53 = vld [vmem:[%s5400_s8 + $0xdc] sm:$0xff]  ;;  %v5480_v54 = vpack.c.bf16 %v4044_v51, %v4043_v50  ;;  %294 = vst.msk [vmem:[#allocation2 + $0x70] sm:$0xff] %vm278_vm4, %v5277_v1 }
  0x22   : > { %v646_v47 = vpack.c.bf16 %v4057_v44, %v4056_v43  ;;  %v647_v55 = vpack.c.bf16 %v4059_v53, %v4058_v52  ;;  %v4045_v56 = vld [vmem:[%s5400_s8 + $0xe0] sm:$0xff]  ;;  %v4061_v59 = vld [vmem:[%s5400_s8 + $0xec] sm:$0xff]  ;;  %v4048_v63 = vld [vmem:[%s5400_s8 + $0xf8] sm:$0xff]  ;;  %297 = vst.msk [vmem:[#allocation3] sm:$0xff] %vm296_vm0, %v5277_v1  ;;  %p5217_p12 = pnand %p5216_p11, %p5361_p5  ;;  %p5224_p2 = por %p5223_p1, %p5222_p0 }
  0x23   : > { %v4060_v58 = vld [vmem:[%s5400_s8 + $0xe4] sm:$0xff]  ;;  %v5494_v60 = vpack.c.bf16 %v4046_v57, %v4045_v56  ;;  %v4047_v62 = vld [vmem:[%s5400_s8 + $0xf0] sm:$0xff]  ;;  %v4063_v2 = vld [vmem:[%s5400_s8 + $0xfc] sm:$0xff]  ;;  %298 = vst.msk [vmem:[#allocation3 + $0x8] sm:$0xff] %vm296_vm0, %v5277_v1 }
  0x24   : > { %4556 = vmatmul.mubr.msk.bf16.gmra.mxu0 %vm336_vm3, %v330_v22  ;;  %v648_v61 = vpack.c.bf16 %v4061_v59, %v4060_v58  ;;  %v4062_v0 = vld [vmem:[%s5400_s8 + $0xf4] sm:$0xff]  ;;  %v5507_v3 = vpack.c.bf16 %v4048_v63, %v4047_v62  ;;  %v4049_v6 = vld [vmem:[%s5400_s8 + $0x100] sm:$0xff]  ;;  %v4072_v11 = vld [vmem:[%s5400_s8 + $0x12c] sm:$0xff]  ;;  %299 = vst.msk [vmem:[#allocation3 + $0x10] sm:$0xff] %vm296_vm0, %v5277_v1  ;;  %p5218_p13 = pneg %p5217_p12 }
  0x25   : > { %4578 = vmatmul.mubr.msk.bf16.gmra.mxu1 %vm336_vm3, %v314_v23  ;;  %4559 = vmatprep.mubr.msk.bf16.mxu0 %vm5279_vm2, %v5277_v1  ;;  %v649_v4 = vpack.c.bf16 %v4063_v2, %v4062_v0  ;;  %v4064_v7 = vld [vmem:[%s5400_s8 + $0x104] sm:$0xff]  ;;  %v5518_v8 = vpack.c.bf16 %v4049_v6, %v4049_v6  ;;  %v869_v13 = vld [vmem:[%s5400_s8 + $0xd] sm:$0xff]  ;;  %v5545_v21 = vld [vmem:[%s5400_s8 + $0x19] sm:$0xff]  ;;  %300 = vst.msk [vmem:[#allocation3 + $0x18] sm:$0xff] %vm296_vm0, %v5277_v1 }
  0x26   : > { %4581 = vmatprep.mubr.msk.bf16.mxu1 %vm5279_vm2, %v5277_v1  ;;  %v650_v9 = vpack.c.bf16 %v4064_v7, %v4064_v7  ;;  %v4071_v10 = vld [vmem:[%s5400_s8 + $0x124] sm:$0xff]  ;;  %v4092_v14 = vld [vmem:[%s6568_s1 + $0xc] sm:$0x3]  ;;  %v4107_v15 = vld [vmem:[%s6568_s1 + $0xe] sm:$0x3]  ;;  %301 = vst.msk [vmem:[#allocation3 + $0x20] sm:$0xff] %vm296_vm0, %v5277_v1  ;;  %p5225_p3 = pnand %p5224_p2, %p5218_p13 }
  0x27   : > { %v868_v12 = vld [vmem:[%s5400_s8 + $0x5] sm:$0xff]  ;;  %v762_v16 = vpack.c.bf16 %v4072_v11, %v4071_v10  ;;  %v1015_v18 = vand.u32 %v4092_v14, %v5380_v5  ;;  %v1130_v19 = vand.u32 %v4107_v15, %v5380_v5  ;;  %v5542_v20 = vld [vmem:[%s5400_s8 + $0x11] sm:$0xff]  ;;  %v4074_v24 = vld [vmem:[%s5400_s8 + $0x13c] sm:$0xff] }
  0x28   : > { %v5537_v17 = vpack.c.bf16 %v869_v13, %v868_v12  ;;  %v1595_v22 = vpack.c.bf16 %v5545_v21, %v5542_v20  ;;  %v4073_v23 = vld [vmem:[%s5400_s8 + $0x134] sm:$0xff]  ;;  %v871_v26 = vld [vmem:[%s5400_s8 + $0x1d] sm:$0xff]  ;;  %v4076_v30 = vld [vmem:[%s5400_s8 + $0x14c] sm:$0xff] }
  0x29   : > { %v870_v25 = vld [vmem:[%s5400_s8 + $0x15] sm:$0xff]  ;;  %v763_v27 = vpack.c.bf16 %v4074_v24, %v4073_v23  ;;  %v872_v31 = vld [vmem:[%s5400_s8 + $0x25] sm:$0xff]  ;;  %v873_v32 = vld [vmem:[%s5400_s8 + $0x2d] sm:$0xff] }
  0x2a   : > { %v4078_v36 = vld [vmem:[%s5400_s8 + $0x15c] sm:$0xff]  ;;  %v4079_v41 = vld [vmem:[%s5400_s8 + $0x164] sm:$0xff]  ;;  %v5646_v63 = vld [vmem:[%s5400_s8 + $0x31] sm:$0xff] }
  0x2b   : > { %v874_v37 = vld [vmem:[%s5400_s8 + $0x35] sm:$0xff]  ;;  %v876_v42 = vld [vmem:[%s5400_s8 + $0x45] sm:$0xff]  ;;  %v766_v43 = vpack.c.bf16 %v4079_v41, %v4079_v41  ;;  %v4147_v50 = vld [vmem:[%s6568_s1 + $0x2] sm:$0x3] }
  0x2c   : > { %4560 = vmatmul.mubr.msk.bf16.gmra.mxu0 %vm336_vm3, %v331_v28  ;;  %v5562_v28 = vpack.c.bf16 %v871_v26, %v870_v25  ;;  %v5599_v44 = vpack.c.bf16 %v876_v42, %v876_v42  ;;  %v5607_v45 = vld [vmem:[%s5400_s8 + $0x9] sm:$0xff]  ;;  %v5626_v56 = vld [vmem:[%s5400_s8 + $0x21] sm:$0xff]  ;;  %v4100_v57 = vld [vmem:[%s5400_s8 + $0x79] sm:$0xff] }
  0x2d   : > { %4582 = vmatmul.mubr.msk.bf16.gmra.mxu1 %vm336_vm3, %v315_v29  ;;  %4563 = vmatprep.mubr.msk.bf16.mxu0 %vm5279_vm2, %v5277_v1  ;;  %v4075_v29 = vld [vmem:[%s5400_s8 + $0x144] sm:$0xff]  ;;  %v992_v51 = vpack.c.bf16 %v5542_v20, %v5607_v45  ;;  %v993_v59 = vpack.c.bf16 %v5626_v56, %v5545_v21  ;;  %v4103_v2 = vld [vmem:[%s5400_s8 + $0x91] sm:$0xff]  ;;  %v5659_v7 = vld [vmem:[%s5400_s8 + $0x39] sm:$0xff] }
  0x2e   : > { %4585 = vmatprep.mubr.msk.bf16.mxu1 %vm5279_vm2, %v5277_v1  ;;  %v764_v33 = vpack.c.bf16 %v4076_v30, %v4075_v29  ;;  %v4101_v58 = vld [vmem:[%s5400_s8 + $0x81] sm:$0xff]  ;;  %v5643_v62 = vld [vmem:[%s5400_s8 + $0x29] sm:$0xff]  ;;  %v4104_v10 = vld [vmem:[%s5400_s8 + $0x99] sm:$0xff] }
  0x2f   : > { %v4102_v0 = vld [vmem:[%s5400_s8 + $0x89] sm:$0xff]  ;;  %v4105_v11 = vld [vmem:[%s5400_s8 + $0xa1] sm:$0xff]  ;;  %v4114_v23 = vld [vmem:[%s5400_s8 + $0xd1] sm:$0xff] }
  0x30   : > { %v1109_v6 = vpack.c.bf16 %v4103_v2, %v4102_v0  ;;  %v1110_v13 = vpack.c.bf16 %v4105_v11, %v4104_v10  ;;  %v991_v14 = vld [vmem:[%s5400_s8 + $0x49] sm:$0xff]  ;;  %v4138_v24 = vld [vmem:[%s5400_s8 + $0x120] sm:$0xff]  ;;  %v4118_v42 = vld [vmem:[%s5400_s8 + $0xf1] sm:$0xff] }
  0x31   : > { %v4106_v15 = vld [vmem:[%s5400_s8 + $0xa9] sm:$0xff]  ;;  %v1389_v26 = vld [vmem:[%s6568_s1] sm:$0x3] }
  0x32   : > { %v4139_v25 = vld [vmem:[%s5400_s8 + $0x128] sm:$0xff] }
  0x33   : > { %v1399_v30 = vpack.c.bf16 %v4139_v25, %v4138_v24  ;;  %v4117_v41 = vld [vmem:[%s5400_s8 + $0xe9] sm:$0xff]  ;;  %v1585_v11 = vld [vmem:[%s5400_s8 + $0x1] sm:$0xff] }
  0x34   : > { %4564 = vmatmul.mubr.msk.bf16.gmra.mxu0 %vm336_vm3, %v332_v34  ;;  %v5575_v34 = vpack.c.bf16 %v873_v32, %v872_v31  ;;  %v1511_v31 = vand.u32 %v1389_v26, %v5380_v5 }
  0x35   : > { %4586 = vmatmul.mubr.msk.bf16.gmra.mxu1 %vm336_vm3, %v316_v35  ;;  %4567 = vmatprep.mubr.msk.bf16.mxu0 %vm5279_vm2, %v5277_v1  ;;  %v4077_v35 = vld [vmem:[%s5400_s8 + $0x154] sm:$0xff] }
  0x36   : > { %4589 = vmatprep.mubr.msk.bf16.mxu1 %vm5279_vm2, %v5277_v1 }
  0x3c   : > { %4568 = vmatmul.mubr.msk.bf16.gmra.mxu0 %vm336_vm3, %v333_v38  ;;  %v875_v38 = vld [vmem:[%s5400_s8 + $0x3d] sm:$0xff] }
  0x3d   : > { %4590 = vmatmul.mubr.msk.bf16.gmra.mxu1 %vm336_vm3, %v317_v39  ;;  %4595 = vmatprep.mubr.msk.bf16.mxu0 %vm5279_vm2, %v5277_v1  ;;  %v765_v39 = vpack.c.bf16 %v4078_v36, %v4077_v35  ;;  %v5588_v40 = vpack.c.bf16 %v875_v38, %v874_v37  ;;  %v4116_v35 = vld [vmem:[%s5400_s8 + $0xe1] sm:$0xff]  ;;  %v4140_v36 = vld [vmem:[%s5400_s8 + $0x130] sm:$0xff]  ;;  %v4141_v37 = vld [vmem:[%s5400_s8 + $0x138] sm:$0xff] }
  0x3e   : > { %4617 = vmatprep.mubr.msk.bf16.mxu1 %vm5279_vm2, %v5277_v1 }
  0x44   : > { %4596 = vmatmul.mubr.msk.bf16.vlgmr.msra.gmra.mxu0 %vm336_vm3, %v5464_v46 }
  0x45   : > { %4618 = vmatmul.mubr.msk.bf16.vlgmr.msra.gmra.mxu1 %vm336_vm3, %v646_v47  ;;  %4638 = vmatpush3.bf16.msra.mxu0 %v785_v48  ;;  %v4098_v47 = vld [vmem:[%s5400_s8 + $0x69] sm:$0xff]  ;;  %v4099_v48 = vld [vmem:[%s5400_s8 + $0x71] sm:$0xff] }
  0x46   : > { %4660 = vmatpush3.bf16.msra.mxu1 %v900_v49  ;;  %4599 = vmatprep.mubr.msk.bf16.mxu0 %vm5279_vm2, %v5277_v1  ;;  %v4122_v49 = vld [vmem:[%s6568_s1 + $0x10] sm:$0x3]  ;;  %v1107_v52 = vpack.c.bf16 %v4099_v48, %v4098_v47  ;;  %v4143_v47 = vld [vmem:[%s5400_s8 + $0x148] sm:$0xff]  ;;  %v5724_v48 = vpack.c.bf16 %v4118_v42, %v4117_v41 }
  0x47   : > { %4621 = vmatprep.mubr.msk.bf16.mxu1 %vm5279_vm2, %v5277_v1  ;;  %4681 = vmatprep.subr.bf16.mxu0 %v5277_v1  ;;  %v1245_v53 = vand.u32 %v4122_v49, %v5380_v5 }
  0x48   : > { %4703 = vmatprep.subr.bf16.mxu1 %v5277_v1 }
  0x4c   : > { %4600 = vmatmul.mubr.msk.bf16.gmra.mxu0 %vm336_vm3, %v5480_v54 }
  0x4d   : > { %4622 = vmatmul.mubr.msk.bf16.gmra.mxu1 %vm336_vm3, %v647_v55  ;;  %4603 = vmatprep.mubr.msk.bf16.mxu0 %vm5279_vm2, %v5277_v1  ;;  %v1421_v55 = vand.u32 %v4147_v50, %v5380_v5  ;;  %v4119_v50 = vld [vmem:[%s5400_s8 + $0xf9] sm:$0xff] }
  0x4e   : > { %4625 = vmatprep.mubr.msk.bf16.mxu1 %vm5279_vm2, %v5277_v1 }
  0x54   : > { %4604 = vmatmul.mubr.msk.bf16.gmra.mxu0 %vm336_vm3, %v5494_v60 }
  0x55   : > { %4626 = vmatmul.mubr.msk.bf16.gmra.mxu1 %vm336_vm3, %v648_v61  ;;  %4607 = vmatprep.mubr.msk.bf16.mxu0 %vm5279_vm2, %v5277_v1  ;;  %v1108_v61 = vpack.c.bf16 %v4101_v58, %v4100_v57  ;;  %v4121_v58 = vld [vmem:[%s5400_s8 + $0x109] sm:$0xff] }
  0x56   : > { %4629 = vmatprep.mubr.msk.bf16.mxu1 %vm5279_vm2, %v5277_v1 }
  0x5c   : > { %4608 = vmatmul.mubr.msk.bf16.gmra.mxu0 %vm336_vm3, %v5507_v3 }
  0x5d   : > { %4630 = vmatmul.mubr.msk.bf16.gmra.mxu1 %vm336_vm3, %v649_v4  ;;  %4611 = vmatprep.mubr.msk.bf16.mxu0 %vm5279_vm2, %v5277_v1  ;;  %v994_v4 = vpack.c.bf16 %v5646_v63, %v5643_v62 }
  0x5e   : > { %4633 = vmatprep.mubr.msk.bf16.mxu1 %vm5279_vm2, %v5277_v1 }
  0x64   : > { %4612 = vmatmul.mubr.msk.bf16.gmra.mxu0 %vm336_vm3, %v5518_v8 }
  0x65   : > { %4634 = vmatmul.mubr.msk.bf16.gmra.mxu1 %vm336_vm3, %v650_v9  ;;  %4639 = vmatprep.mubr.msk.bf16.mxu0 %vm5279_vm2, %v5277_v1  ;;  %v5662_v9 = vld [vmem:[%s5400_s8 + $0x41] sm:$0xff] }
  0x66   : > { %4661 = vmatprep.mubr.msk.bf16.mxu1 %vm5279_vm2, %v5277_v1  ;;  %v995_v12 = vpack.c.bf16 %v5662_v9, %v5659_v7 }
  0x6c   : > { %4640 = vmatmul.mubr.msk.bf16.vlgmr.msra.gmra.mxu0 %vm336_vm3, %v762_v16  ;;  %v996_v16 = vpack.c.bf16 %v991_v14, %v991_v14  ;;  %v4179_v14 = vld [vmem:[%s6568_s1 + $0x8] sm:$0x3] }
  0x6d   : > { %4662 = vmatmul.mubr.msk.bf16.vlgmr.msra.gmra.mxu1 %vm336_vm3, %v5537_v17  ;;  %4682 = vmatpush3.bf16.msra.mxu0 %v1015_v18  ;;  %v1111_v18 = vpack.c.bf16 %v4106_v15, %v4106_v15  ;;  %v1844_v25 = vand.u32 %v4179_v14, %v5380_v5 }
  0x6e   : > { %4704 = vmatpush3.bf16.msra.mxu1 %v1130_v19  ;;  %4643 = vmatprep.mubr.msk.bf16.mxu0 %vm5279_vm2, %v5277_v1  ;;  %v4113_v19 = vld [vmem:[%s5400_s8 + $0xc9] sm:$0xff] }
  0x6f   : > { %4665 = vmatprep.mubr.msk.bf16.mxu1 %vm5279_vm2, %v5277_v1  ;;  %4725 = vmatprep.subr.bf16.mxu0 %v5277_v1  ;;  %v5694_v29 = vpack.c.bf16 %v4114_v23, %v4113_v19 }
  0x70   : > { %4747 = vmatprep.subr.bf16.mxu1 %v5277_v1 }
  0x74   : > { %4644 = vmatmul.mubr.msk.bf16.gmra.mxu0 %vm336_vm3, %v763_v27  ;;  %v4158_v27 = vld [vmem:[%s6568_s1 + $0x4] sm:$0x3] }
  0x75   : > { %4666 = vmatmul.mubr.msk.bf16.gmra.mxu1 %vm336_vm3, %v5562_v28  ;;  %4647 = vmatprep.mubr.msk.bf16.mxu0 %vm5279_vm2, %v5277_v1  ;;  %v1616_v32 = vand.u32 %v4158_v27, %v5380_v5 }
  0x76   : > { %4669 = vmatprep.mubr.msk.bf16.mxu1 %vm5279_vm2, %v5277_v1 }
  0x7c   : > { %4648 = vmatmul.mubr.msk.bf16.gmra.mxu0 %vm336_vm3, %v764_v33  ;;  %v4115_v33 = vld [vmem:[%s5400_s8 + $0xd9] sm:$0xff] }
  0x7d   : > { %4670 = vmatmul.mubr.msk.bf16.gmra.mxu1 %vm336_vm3, %v5575_v34  ;;  %4651 = vmatprep.mubr.msk.bf16.mxu0 %vm5279_vm2, %v5277_v1  ;;  %v5710_v38 = vpack.c.bf16 %v4116_v35, %v4115_v33 }
  0x7e   : > { %4673 = vmatprep.mubr.msk.bf16.mxu1 %vm5279_vm2, %v5277_v1 }
  0x84   : > { %4652 = vmatmul.mubr.msk.bf16.gmra.mxu0 %vm336_vm3, %v765_v39  ;;  %v1400_v39 = vpack.c.bf16 %v4141_v37, %v4140_v36 }
  0x85   : > { %4674 = vmatmul.mubr.msk.bf16.gmra.mxu1 %vm336_vm3, %v5588_v40  ;;  %4655 = vmatprep.mubr.msk.bf16.mxu0 %vm5279_vm2, %v5277_v1 }
  0x86   : > { %4677 = vmatprep.mubr.msk.bf16.mxu1 %vm5279_vm2, %v5277_v1 }
  0x8c   : > { %4656 = vmatmul.mubr.msk.bf16.gmra.mxu0 %vm336_vm3, %v766_v43  ;;  %v4142_v43 = vld [vmem:[%s5400_s8 + $0x140] sm:$0xff] }
  0x8d   : > { %4678 = vmatmul.mubr.msk.bf16.gmra.mxu1 %vm336_vm3, %v5599_v44  ;;  %4683 = vmatprep.mubr.msk.bf16.mxu0 %vm5279_vm2, %v5277_v1  ;;  %v1401_v49 = vpack.c.bf16 %v4143_v47, %v4142_v43 }
  0x8e   : > { %4705 = vmatprep.mubr.msk.bf16.mxu1 %vm5279_vm2, %v5277_v1 }
  0x94   : > { %4684 = vmatmul.mubr.msk.bf16.vlgmr.msra.gmra.mxu0 %vm336_vm3, %v992_v51  ;;  %v4120_v51 = vld [vmem:[%s5400_s8 + $0x101] sm:$0xff] }
  0x95   : > { %4706 = vmatmul.mubr.msk.bf16.vlgmr.msra.gmra.mxu1 %vm336_vm3, %v1107_v52  ;;  %4726 = vmatpush3.bf16.msra.mxu0 %v1245_v53  ;;  %v4144_v52 = vld [vmem:[%s5400_s8 + $0x150] sm:$0xff]  ;;  %v4145_v53 = vld [vmem:[%s5400_s8 + $0x158] sm:$0xff] }
  0x96   : > { %4748 = vmatpush3.bf16.msra.mxu1 %v1421_v55  ;;  %4687 = vmatprep.mubr.msk.bf16.mxu0 %vm5279_vm2, %v5277_v1  ;;  %v5737_v55 = vpack.c.bf16 %v4120_v51, %v4119_v50  ;;  %v1402_v57 = vpack.c.bf16 %v4145_v53, %v4144_v52 }
  0x97   : > { %4709 = vmatprep.mubr.msk.bf16.mxu1 %vm5279_vm2, %v5277_v1  ;;  %4769 = vmatprep.subr.bf16.mxu0 %v5277_v1 }
  0x98   : > { %4791 = vmatprep.subr.bf16.mxu1 %v5277_v1 }
  0x9c   : > { %4688 = vmatmul.mubr.msk.bf16.gmra.mxu0 %vm336_vm3, %v993_v59  ;;  %v4146_v59 = vld [vmem:[%s5400_s8 + $0x160] sm:$0xff] }
  0x9d   : > { %4710 = vmatmul.mubr.msk.bf16.gmra.mxu1 %vm336_vm3, %v1108_v61  ;;  %4691 = vmatprep.mubr.msk.bf16.mxu0 %vm5279_vm2, %v5277_v1  ;;  %v5748_v61 = vpack.c.bf16 %v4121_v58, %v4121_v58  ;;  %v1403_v0 = vpack.c.bf16 %v4146_v59, %v4146_v59  ;;  %v1597_v59 = vpack.c.bf16 %v5659_v7, %v5646_v63 }
  0x9e   : > { %4713 = vmatprep.mubr.msk.bf16.mxu1 %vm5279_vm2, %v5277_v1 }
  0xa4   : > { %4692 = vmatmul.mubr.msk.bf16.gmra.mxu0 %vm336_vm3, %v994_v4 }
  0xa5   : > { %4714 = vmatmul.mubr.msk.bf16.gmra.mxu1 %vm336_vm3, %v1109_v6  ;;  %4695 = vmatprep.mubr.msk.bf16.mxu0 %vm5279_vm2, %v5277_v1 }
  0xa6   : > { %4717 = vmatprep.mubr.msk.bf16.mxu1 %vm5279_vm2, %v5277_v1 }
  0xac   : > { %4696 = vmatmul.mubr.msk.bf16.gmra.mxu0 %vm336_vm3, %v995_v12  ;;  %v4164_v12 = vld [vmem:[%s6568_s1 + $0x6] sm:$0x3] }
  0xad   : > { %4718 = vmatmul.mubr.msk.bf16.gmra.mxu1 %vm336_vm3, %v1110_v13  ;;  %4699 = vmatprep.mubr.msk.bf16.mxu0 %vm5279_vm2, %v5277_v1  ;;  %v1730_v19 = vand.u32 %v4164_v12, %v5380_v5 }
  0xae   : > { %4721 = vmatprep.mubr.msk.bf16.mxu1 %vm5279_vm2, %v5277_v1 }
  0xb4   : > { %4700 = vmatmul.mubr.msk.bf16.gmra.mxu0 %vm336_vm3, %v996_v16 }
  0xb5   : > { %4722 = vmatmul.mubr.msk.bf16.gmra.mxu1 %vm336_vm3, %v1111_v18  ;;  %4727 = vmatprep.mubr.msk.bf16.mxu0 %vm5279_vm2, %v5277_v1  ;;  %v1594_v18 = vpack.c.bf16 %v5607_v45, %v1585_v11 }
  0xb6   : > { %4749 = vmatprep.mubr.msk.bf16.mxu1 %vm5279_vm2, %v5277_v1 }
  0xbc   : > { %4728 = vmatmul.mubr.msk.bf16.vlgmr.msra.gmra.mxu0 %vm336_vm3, %v5694_v29 }
  0xbd   : > { %4750 = vmatmul.mubr.msk.bf16.vlgmr.msra.gmra.mxu1 %vm336_vm3, %v1399_v30  ;;  %4770 = vmatpush3.bf16.msra.mxu0 %v1511_v31 }
  0xbe   : > { %4792 = vmatpush3.bf16.msra.mxu1 %v1616_v32  ;;  %4731 = vmatprep.mubr.msk.bf16.mxu0 %vm5279_vm2, %v5277_v1 }
  0xbf   : > { %4753 = vmatprep.mubr.msk.bf16.mxu1 %vm5279_vm2, %v5277_v1  ;;  %4813 = vmatprep.subr.bf16.mxu0 %v5277_v1 }
  0xc0   : > { %4835 = vmatprep.subr.bf16.mxu1 %v5277_v1 }
  0xc4   : > { %4732 = vmatmul.mubr.msk.bf16.gmra.mxu0 %vm336_vm3, %v5710_v38 }
  0xc5   : > { %4754 = vmatmul.mubr.msk.bf16.gmra.mxu1 %vm336_vm3, %v1400_v39  ;;  %4735 = vmatprep.mubr.msk.bf16.mxu0 %vm5279_vm2, %v5277_v1 }
  0xc6   : > { %4757 = vmatprep.mubr.msk.bf16.mxu1 %vm5279_vm2, %v5277_v1 }
  0xcc   : > { %4736 = vmatmul.mubr.msk.bf16.gmra.mxu0 %vm336_vm3, %v5724_v48 }
  0xcd   : > { %4758 = vmatmul.mubr.msk.bf16.gmra.mxu1 %vm336_vm3, %v1401_v49  ;;  %4739 = vmatprep.mubr.msk.bf16.mxu0 %vm5279_vm2, %v5277_v1 }
  0xce   : > { %4761 = vmatprep.mubr.msk.bf16.mxu1 %vm5279_vm2, %v5277_v1 }
  0xd4   : > { %4740 = vmatmul.mubr.msk.bf16.gmra.mxu0 %vm336_vm3, %v5737_v55 }
  0xd5   : > { %4762 = vmatmul.mubr.msk.bf16.gmra.mxu1 %vm336_vm3, %v1402_v57  ;;  %4743 = vmatprep.mubr.msk.bf16.mxu0 %vm5279_vm2, %v5277_v1 }
  0xd6   : > { %4765 = vmatprep.mubr.msk.bf16.mxu1 %vm5279_vm2, %v5277_v1 }
  0xdc   : > { %v393_v2 = vpop.f32.mrf.mxu0  ;;  %4744 = vmatmul.mubr.msk.bf16.gmra.mxu0 %vm336_vm3, %v5748_v61 }
  0xdd   : > { %v483_v4 = vpop.f32.mrf.mxu1  ;;  %4766 = vmatmul.mubr.msk.bf16.gmra.mxu1 %vm336_vm3, %v1403_v0  ;;  %4771 = vmatprep.mubr.msk.bf16.mxu0 %vm5279_vm2, %v5277_v1 }
  0xde   : > { %v5755_v6 = vadd.f32 %v483_v4, %v393_v2  ;;  %v4553_v10 = vpop.f32.mrf.mxu0  ;;  %4793 = vmatprep.mubr.msk.bf16.mxu1 %vm5279_vm2, %v5277_v1 }
  0xdf   : > { %v4575_v13 = vpop.f32.mrf.mxu1 }
  0xe0   : > { %v396_v15 = vpop.f32.mrf.mxu0  ;;  %v1598_v13 = vpack.c.bf16 %v5662_v9, %v5662_v9  ;;  %v4171_v9 = vld [vmem:[%s5400_s8 + $0x6d] sm:$0xff] }
  0xe1   : > { %v486_v16 = vpop.f32.mrf.mxu1 }
  0xe2   : > { %v5768_v23 = vadd.f32 %v486_v16, %v396_v15  ;;  %v4554_v24 = vpop.f32.mrf.mxu0 }
  0xe3   : > { %v4576_v26 = vpop.f32.mrf.mxu1 }
  0xe4   : > { %v401_v27 = vpop.f32.mrf.mxu0  ;;  %4772 = vmatmul.mubr.msk.bf16.vlgmr.msra.gmra.mxu0 %vm336_vm3, %v5464_v46  ;;  %v4194_v26 = vld [vmem:[%s6568_s1 + $0xa] sm:$0x3] }
  0xe5   : > { %v491_v30 = vpop.f32.mrf.mxu1  ;;  %4794 = vmatmul.mubr.msk.bf16.vlgmr.msra.gmra.mxu1 %vm336_vm3, %v1594_v18  ;;  %4814 = vmatpush3.bf16.msra.mxu0 %v1730_v19 }
  0xe6   : > { %v5774_v31 = vadd.f32 %v491_v30, %v401_v27  ;;  %v4557_v32 = vpop.f32.mrf.mxu0  ;;  %4836 = vmatpush3.bf16.msra.mxu1 %v1844_v25  ;;  %4775 = vmatprep.mubr.msk.bf16.mxu0 %vm5279_vm2, %v5277_v1  ;;  %v4170_v25 = vld [vmem:[%s5400_s8 + $0x65] sm:$0xff] }
  0xe7   : > { %v4579_v45 = vpop.f32.mrf.mxu1  ;;  %4797 = vmatprep.mubr.msk.bf16.mxu1 %vm5279_vm2, %v5277_v1  ;;  %4857 = vmatprep.subr.bf16.mxu0 %v5277_v1 }
  0xe8   : > { %v404_v33 = vpop.f32.mrf.mxu0  ;;  %4879 = vmatprep.subr.bf16.mxu1 %v5277_v1 }
  0xe9   : > { %v494_v46 = vpop.f32.mrf.mxu1 }
  0xea   : > { %v5782_v35 = vadd.f32 %v494_v46, %v404_v33  ;;  %v4558_v36 = vpop.f32.mrf.mxu0  ;;  %v1822_v33 = vpack.c.bf16 %v4171_v9, %v4170_v25  ;;  %v1958_v46 = vand.u32 %v4194_v26, %v5380_v5 }
  0xeb   : > { %v4580_v37 = vpop.f32.mrf.mxu1 }
  0xec   : > { %v409_v39 = vpop.f32.mrf.mxu0  ;;  %4776 = vmatmul.mubr.msk.bf16.gmra.mxu0 %vm336_vm3, %v5480_v54  ;;  %v1596_v54 = vpack.c.bf16 %v5643_v62, %v5626_v56 }
  0xed   : > { %v499_v41 = vpop.f32.mrf.mxu1  ;;  %4798 = vmatmul.mubr.msk.bf16.gmra.mxu1 %vm336_vm3, %v1595_v22  ;;  %4779 = vmatprep.mubr.msk.bf16.mxu0 %vm5279_vm2, %v5277_v1 }
  0xee   : > { %v5792_v42 = vadd.f32 %v499_v41, %v409_v39  ;;  %v4561_v43 = vpop.f32.mrf.mxu0  ;;  %4801 = vmatprep.mubr.msk.bf16.mxu1 %vm5279_vm2, %v5277_v1 }
  0xef   : > { %v4583_v47 = vpop.f32.mrf.mxu1 }
  0xf0   : > { %v412_v49 = vpop.f32.mrf.mxu0 }
  0xf1   : > { %v502_v50 = vpop.f32.mrf.mxu1 }
  0xf2   : > { %v5798_v51 = vadd.f32 %v502_v50, %v412_v49  ;;  %v4562_v20 = vpop.f32.mrf.mxu0  ;;  %v4172_v50 = vld [vmem:[%s5400_s8 + $0x75] sm:$0xff] }
  0xf3   : > { %v4584_v21 = vpop.f32.mrf.mxu1 }
  0xf4   : > { %v417_v22 = vpop.f32.mrf.mxu0  ;;  %4780 = vmatmul.mubr.msk.bf16.gmra.mxu0 %vm336_vm3, %v5494_v60 }
  0xf5   : > { %v507_v52 = vpop.f32.mrf.mxu1  ;;  %4802 = vmatmul.mubr.msk.bf16.gmra.mxu1 %vm336_vm3, %v1596_v54  ;;  %4783 = vmatprep.mubr.msk.bf16.mxu0 %vm5279_vm2, %v5277_v1  ;;  %v4173_v54 = vld [vmem:[%s5400_s8 + $0x7d] sm:$0xff] }
  0xf6   : > { %v5805_v53 = vadd.f32 %v507_v52, %v417_v22  ;;  %v4565_v57 = vpop.f32.mrf.mxu0  ;;  %4805 = vmatprep.mubr.msk.bf16.mxu1 %vm5279_vm2, %v5277_v1  ;;  %v1823_v52 = vpack.c.bf16 %v4173_v54, %v4172_v50 }
  0xf7   : > { %v4587_v56 = vpop.f32.mrf.mxu1 }
  0xf8   : > { %v420_v62 = vpop.f32.mrf.mxu0 }
  0xf9   : > { %v510_v58 = vpop.f32.mrf.mxu1 }
  0xfa   : > { %v5811_v0 = vadd.f32 %v510_v58, %v420_v62  ;;  %v4566_v60 = vpop.f32.mrf.mxu0 }
  0xfb   : > { %v4588_v2 = vpop.f32.mrf.mxu1 }
  0xfc   : > { %v425_v4 = vpop.f32.mrf.mxu0  ;;  %4784 = vmatmul.mubr.msk.bf16.gmra.mxu0 %vm336_vm3, %v5507_v3 }
  0xfd   : > { %v515_v3 = vpop.f32.mrf.mxu1  ;;  %4806 = vmatmul.mubr.msk.bf16.gmra.mxu1 %vm336_vm3, %v1597_v59  ;;  %4787 = vmatprep.mubr.msk.bf16.mxu0 %vm5279_vm2, %v5277_v1 }
  0xfe   : > { %v5846_v63 = vadd.f32 %v515_v3, %v425_v4  ;;  %v4569_v7 = vpop.f32.mrf.mxu0  ;;  %4809 = vmatprep.mubr.msk.bf16.mxu1 %vm5279_vm2, %v5277_v1  ;;  %v4175_v4 = vld [vmem:[%s5400_s8 + $0x8d] sm:$0xff] }
  0xff   : > { %v4591_v10 = vpop.f32.mrf.mxu1 }
 0x100   : > { %v428_v11 = vpop.f32.mrf.mxu0 }
 0x101   : > { %v518_v12 = vpop.f32.mrf.mxu1 }
 0x102   : > { %v4570_v14 = vpop.f32.mrf.mxu0 }
 0x103   : > { %v4592_v15 = vpop.f32.mrf.mxu1 }
 0x104   : > { %v590_v16 = vpop.f32.mrf.mxu0  ;;  %4788 = vmatmul.mubr.msk.bf16.gmra.mxu0 %vm336_vm3, %v5518_v8 }
 0x105   : > { %v628_v18 = vadd.f32 %v590_v16, %v5755_v6  ;;  %v705_v19 = vpop.f32.mrf.mxu1  ;;  %4810 = vmatmul.mubr.msk.bf16.gmra.mxu1 %vm336_vm3, %v1598_v13  ;;  %4815 = vmatprep.mubr.msk.bf16.mxu0 %vm5279_vm2, %v5277_v1  ;;  %v4209_v6 = vld [vmem:[%s6568_s1 + $0xc] sm:$0x3] }
 0x106   : > { %v4597_v24 = vpop.f32.mrf.mxu0  ;;  %4837 = vmatprep.mubr.msk.bf16.mxu1 %vm5279_vm2, %v5277_v1  ;;  %v2072_v37 = vand.u32 %v4209_v6, %v5380_v5 }
 0x107   : > { %v5865_v27 = vadd.f32 %v705_v19, %v628_v18  ;;  %v4619_v8 = vpop.f32.mrf.mxu1  ;;  %v4177_v24 = vld [vmem:[%s5400_s8 + $0x9d] sm:$0xff] }
 0x108   : > { %v593_v30 = vpop.f32.mrf.mxu0 }
 0x109   : > { %v629_v32 = vadd.f32 %v593_v30, %v5768_v23  ;;  %v708_v45 = vpop.f32.mrf.mxu1 }
 0x10a   : > { %v4598_v36 = vpop.f32.mrf.mxu0 }
 0x10b   : > { %v5873_v39 = vadd.f32 %v708_v45, %v629_v32  ;;  %v4620_v41 = vpop.f32.mrf.mxu1 }
 0x10c   : > { %v598_v43 = vpop.f32.mrf.mxu0  ;;  %4816 = vmatmul.mubr.msk.bf16.vlgmr.msra.gmra.mxu0 %vm336_vm3, %v5537_v17 }
 0x10d   : > { %v630_v47 = vadd.f32 %v598_v43, %v5774_v31  ;;  %v713_v49 = vpop.f32.mrf.mxu1  ;;  %4838 = vmatmul.mubr.msk.bf16.vlgmr.msra.gmra.mxu1 %vm336_vm3, %v1822_v33  ;;  %4858 = vmatpush3.bf16.msra.mxu0 %v1958_v46 }
 0x10e   : > { %v4601_v23 = vpop.f32.mrf.mxu0  ;;  %4880 = vmatpush3.bf16.msra.mxu1 %v2072_v37  ;;  %4819 = vmatprep.mubr.msk.bf16.mxu0 %vm5279_vm2, %v5277_v1 }
 0x10f   : > { %v5883_v20 = vadd.f32 %v713_v49, %v630_v47  ;;  %v4623_v21 = vpop.f32.mrf.mxu1  ;;  %4841 = vmatprep.mubr.msk.bf16.mxu1 %vm5279_vm2, %v5277_v1  ;;  %4901 = vmatprep.subr.bf16.mxu0 %v5277_v1 }
 0x110   : > { %v601_v17 = vpop.f32.mrf.mxu0  ;;  %4923 = vmatprep.subr.bf16.mxu1 %v5277_v1  ;;  %v4185_v21 = vld [vmem:[%s5400_s8 + $0xc5] sm:$0xff] }
 0x111   : > { %v631_v31 = vadd.f32 %v601_v17, %v5782_v35  ;;  %v716_v22 = vpop.f32.mrf.mxu1  ;;  %v4174_v35 = vld [vmem:[%s5400_s8 + $0x85] sm:$0xff]  ;;  %v4186_v17 = vld [vmem:[%s5400_s8 + $0xcd] sm:$0xff] }
 0x112   : > { %v4602_v57 = vpop.f32.mrf.mxu0  ;;  %v1824_v11 = vpack.c.bf16 %v4175_v4, %v4174_v35 }
 0x113   : > { %v5890_v56 = vadd.f32 %v716_v22, %v631_v31  ;;  %v4624_v62 = vpop.f32.mrf.mxu1  ;;  %v4224_v22 = vld [vmem:[%s6568_s1 + $0xe] sm:$0x3] }
 0x114   : > { %v606_v58 = vpop.f32.mrf.mxu0  ;;  %4820 = vmatmul.mubr.msk.bf16.gmra.mxu0 %vm336_vm3, %v5562_v28  ;;  %v1936_v62 = vpack.c.bf16 %v4186_v17, %v4185_v21 }
 0x115   : > { %v632_v59 = vadd.f32 %v606_v58, %v5792_v42  ;;  %v721_v60 = vpop.f32.mrf.mxu1  ;;  %4842 = vmatmul.mubr.msk.bf16.gmra.mxu1 %vm336_vm3, %v1823_v52  ;;  %4823 = vmatprep.mubr.msk.bf16.mxu0 %vm5279_vm2, %v5277_v1 }
 0x116   : > { %v4605_v2 = vpop.f32.mrf.mxu0  ;;  %4845 = vmatprep.mubr.msk.bf16.mxu1 %vm5279_vm2, %v5277_v1 }
 0x117   : > { %v5902_v3 = vadd.f32 %v721_v60, %v632_v59  ;;  %v4627_v7 = vpop.f32.mrf.mxu1  ;;  %v2186_v60 = vand.u32 %v4224_v22, %v5380_v5 }
 0x118   : > { %v609_v10 = vpop.f32.mrf.mxu0 }
 0x119   : > { %v633_v28 = vadd.f32 %v609_v10, %v5798_v51  ;;  %v724_v42 = vpop.f32.mrf.mxu1  ;;  %v4176_v51 = vld [vmem:[%s5400_s8 + $0x95] sm:$0xff] }
 0x11a   : > { %v4606_v12 = vpop.f32.mrf.mxu0  ;;  %v1825_v8 = vpack.c.bf16 %v4177_v24, %v4176_v51 }
 0x11b   : > { %v5905_v13 = vadd.f32 %v724_v42, %v633_v28  ;;  %v4628_v14 = vpop.f32.mrf.mxu1 }
 0x11c   : > { %v614_v15 = vpop.f32.mrf.mxu0  ;;  %4824 = vmatmul.mubr.msk.bf16.gmra.mxu0 %vm336_vm3, %v5575_v34 }
 0x11d   : > { %v634_v16 = vadd.f32 %v614_v15, %v5805_v53  ;;  %v729_v18 = vpop.f32.mrf.mxu1  ;;  %4846 = vmatmul.mubr.msk.bf16.gmra.mxu1 %vm336_vm3, %v1824_v11  ;;  %4827 = vmatprep.mubr.msk.bf16.mxu0 %vm5279_vm2, %v5277_v1  ;;  %v4188_v11 = vld [vmem:[%s5400_s8 + $0xdd] sm:$0xff] }
 0x11e   : > { %v4609_v19 = vpop.f32.mrf.mxu0  ;;  %4849 = vmatprep.mubr.msk.bf16.mxu1 %vm5279_vm2, %v5277_v1 }
 0x11f   : > { %v5917_v25 = vadd.f32 %v729_v18, %v634_v16  ;;  %v4631_v9 = vpop.f32.mrf.mxu1 }
 0x120   : > { %v617_v26 = vpop.f32.mrf.mxu0 }
 0x121   : > { %v635_v34 = vadd.f32 %v617_v26, %v5811_v0  ;;  %v732_v53 = vpop.f32.mrf.mxu1  ;;  %v4178_v0 = vld [vmem:[%s5400_s8 + $0xa5] sm:$0xff] }
 0x122   : > { %v4610_v6 = vpop.f32.mrf.mxu0  ;;  %v1826_v47 = vpack.c.bf16 %v4178_v0, %v4178_v0 }
 0x123   : > { %v5920_v30 = vadd.f32 %v732_v53, %v635_v34  ;;  %v4632_v32 = vpop.f32.mrf.mxu1  ;;  %v4189_v34 = vld [vmem:[%s5400_s8 + $0xe5] sm:$0xff]  ;;  %v4190_v53 = vld [vmem:[%s5400_s8 + $0xed] sm:$0xff] }
 0x124   : > { %v622_v45 = vpop.f32.mrf.mxu0  ;;  %4828 = vmatmul.mubr.msk.bf16.gmra.mxu0 %vm336_vm3, %v5588_v40 }
 0x125   : > { %v636_v33 = vadd.f32 %v622_v45, %v5846_v63  ;;  %v737_v46 = vpop.f32.mrf.mxu1  ;;  %4850 = vmatmul.mubr.msk.bf16.gmra.mxu1 %vm336_vm3, %v1825_v8  ;;  %4831 = vmatprep.mubr.msk.bf16.mxu0 %vm5279_vm2, %v5277_v1 }
 0x126   : > { %v4613_v36 = vpop.f32.mrf.mxu0  ;;  %4853 = vmatprep.mubr.msk.bf16.mxu1 %vm5279_vm2, %v5277_v1 }
 0x127   : > { %v5931_v37 = vadd.f32 %v737_v46, %v636_v33  ;;  %v4635_v41 = vpop.f32.mrf.mxu1 }
 0x128   : > { %v625_v43 = vpop.f32.mrf.mxu0 }
 0x129   : > { %v740_v40 = vpop.f32.mrf.mxu1 }
 0x12a   : > { %v4614_v63 = vpop.f32.mrf.mxu0  ;;  %v4191_v40 = vld [vmem:[%s5400_s8 + $0xf5] sm:$0xff] }
 0x12b   : > { %v4636_v49 = vpop.f32.mrf.mxu1 }
 0x12c   : > { %v821_v23 = vpop.f32.mrf.mxu0  ;;  %4832 = vmatmul.mubr.msk.bf16.gmra.mxu0 %vm336_vm3, %v5599_v44 }
 0x12d   : > { %v859_v50 = vadd.f32 %v821_v23, %v5865_v27  ;;  %v936_v54 = vpop.f32.mrf.mxu1  ;;  %4854 = vmatmul.mubr.msk.bf16.gmra.mxu1 %vm336_vm3, %v1826_v47  ;;  %4859 = vmatprep.mubr.msk.bf16.mxu0 %vm5279_vm2, %v5277_v1  ;;  %v4230_v27 = vld [vmem:[%s6568_s1 + $0x10] sm:$0x3]  ;;  %v4192_v47 = vld [vmem:[%s5400_s8 + $0xfd] sm:$0xff] }
 0x12e   : > { %v4641_v31 = vpop.f32.mrf.mxu0  ;;  %4881 = vmatprep.mubr.msk.bf16.mxu1 %vm5279_vm2, %v5277_v1  ;;  %v2300_v35 = vand.u32 %v4230_v27, %v5380_v5  ;;  %v4193_v27 = vld [vmem:[%s5400_s8 + $0x105] sm:$0xff] }
 0x12f   : > { %v5946_v52 = vadd.f32 %v936_v54, %v859_v50  ;;  %v4663_v44 = vpop.f32.mrf.mxu1  ;;  %v1939_v50 = vpack.c.bf16 %v4192_v47, %v4191_v40  ;;  %v2273_v47 = vld [vmem:[%s5400_s8 + $0x2a] sm:$0xff] }
 0x130   : > { %v824_v57 = vpop.f32.mrf.mxu0 }
 0x131   : > { %v860_v58 = vadd.f32 %v824_v57, %v5873_v39  ;;  %v939_v59 = vpop.f32.mrf.mxu1  ;;  %v4187_v39 = vld [vmem:[%s5400_s8 + $0xd5] sm:$0xff] }
 0x132   : > { %v4642_v2 = vpop.f32.mrf.mxu0 }
 0x133   : > { %v5954_v4 = vadd.f32 %v939_v59, %v860_v58  ;;  %v4664_v7 = vpop.f32.mrf.mxu1  ;;  %v1940_v58 = vpack.c.bf16 %v4193_v27, %v4193_v27  ;;  %v4222_v27 = vld [vmem:[%s5400_s8 + $0x161] sm:$0xff] }
 0x134   : > { %v829_v10 = vpop.f32.mrf.mxu0  ;;  %4860 = vmatmul.mubr.msk.bf16.vlgmr.msra.gmra.mxu0 %vm336_vm3, %v1936_v62  ;;  %v4215_v7 = vld [vmem:[%s5400_s8 + $0x129] sm:$0xff] }
 0x135   : > { %v861_v28 = vadd.f32 %v829_v10, %v5883_v20  ;;  %v944_v42 = vpop.f32.mrf.mxu1  ;;  %4882 = vmatmul.mubr.msk.bf16.vlgmr.msra.gmra.mxu1 %vm336_vm3, %v5694_v29  ;;  %4902 = vmatpush3.bf16.msra.mxu0 %v2186_v60  ;;  %v1937_v29 = vpack.c.bf16 %v4188_v11, %v4187_v39  ;;  %v4216_v10 = vld [vmem:[%s5400_s8 + $0x131] sm:$0xff] }
 0x136   : > { %v4645_v12 = vpop.f32.mrf.mxu0  ;;  %4924 = vmatpush3.bf16.msra.mxu1 %v2300_v35  ;;  %4863 = vmatprep.mubr.msk.bf16.mxu0 %vm5279_vm2, %v5277_v1  ;;  %v2270_v39 = vld [vmem:[%s5400_s8 + $0x12] sm:$0xff] }
 0x137   : > { %v5964_v5 = vadd.f32 %v944_v42, %v861_v28  ;;  %v4667_v14 = vpop.f32.mrf.mxu1  ;;  %4885 = vmatprep.mubr.msk.bf16.mxu1 %vm5279_vm2, %v5277_v1  ;;  %4945 = vmatprep.subr.bf16.mxu0 %v5277_v1  ;;  %v2269_v42 = vld [vmem:[%s5400_s8 + $0xa] sm:$0xff] }
 0x138   : > { %v832_v20 = vpop.f32.mrf.mxu0  ;;  %4959 = vmatprep.subr.bf16.mxu1 %v5277_v1  ;;  %v2164_v14 = vpack.c.bf16 %v4216_v10, %v4215_v7 }
 0x139   : > { %v862_v15 = vadd.f32 %v832_v20, %v5890_v56  ;;  %v947_v16 = vpop.f32.mrf.mxu1  ;;  %v2278_v20 = vpack.c.bf16 %v2270_v39, %v2269_v42 }
 0x13a   : > { %v4646_v18 = vpop.f32.mrf.mxu0 }
 0x13b   : > { %v5971_v19 = vadd.f32 %v947_v16, %v862_v15  ;;  %v4668_v51 = vpop.f32.mrf.mxu1  ;;  %v5188_v15 = vld [vmem:[%s6569_s2 + $0x8] sm:$0xff]  }
 0x13c   : > { %v837_v24 = vpop.f32.mrf.mxu0  ;;  %4864 = vmatmul.mubr.msk.bf16.gmra.mxu0 %vm336_vm3, %v1937_v29 }
 0x13d   : > { %v863_v9 = vadd.f32 %v837_v24, %v5902_v3  ;;  %v952_v26 = vpop.f32.mrf.mxu1  ;;  %4886 = vmatmul.mubr.msk.bf16.gmra.mxu1 %vm336_vm3, %v5710_v38  ;;  %4867 = vmatprep.mubr.msk.bf16.mxu0 %vm5279_vm2, %v5277_v1  ;;  %v1938_v3 = vpack.c.bf16 %v4190_v53, %v4189_v34  ;;  %v4217_v24 = vld [vmem:[%s5400_s8 + $0x139] sm:$0xff]  ;;  %v2272_v53 = vld [vmem:[%s5400_s8 + $0x22] sm:$0xff] }
 0x13e   : > { %v4649_v56 = vpop.f32.mrf.mxu0  ;;  %4889 = vmatprep.mubr.msk.bf16.mxu1 %vm5279_vm2, %v5277_v1  ;;  %v2271_v34 = vld [vmem:[%s5400_s8 + $0x1a] sm:$0xff] }
 0x13f   : > { %v5983_v8 = vadd.f32 %v952_v26, %v863_v9  ;;  %v4671_v6 = vpop.f32.mrf.mxu1  ;;  %v4218_v9 = vld [vmem:[%s5400_s8 + $0x141] sm:$0xff] }
 0x140   : > { %v840_v32 = vpop.f32.mrf.mxu0 }
 0x141   : > { %v864_v45 = vadd.f32 %v840_v32, %v5905_v13  ;;  %v955_v33 = vpop.f32.mrf.mxu1  ;;  %v2165_v32 = vpack.c.bf16 %v4218_v9, %v4217_v24 }
 0x142   : > { %v4650_v38 = vpop.f32.mrf.mxu0 }
 0x143   : > { %v5986_v46 = vadd.f32 %v955_v33, %v864_v45  ;;  %v4672_v36 = vpop.f32.mrf.mxu1  ;;  %v2279_v45 = vpack.c.bf16 %v2272_v53, %v2271_v34 }
 0x144   : > { %v845_v0 = vpop.f32.mrf.mxu0  ;;  %4868 = vmatmul.mubr.msk.bf16.gmra.mxu0 %vm336_vm3, %v1938_v3 }
 0x145   : > { %v865_v41 = vadd.f32 %v845_v0, %v5917_v25  ;;  %v960_v43 = vpop.f32.mrf.mxu1  ;;  %4890 = vmatmul.mubr.msk.bf16.gmra.mxu1 %vm336_vm3, %v5724_v48  ;;  %4871 = vmatprep.mubr.msk.bf16.mxu0 %vm5279_vm2, %v5277_v1 }
 0x146   : > { %v4653_v13 = vpop.f32.mrf.mxu0  ;;  %4893 = vmatprep.mubr.msk.bf16.mxu1 %vm5279_vm2, %v5277_v1 }
 0x147   : > { %v5998_v63 = vadd.f32 %v960_v43, %v865_v41  ;;  %v4675_v49 = vpop.f32.mrf.mxu1  ;;  %v4219_v41 = vld [vmem:[%s5400_s8 + $0x149] sm:$0xff]  ;;  %v4220_v43 = vld [vmem:[%s5400_s8 + $0x151] sm:$0xff] }
 0x148   : > { %v848_v23 = vpop.f32.mrf.mxu0  ;;  %v2274_v13 = vld [vmem:[%s5400_s8 + $0x32] sm:$0xff] }
 0x149   : > { %v866_v25 = vadd.f32 %v848_v23, %v5920_v30  ;;  %v963_v54 = vpop.f32.mrf.mxu1 }
 0x14a   : > { %v4654_v21 = vpop.f32.mrf.mxu0 }
 0x14b   : > { %v6001_v48 = vadd.f32 %v963_v54, %v866_v25  ;;  %v4676_v17 = vpop.f32.mrf.mxu1  ;;  %v2280_v54 = vpack.c.bf16 %v2274_v13, %v2273_v47 }
 0x14c   : > { %v853_v31 = vpop.f32.mrf.mxu0  ;;  %4872 = vmatmul.mubr.msk.bf16.gmra.mxu0 %vm336_vm3, %v1939_v50  ;;  %v2166_v50 = vpack.c.bf16 %v4220_v43, %v4219_v41 }
 0x14d   : > { %v867_v22 = vadd.f32 %v853_v31, %v5931_v37  ;;  %v968_v44 = vpop.f32.mrf.mxu1  ;;  %4894 = vmatmul.mubr.msk.bf16.gmra.mxu1 %vm336_vm3, %v5737_v55  ;;  %4875 = vmatprep.mubr.msk.bf16.mxu0 %vm5279_vm2, %v5277_v1 }
 0x14e   : > { %v4657_v30 = vpop.f32.mrf.mxu0  ;;  %4897 = vmatprep.mubr.msk.bf16.mxu1 %vm5279_vm2, %v5277_v1 }
 0x14f   : > { %v6012_v57 = vadd.f32 %v968_v44, %v867_v22  ;;  %v4679_v62 = vpop.f32.mrf.mxu1  ;;  %v4221_v44 = vld [vmem:[%s5400_s8 + $0x159] sm:$0xff] }
 0x150   : > { %v856_v37 = vpop.f32.mrf.mxu0  ;;  %v2275_v62 = vld [vmem:[%s5400_s8 + $0x3a] sm:$0xff] }
 0x151   : > { %v971_v59 = vpop.f32.mrf.mxu1  ;;  %v2276_v37 = vld [vmem:[%s5400_s8 + $0x42] sm:$0xff] }
 0x152   : > { %v4658_v60 = vpop.f32.mrf.mxu0  ;;  %v2281_v7 = vpack.c.bf16 %v2276_v37, %v2275_v62 }
 0x153   : > { %v4680_v55 = vpop.f32.mrf.mxu1  ;;  %v2167_v60 = vpack.c.bf16 %v4222_v27, %v4221_v44 }
 0x154   : > { %v6014_v2 = vpop.f32.mrf.mxu0  ;;  %4876 = vmatmul.mubr.msk.bf16.gmra.mxu0 %vm336_vm3, %v1940_v58 }
 0x155   : > { %v6017_v35 = vpop.f32.mrf.mxu1  ;;  %4898 = vmatmul.mubr.msk.bf16.gmra.mxu1 %vm336_vm3, %v5748_v61  ;;  %4903 = vmatprep.mubr.msk.bf16.mxu0 %vm5279_vm2, %v5277_v1 }
 0x156   : > { %v4685_v28 = vpop.f32.mrf.mxu0  ;;  %4925 = vmatprep.mubr.msk.bf16.mxu1 %vm5279_vm2, %v5277_v1 }
 0x157   : > { %v4707_v11 = vpop.f32.mrf.mxu1 }
 0x158   : > { %v6029_v12 = vpop.f32.mrf.mxu0  ;;  %v4223_v11 = vld [vmem:[%s5400_s8 + $0x169] sm:$0xff] }
 0x159   : > { %v6031_v61 = vpop.f32.mrf.mxu1  ;;  %v2168_v24 = vpack.c.bf16 %v4223_v11, %v4223_v11 }
 0x15a   : > { %v4686_v29 = vpop.f32.mrf.mxu0 }
 0x15b   : > { %v4708_v16 = vpop.f32.mrf.mxu1  ;;  %v1089_v29 = vadd.f32 %v6014_v2, %v5946_v52 }
 0x15c   : > { %v6036_v18 = vpop.f32.mrf.mxu0  ;;  %4904 = vmatmul.mubr.msk.bf16.vlgmr.msra.gmra.mxu0 %vm336_vm3, %v2164_v14 }
 0x15d   : > { %v6039_v51 = vpop.f32.mrf.mxu1  ;;  %4926 = vmatmul.mubr.msk.bf16.vlgmr.msra.gmra.mxu1 %vm336_vm3, %v2278_v20  ;;  %4907 = vmatprep.mubr.msk.bf16.mxu0 %vm5279_vm2, %v5277_v1  ;;  %v2277_v20 = vld [vmem:[%s5400_s8 + $0x4a] sm:$0xff]  ;;  %v1204_v53 = vadd.f32 %v6017_v35, %v1089_v29 }
 0x15e   : > { %v4689_v26 = vpop.f32.mrf.mxu0  ;;  %4929 = vmatprep.mubr.msk.bf16.mxu1 %vm5279_vm2, %v5277_v1  ;;  %4946 = vmatpush3.bf16.msra.mxu0 %v5188_v15 }
 0x15f   : > { %v4711_v56 = vpop.f32.mrf.mxu1  ;;  %4973 = vmatprep.subr.bf16.mxu0 %v5277_v1  ;;  %v2282_v26 = vpack.c.bf16 %v2277_v20, %v2277_v20 }
 0x160   : > { %v6051_v6 = vpop.f32.mrf.mxu0  ;;  %v1090_v56 = vadd.f32 %v6029_v12, %v5954_v4  ;;  %v1091_v12 = vadd.f32 %v6036_v18, %v5964_v5 }
 0x161   : > { %v6053_v3 = vpop.f32.mrf.mxu1 }
 0x162   : > { %v4690_v33 = vpop.f32.mrf.mxu0  ;;  %v1205_v4 = vadd.f32 %v6031_v61, %v1090_v56 }
 0x163   : > { %v4712_v38 = vpop.f32.mrf.mxu1  ;;  %v6111_v33 = vld [vmem:[%s6571_s4] ss:$0 sm:$0xff] }
 0x164   : > { %v6055_v36 = vpop.f32.mrf.mxu0  ;;  %4908 = vmatmul.mubr.msk.bf16.gmra.mxu0 %vm336_vm3, %v2165_v32 }
 0x165   : > { %v6058_v0 = vpop.f32.mrf.mxu1  ;;  %4930 = vmatmul.mubr.msk.bf16.gmra.mxu1 %vm336_vm3, %v2279_v45  ;;  %4911 = vmatprep.mubr.msk.bf16.mxu0 %vm5279_vm2, %v5277_v1 }
 0x166   : > { %v4693_v40 = vpop.f32.mrf.mxu0  ;;  %4933 = vmatprep.mubr.msk.bf16.mxu1 %vm5279_vm2, %v5277_v1 }
 0x167   : > { %v4715_v49 = vpop.f32.mrf.mxu1 }
 0x168   : > { %v6069_v23 = vpop.f32.mrf.mxu0 }
 0x169   : > { %v6071_v25 = vpop.f32.mrf.mxu1 }
 0x16a   : > { %v4694_v21 = vpop.f32.mrf.mxu0 }
 0x16b   : > { %v4716_v17 = vpop.f32.mrf.mxu1 }
 0x16c   : > { %v6073_v31 = vpop.f32.mrf.mxu0  ;;  %4912 = vmatmul.mubr.msk.bf16.gmra.mxu0 %vm336_vm3, %v2166_v50  ;;  %v1206_v50 = vadd.f32 %v6039_v51, %v1091_v12  ;;  %v1093_v51 = vadd.f32 %v6055_v36, %v5983_v8 }
 0x16d   : > { %v6076_v22 = vpop.f32.mrf.mxu1  ;;  %4934 = vmatmul.mubr.msk.bf16.gmra.mxu1 %vm336_vm3, %v2280_v54  ;;  %4915 = vmatprep.mubr.msk.bf16.mxu0 %vm5279_vm2, %v5277_v1  ;;  %v1092_v54 = vadd.f32 %v6051_v6, %v5971_v19 }
 0x16e   : > { %v4697_v30 = vpop.f32.mrf.mxu0  ;;  %4937 = vmatprep.mubr.msk.bf16.mxu1 %vm5279_vm2, %v5277_v1 }
 0x16f   : > { %v4719_v58 = vpop.f32.mrf.mxu1  ;;  %v1207_v30 = vadd.f32 %v6053_v3, %v1092_v54  ;;  %v1094_v3 = vadd.f32 %v6069_v23, %v5986_v46 }
 0x170   : > { %v6087_v59 = vpop.f32.mrf.mxu0 }
 0x171   : > { %v6089_v55 = vpop.f32.mrf.mxu1 }
 0x172   : > { %v4698_v10 = vpop.f32.mrf.mxu0 }
 0x173   : > { %v4720_v28 = vpop.f32.mrf.mxu1  ;;  %v1208_v10 = vadd.f32 %v6058_v0, %v1093_v51  ;;  %v1095_v0 = vadd.f32 %v6073_v31, %v5998_v63 }
 0x174   : > { %v6091_v42 = vpop.f32.mrf.mxu0  ;;  %4916 = vmatmul.mubr.msk.bf16.gmra.mxu0 %vm336_vm3, %v2167_v60 }
 0x175   : > { %v6094_v39 = vpop.f32.mrf.mxu1  ;;  %4938 = vmatmul.mubr.msk.bf16.gmra.mxu1 %vm336_vm3, %v2281_v7  ;;  %4919 = vmatprep.mubr.msk.bf16.mxu0 %vm5279_vm2, %v5277_v1 }
 0x176   : > { %v4701_v14 = vpop.f32.mrf.mxu0  ;;  %4941 = vmatprep.mubr.msk.bf16.mxu1 %vm5279_vm2, %v5277_v1 }
 0x177   : > { %v4723_v15 = vpop.f32.mrf.mxu1 }
 0x178   : > { %v1086_v16 = vpop.f32.mrf.mxu0  ;;  %v1209_v15 = vadd.f32 %v6071_v25, %v1094_v3  ;;  %v1096_v25 = vadd.f32 %v6087_v59, %v6001_v48  ;;  %v1097_v59 = vadd.f32 %v6091_v42, %v6012_v57 }
 0x179   : > { %v1201_v9 = vpop.f32.mrf.mxu1 }
 0x17a   : > { %v4702_v34 = vpop.f32.mrf.mxu0 }
 0x17b   : > { %v4724_v32 = vpop.f32.mrf.mxu1 }
 0x17c   : > { %v1281_v45 = vpop.f32.mrf.mxu0  ;;  %4920 = vmatmul.mubr.msk.bf16.gmra.mxu0 %vm336_vm3, %v2168_v24  ;;  %v1210_v32 = vadd.f32 %v6076_v22, %v1095_v0  ;;  %v1211_v22 = vadd.f32 %v6089_v55, %v1096_v25 }
 0x17d   : > { %v1319_v52 = vadd.f32 %v1281_v45, %v1204_v53  ;;  %v6114_v2 = vpop.f32.mrf.mxu1  ;;  %4942 = vmatmul.mubr.msk.bf16.gmra.mxu1 %vm336_vm3, %v2282_v26  ;;  %4947 = vmatprep.mubr.msk.bf16.mxu0 %vm5279_vm2, %v5277_v1  ;;  %vm3210_vm3 = vcmask 259074  }
 0x17e   : > { %v4729_v35 = vpop.f32.mrf.mxu0  ;;  %4961 = vmatprep.mubr.msk.bf16.mxu1 %vm5279_vm2, %v5277_v1 }
 0x17f   : > { %v1335_v38 = vadd.f32 %v6111_v33, %v1319_v52  ;;  %v4751_v41 = vpop.f32.mrf.mxu1  ;;  %v5189_v52 = vld [vmem:[%s6569_s2] sm:$0xff]  }
 0x180   : > { %v1284_v43 = vpop.f32.mrf.mxu0  ;;  %4960 = vmatpush3.bf16.msra.mxu1 %v5189_v52 }
 0x181   : > { %v1344_v40 = vmax.f32 %v1335_v38, 0.0  ;;  %v1320_v47 = vadd.f32 %v1284_v43, %v1205_v4  ;;  %v6125_v13 = vpop.f32.mrf.mxu1  ;;  %4987 = vmatprep.subr.bf16.mxu1 %v5277_v1 }
 0x182   : > { %v4730_v49 = vpop.f32.mrf.mxu0 }
 0x183   : > { %1354 = vst.msk [vmem:[#allocation2 + $0x45] sm:$0xf] %vm286_vm5, %v1344_v40  ;;  %v1336_v61 = vadd.f32 %v6111_v33, %v1320_v47  ;;  %v4752_v21 = vpop.f32.mrf.mxu1 }
 0x184   : > { %v1289_v5 = vpop.f32.mrf.mxu0 }
 0x185   : > { %v1345_v18 = vmax.f32 %v1336_v61, 0.0  ;;  %v1321_v17 = vadd.f32 %v1289_v5, %v1206_v50  ;;  %v6132_v44 = vpop.f32.mrf.mxu1  ;;  %v1212_v61 = vadd.f32 %v6094_v39, %v1097_v59 }
 0x186   : > { %v4733_v27 = vpop.f32.mrf.mxu0 }
 0x187   : > { %1356 = vst.msk [vmem:[#allocation2 + $0x49] sm:$0x1e] %vm1355_vm6, %v1345_v18  ;;  %v1337_v19 = vadd.f32 %v6111_v33, %v1321_v17  ;;  %v4755_v6 = vpop.f32.mrf.mxu1 }
 0x188   : > { %v1292_v62 = vpop.f32.mrf.mxu0 }
 0x189   : > { %v1346_v37 = vmax.f32 %v1337_v19, 0.0  ;;  %v1322_v58 = vadd.f32 %v1292_v62, %v1207_v30  ;;  %v6139_v60 = vpop.f32.mrf.mxu1 }
 0x18a   : > { %v4734_v7 = vpop.f32.mrf.mxu0  ;;  %v2429_v53 = vld [vmem:[#allocation2 + $0x40] sm:$0xff] }
 0x18b   : > { %1358 = vst.msk [vmem:[#allocation2 + $0x4d] sm:$0x3c] %vm1357_vm7, %v1346_v37  ;;  %v1338_v8 = vadd.f32 %v6111_v33, %v1322_v58  ;;  %v4756_v36 = vpop.f32.mrf.mxu1 }
 0x18c   : > { %v1297_v28 = vpop.f32.mrf.mxu0 }
 0x18d   : > { %v1347_v11 = vmax.f32 %v1338_v8, 0.0  ;;  %v1323_v14 = vadd.f32 %v1297_v28, %v1208_v10  ;;  %v6146_v20 = vpop.f32.mrf.mxu1 }
 0x18e   : > { %v4737_v29 = vpop.f32.mrf.mxu0 }
 0x18f   : > { %1360 = vst.msk [vmem:[#allocation2 + $0x51] sm:$0x78] %vm1359_vm8, %v1347_v11  ;;  %v1339_v46 = vadd.f32 %v6111_v33, %v1323_v14  ;;  %v4759_v23 = vpop.f32.mrf.mxu1 }
 0x190   : > { %v1300_v16 = vpop.f32.mrf.mxu0 }
 0x191   : > { %v1348_v24 = vmax.f32 %v1339_v46, 0.0  ;;  %v1324_v9 = vadd.f32 %v1300_v16, %v1209_v15  ;;  %v6153_v26 = vpop.f32.mrf.mxu1 }
 0x192   : > { %v4738_v34 = vpop.f32.mrf.mxu0  ;;  %v2430_v56 = vld [vmem:[#allocation2 + $0x48] sm:$0xff] }
 0x193   : > { %1362 = vst.msk [vmem:[#allocation2 + $0x55] sm:$0xf0] %vm1361_vm9, %v1348_v24  ;;  %v1340_v63 = vadd.f32 %v6111_v33, %v1324_v9  ;;  %v4760_v31 = vpop.f32.mrf.mxu1  ;;  %v2434_v45 = vpack.c.bf16 %v2430_v56, %v2429_v53  ;;  %v5190_v53 = vld [vmem:[%s6569_s2 + $0x10] sm:$0xff]  }
 0x194   : > { %v1305_v35 = vpop.f32.mrf.mxu0 }
 0x195   : > { %v1349_v4 = vmax.f32 %v1340_v63, 0.0  ;;  %v1325_v12 = vadd.f32 %v1305_v35, %v1210_v32  ;;  %v6163_v38 = vpop.f32.mrf.mxu1  ;;  %4948 = vmatmul.mubr.msk.bf16.vlgmr.msra.gmra.mxu0 %vm278_vm4, %v2434_v45 }
 0x196   : > { %v4741_v48 = vpop.f32.mrf.mxu0  ;;  %4951 = vmatprep.mubr.msk.bf16.mxu0 %vm5279_vm2, %v5277_v1  ;;  %v2431_v27 = vld [vmem:[#allocation2 + $0x50] sm:$0xff]  ;;  %4974 = vmatpush3.bf16.msra.mxu0 %v5190_v53 }
 0x197   : > { %1364 = vst.msk [vmem:[#allocation2 + $0x59] sm:$0xe0] %vm1363_vm10, %v1349_v4  ;;  %v1341_v41 = vadd.f32 %v6111_v33, %v1325_v12  ;;  %v4763_v43 = vpop.f32.mrf.mxu1  ;;  %5001 = vmatprep.subr.bf16.mxu0 %v5277_v1 }
 0x198   : > { %v1308_v40 = vpop.f32.mrf.mxu0 }
 0x199   : > { %v1350_v47 = vmax.f32 %v1341_v41, 0.0  ;;  %v1326_v49 = vadd.f32 %v1308_v40, %v1211_v22  ;;  %v6174_v50 = vpop.f32.mrf.mxu1 }
 0x19a   : > { %v4742_v54 = vpop.f32.mrf.mxu0 }
 0x19b   : > { %1366 = vst.msk [vmem:[#allocation2 + $0x61] sm:$0x1] %vm1365_vm11, %v1350_v47  ;;  %v1342_v57 = vadd.f32 %v6111_v33, %v1326_v49  ;;  %v4764_v55 = vpop.f32.mrf.mxu1 }
 0x19c   : > { %1368 = vst.msk [vmem:[#allocation2 + $0x5d] sm:$0xc0] %vm1367_vm12, %v1350_v47  ;;  %v1313_v42 = vpop.f32.mrf.mxu0 }
 0x19d   : > { %v1351_v21 = vmax.f32 %v1342_v57, 0.0  ;;  %v1327_v5 = vadd.f32 %v1313_v42, %v1212_v61  ;;  %v6180_v18 = vpop.f32.mrf.mxu1 }
 0x19e   : > { %v4745_v17 = vpop.f32.mrf.mxu0  ;;  %v2432_v30 = vld [vmem:[#allocation2 + $0x58] sm:$0xff] }
 0x19f   : > { %1370 = vst.msk [vmem:[#allocation2 + $0x65] sm:$0x3] %vm1369_vm13, %v1351_v21  ;;  %v1343_v39 = vadd.f32 %v6111_v33, %v1327_v5  ;;  %v4767_v51 = vpop.f32.mrf.mxu1  ;;  %v2435_v19 = vpack.c.bf16 %v2432_v30, %v2431_v27 }
 0x1a0   : > { %1372 = vst.msk [vmem:[#allocation2 + $0x61] sm:$0x80] %vm1371_vm14, %v1351_v21  ;;  %v1316_v6 = vpop.f32.mrf.mxu0 }
 0x1a1   : > { %v1352_v62 = vmax.f32 %v1343_v39, 0.0  ;;  %v1492_v37 = vpop.f32.mrf.mxu1  ;;  %4952 = vmatmul.mubr.msk.bf16.gmra.mxu0 %vm278_vm4, %v2435_v19 }
 0x1a2   : > { %v4746_v58 = vpop.f32.mrf.mxu0  ;;  %4955 = vmatprep.mubr.msk.bf16.mxu0 %vm5279_vm2, %v5277_v1 }
 0x1a3   : > { %1374 = vst.msk [vmem:[#allocation2 + $0x69] sm:$0x7] %vm1373_vm15, %v1352_v62  ;;  %v4768_v7 = vpop.f32.mrf.mxu1 }
 0x1a4   : > { %v1547_v10 = vpop.f32.mrf.mxu0 }
 0x1a5   : > { %v1548_v3 = vadd.f32 %v1547_v10, %v6114_v2  ;;  %v1652_v8 = vpop.f32.mrf.mxu1 }
 0x1a6   : > { %v4773_v36 = vpop.f32.mrf.mxu0  ;;  %v2433_v28 = vld [vmem:[#allocation2 + $0x60] sm:$0xff] }
 0x1a7   : > { %v1690_v11 = vadd.f32 %v1652_v8, %v1548_v3  ;;  %v4795_v14 = vpop.f32.mrf.mxu1  ;;  %v2436_v29 = vpack.c.bf16 %v2433_v28, %v2433_v28 }
 0x1a8   : > { %v1550_v15 = vpop.f32.mrf.mxu0 }
 0x1a9   : > { %v1551_v0 = vadd.f32 %v1550_v15, %v6125_v13  ;;  %v1655_v46 = vpop.f32.mrf.mxu1  ;;  %4956 = vmatmul.mubr.msk.bf16.gmra.mxu0 %vm278_vm4, %v2436_v29 }
 0x1aa   : > { %v4774_v23 = vpop.f32.mrf.mxu0  ;;  %4975 = vmatprep.mubr.msk.bf16.mxu0 %vm5279_vm2, %v5277_v1 }
 0x1ab   : > { %v1691_v16 = vadd.f32 %v1655_v46, %v1551_v0  ;;  %v4796_v24 = vpop.f32.mrf.mxu1 }
 0x1ac   : > { %v1555_v9 = vpop.f32.mrf.mxu0 }
 0x1ad   : > { %v1556_v2 = vadd.f32 %v1555_v9, %v6132_v44  ;;  %v1660_v34 = vpop.f32.mrf.mxu1 }
 0x1ae   : > { %v4777_v56 = vpop.f32.mrf.mxu0 }
 0x1af   : > { %v1692_v32 = vadd.f32 %v1660_v34, %v1556_v2  ;;  %v4799_v13 = vpop.f32.mrf.mxu1 }
 0x1b0   : > { %v1558_v25 = vpop.f32.mrf.mxu0 }
 0x1b1   : > { %v1559_v63 = vadd.f32 %v1558_v25, %v6139_v60  ;;  %v1663_v31 = vpop.f32.mrf.mxu1 }
 0x1b2   : > { %v4778_v45 = vpop.f32.mrf.mxu0 }
 0x1b3   : > { %v1693_v52 = vadd.f32 %v1663_v31, %v1559_v63  ;;  %v4800_v35 = vpop.f32.mrf.mxu1 }
 0x1b4   : > { %v1563_v4 = vpop.f32.mrf.mxu0 }
 0x1b5   : > { %v1564_v44 = vadd.f32 %v1563_v4, %v6146_v20  ;;  %v1668_v12 = vpop.f32.mrf.mxu1 }
 0x1b6   : > { %v4781_v48 = vpop.f32.mrf.mxu0 }
 0x1b7   : > { %v1694_v22 = vadd.f32 %v1668_v12, %v1564_v44  ;;  %v4803_v59 = vpop.f32.mrf.mxu1 }
 0x1b8   : > { %v1566_v41 = vpop.f32.mrf.mxu0 }
 0x1b9   : > { %v1567_v43 = vadd.f32 %v1566_v41, %v6153_v26  ;;  %v1671_v40 = vpop.f32.mrf.mxu1 }
 0x1ba   : > { %v4782_v47 = vpop.f32.mrf.mxu0 }
 0x1bb   : > { %v1695_v49 = vadd.f32 %v1671_v40, %v1567_v43  ;;  %v4804_v54 = vpop.f32.mrf.mxu1 }
 0x1bc   : > { %v1571_v61 = vpop.f32.mrf.mxu0 }
 0x1bd   : > { %v1572_v60 = vadd.f32 %v1571_v61, %v6163_v38  ;;  %v1676_v57 = vpop.f32.mrf.mxu1 }
 0x1be   : > { %v4785_v55 = vpop.f32.mrf.mxu0 }
 0x1bf   : > { %v1696_v42 = vadd.f32 %v1676_v57, %v1572_v60  ;;  %v4807_v21 = vpop.f32.mrf.mxu1 }
 0x1c0   : > { %v1574_v5 = vpop.f32.mrf.mxu0 }
 0x1c1   : > { %v1575_v20 = vadd.f32 %v1574_v5, %v6174_v50  ;;  %v1679_v17 = vpop.f32.mrf.mxu1 }
 0x1c2   : > { %v4786_v27 = vpop.f32.mrf.mxu0 }
 0x1c3   : > { %v1697_v30 = vadd.f32 %v1679_v17, %v1575_v20  ;;  %v4808_v39 = vpop.f32.mrf.mxu1 }
 0x1c4   : > { %v1579_v51 = vpop.f32.mrf.mxu0 }
 0x1c5   : > { %v1580_v26 = vadd.f32 %v1579_v51, %v6180_v18  ;;  %v1684_v19 = vpop.f32.mrf.mxu1 }
 0x1c6   : > { %v4789_v6 = vpop.f32.mrf.mxu0 }
 0x1c7   : > { %v1698_v62 = vadd.f32 %v1684_v19, %v1580_v26  ;;  %v4811_v37 = vpop.f32.mrf.mxu1 }
 0x1c8   : > { %v1582_v58 = vpop.f32.mrf.mxu0 }
 0x1c9   : > { %v1687_v38 = vpop.f32.mrf.mxu1 }
 0x1ca   : > { %v4790_v7 = vpop.f32.mrf.mxu0 }
 0x1cb   : > { %v4812_v10 = vpop.f32.mrf.mxu1 }
 0x1cc   : > { %v1766_v3 = vpop.f32.mrf.mxu0 }
 0x1cd   : > { %v1804_v8 = vadd.f32 %v1766_v3, %v1690_v11  ;;  %v1880_v36 = vpop.f32.mrf.mxu1 }
 0x1ce   : > { %v4817_v28 = vpop.f32.mrf.mxu0 }
 0x1cf   : > { %v6205_v50 = vadd.f32 %v1880_v36, %v1804_v8  ;;  %v4839_v14 = vpop.f32.mrf.mxu1 }
 0x1d0   : > { %v1769_v29 = vpop.f32.mrf.mxu0 }
 0x1d1   : > { %v1805_v15 = vadd.f32 %v1769_v29, %v1691_v16  ;;  %v1883_v0 = vpop.f32.mrf.mxu1 }
 0x1d2   : > { %v4818_v46 = vpop.f32.mrf.mxu0 }
 0x1d3   : > { %v6207_v18 = vadd.f32 %v1883_v0, %v1805_v15  ;;  %v4840_v23 = vpop.f32.mrf.mxu1 }
 0x1d4   : > { %v1774_v24 = vpop.f32.mrf.mxu0 }
 0x1d5   : > { %v1806_v9 = vadd.f32 %v1774_v24, %v1692_v32  ;;  %v1888_v2 = vpop.f32.mrf.mxu1 }
 0x1d6   : > { %v4821_v34 = vpop.f32.mrf.mxu0 }
 0x1d7   : > { %v6209_v53 = vadd.f32 %v1888_v2, %v1806_v9  ;;  %v4843_v56 = vpop.f32.mrf.mxu1 }
 0x1d8   : > { %v1777_v11 = vpop.f32.mrf.mxu0 }
 0x1d9   : > { %v1807_v13 = vadd.f32 %v1777_v11, %v1693_v52  ;;  %v1891_v25 = vpop.f32.mrf.mxu1 }
 0x1da   : > { %v4822_v63 = vpop.f32.mrf.mxu0 }
 0x1db   : > { %v6211_v31 = vadd.f32 %v1891_v25, %v1807_v13  ;;  %v4844_v45 = vpop.f32.mrf.mxu1 }
 0x1dc   : > { %v1782_v16 = vpop.f32.mrf.mxu0 }
 0x1dd   : > { %v1808_v35 = vadd.f32 %v1782_v16, %v1694_v22  ;;  %v1896_v4 = vpop.f32.mrf.mxu1 }
 0x1de   : > { %v4825_v44 = vpop.f32.mrf.mxu0 }
 0x1df   : > { %v6213_v12 = vadd.f32 %v1896_v4, %v1808_v35  ;;  %v4847_v48 = vpop.f32.mrf.mxu1 }
 0x1e0   : > { %v1785_v32 = vpop.f32.mrf.mxu0 }
 0x1e1   : > { %v1809_v59 = vadd.f32 %v1785_v32, %v1695_v49  ;;  %v1899_v41 = vpop.f32.mrf.mxu1 }
 0x1e2   : > { %v4826_v43 = vpop.f32.mrf.mxu0 }
 0x1e3   : > { %v6215_v40 = vadd.f32 %v1899_v41, %v1809_v59  ;;  %v4848_v47 = vpop.f32.mrf.mxu1 }
 0x1e4   : > { %v1790_v52 = vpop.f32.mrf.mxu0 }
 0x1e5   : > { %v1810_v54 = vadd.f32 %v1790_v52, %v1696_v42  ;;  %v1904_v61 = vpop.f32.mrf.mxu1 }
 0x1e6   : > { %v4829_v60 = vpop.f32.mrf.mxu0 }
 0x1e7   : > { %v6217_v57 = vadd.f32 %v1904_v61, %v1810_v54  ;;  %v4851_v55 = vpop.f32.mrf.mxu1 }
 0x1e8   : > { %v1793_v22 = vpop.f32.mrf.mxu0 }
 0x1e9   : > { %v1811_v21 = vadd.f32 %v1793_v22, %v1697_v30  ;;  %v1907_v5 = vpop.f32.mrf.mxu1 }
 0x1ea   : > { %v4830_v20 = vpop.f32.mrf.mxu0 }
 0x1eb   : > { %v6219_v17 = vadd.f32 %v1907_v5, %v1811_v21  ;;  %v4852_v27 = vpop.f32.mrf.mxu1 }
 0x1ec   : > { %v1798_v49 = vpop.f32.mrf.mxu0 }
 0x1ed   : > { %v1812_v39 = vadd.f32 %v1798_v49, %v1698_v62  ;;  %v1912_v51 = vpop.f32.mrf.mxu1 }
 0x1ee   : > { %v4833_v26 = vpop.f32.mrf.mxu0 }
 0x1ef   : > { %v6221_v19 = vadd.f32 %v1912_v51, %v1812_v39  ;;  %v4855_v6 = vpop.f32.mrf.mxu1 }
 0x1f0   : > { %v1801_v42 = vpop.f32.mrf.mxu0 }
 0x1f1   : > { %v1915_v37 = vpop.f32.mrf.mxu1 }
 0x1f2   : > { %v4834_v58 = vpop.f32.mrf.mxu0 }
 0x1f3   : > { %v4856_v38 = vpop.f32.mrf.mxu1 }
 0x1f4   : > { %v1994_v7 = vpop.f32.mrf.mxu0 }
 0x1f5   : > { %v2108_v10 = vpop.f32.mrf.mxu1  ;;  %v2032_v54 = vadd.f32 %v1994_v7, %v6205_v50 }
 0x1f6   : > { %v4861_v3 = vpop.f32.mrf.mxu0 }
 0x1f7   : > { %v4883_v30 = vpop.f32.mrf.mxu1  ;;  %v2146_v21 = vadd.f32 %v2108_v10, %v2032_v54 }
 0x1f8   : > { %v1997_v8 = vpop.f32.mrf.mxu0 }
 0x1f9   : > { %v2111_v36 = vpop.f32.mrf.mxu1  ;;  %v2033_v5 = vadd.f32 %v1997_v8, %v6207_v18 }
 0x1fa   : > { %v4862_v28 = vpop.f32.mrf.mxu0 }
 0x1fb   : > { %v4884_v14 = vpop.f32.mrf.mxu1  ;;  %v2147_v26 = vadd.f32 %v2111_v36, %v2033_v5 }
 0x1fc   : > { %v2002_v29 = vpop.f32.mrf.mxu0 }
 0x1fd   : > { %v2116_v15 = vpop.f32.mrf.mxu1  ;;  %v2034_v6 = vadd.f32 %v2002_v29, %v6209_v53 }
 0x1fe   : > { %v4865_v62 = vpop.f32.mrf.mxu0 }
 0x1ff   : > { %v4887_v0 = vpop.f32.mrf.mxu1  ;;  %v2148_v30 = vadd.f32 %v2116_v15, %v2034_v6 }
 0x200   : > { %v2005_v46 = vpop.f32.mrf.mxu0 }
 0x201   : > { %v2119_v23 = vpop.f32.mrf.mxu1  ;;  %v2035_v10 = vadd.f32 %v2005_v46, %v6211_v31 }
 0x202   : > { %v4866_v24 = vpop.f32.mrf.mxu0 }
 0x203   : > { %v4888_v9 = vpop.f32.mrf.mxu1  ;;  %v2149_v0 = vadd.f32 %v2119_v23, %v2035_v10 }
 0x204   : > { %v2010_v2 = vpop.f32.mrf.mxu0 }
 0x205   : > { %v2124_v34 = vpop.f32.mrf.mxu1  ;;  %v2036_v24 = vadd.f32 %v2010_v2, %v6213_v12 }
 0x206   : > { %v4869_v56 = vpop.f32.mrf.mxu0 }
 0x207   : > { %v4891_v11 = vpop.f32.mrf.mxu1 }
 0x208   : > { %v2013_v13 = vpop.f32.mrf.mxu0 }
 0x209   : > { %v6223_v25 = vpop.f32.mrf.mxu1 }
 0x20a   : > { %v4870_v63 = vpop.f32.mrf.mxu0 }
 0x20b   : > { %v4892_v45 = vpop.f32.mrf.mxu1 }
 0x20c   : > { %v6225_v16 = vpop.f32.mrf.mxu0 }
 0x20d   : > { %v6227_v35 = vpop.f32.mrf.mxu1 }
 0x20e   : > { %v4873_v4 = vpop.f32.mrf.mxu0 }
 0x20f   : > { %v4895_v44 = vpop.f32.mrf.mxu1  ;;  %v2150_v4 = vadd.f32 %v2124_v34, %v2036_v24 }
 0x210   : > { %v6229_v48 = vpop.f32.mrf.mxu0  ;;  %v2037_v44 = vadd.f32 %v2013_v13, %v6215_v40 }
 0x211   : > { %v6231_v32 = vpop.f32.mrf.mxu1 }
 0x212   : > { %v4874_v59 = vpop.f32.mrf.mxu0 }
 0x213   : > { %v4896_v41 = vpop.f32.mrf.mxu1 }
 0x214   : > { %v6233_v43 = vpop.f32.mrf.mxu0 }
 0x215   : > { %v6235_v47 = vpop.f32.mrf.mxu1  ;;  %v2040_v10 = vadd.f32 %v6233_v43, %v6221_v19 }
 0x216   : > { %v4877_v52 = vpop.f32.mrf.mxu0 }
 0x217   : > { %v4899_v61 = vpop.f32.mrf.mxu1  ;;  %v2154_v19 = vadd.f32 %v6235_v47, %v2040_v10 }
 0x218   : > { %v2029_v60 = vpop.f32.mrf.mxu0 }
 0x219   : > { %v2143_v55 = vpop.f32.mrf.mxu1  ;;  %v2151_v60 = vadd.f32 %v6223_v25, %v2037_v44 }
 0x21a   : > { %v4878_v22 = vpop.f32.mrf.mxu0  ;;  %v2038_v55 = vadd.f32 %v6225_v16, %v6217_v57  ;;  %v2039_v16 = vadd.f32 %v6229_v48, %v6219_v17 }
 0x21b   : > { %v4900_v20 = vpop.f32.mrf.mxu1 }
 0x21c   : > { %v2222_v27 = vpop.f32.mrf.mxu0  ;;  %v5191_v20 = vld [vmem:[%s6569_s2 + $0x18] sm:$0xff]   ;;  %v2152_v57 = vadd.f32 %v6227_v35, %v2038_v55 }
 0x21d   : > { %v2260_v49 = vadd.f32 %v2222_v27, %v2146_v21  ;;  %v2336_v39 = vpop.f32.mrf.mxu1 }
 0x21e   : > { %v4905_v51 = vpop.f32.mrf.mxu0 }
 0x21f   : > { %v2374_v42 = vadd.f32 %v2336_v39, %v2260_v49  ;;  %v4927_v37 = vpop.f32.mrf.mxu1 }
 0x220   : > { %v2225_v58 = vpop.f32.mrf.mxu0 }
 0x221   : > { %v2390_v50 = vadd.f32 %v6111_v33, %v2374_v42  ;;  %v2261_v38 = vadd.f32 %v2225_v58, %v2147_v26  ;;  %v2339_v7 = vpop.f32.mrf.mxu1 }
 0x222   : > { %v4906_v3 = vpop.f32.mrf.mxu0 }
 0x223   : > { %v2399_v18 = vmax.f32 %v2390_v50, 0.0  ;;  %v2375_v8 = vadd.f32 %v2339_v7, %v2261_v38  ;;  %v4928_v28 = vpop.f32.mrf.mxu1  ;;  %v5192_v38 = vld [vmem:[%s6569_s2 + $0x20] sm:$0xff]  }
 0x224   : > { %v2230_v14 = vpop.f32.mrf.mxu0 }
 0x225   : > { %2408 = vst.msk [vmem:[#allocation2 + $0x6] sm:$0xf] %vm286_vm5, %v2399_v18  ;;  %v2391_v36 = vadd.f32 %v6111_v33, %v2375_v8  ;;  %v2262_v53 = vadd.f32 %v2230_v14, %v2148_v30  ;;  %v2344_v29 = vpop.f32.mrf.mxu1  ;;  %v2153_v30 = vadd.f32 %v6231_v32, %v2039_v16  ;;  %vm3214_vm5 = vcmask 261126  }
 0x226   : > { %v4909_v62 = vpop.f32.mrf.mxu0 }
 0x227   : > { %v2400_v9 = vmax.f32 %v2391_v36, 0.0  ;;  %v2376_v56 = vadd.f32 %v2344_v29, %v2262_v53  ;;  %v4931_v11 = vpop.f32.mrf.mxu1 }
 0x228   : > { %v2233_v15 = vpop.f32.mrf.mxu0 }
 0x229   : > { %2409 = vst.msk [vmem:[#allocation2 + $0xa] sm:$0x1e] %vm1355_vm6, %v2400_v9  ;;  %v2392_v31 = vadd.f32 %v6111_v33, %v2376_v56  ;;  %v2263_v46 = vadd.f32 %v2233_v15, %v2149_v0  ;;  %v2347_v63 = vpop.f32.mrf.mxu1 }
 0x22a   : > { %v4910_v45 = vpop.f32.mrf.mxu0 }
 0x22b   : > { %v2401_v59 = vmax.f32 %v2392_v31, 0.0  ;;  %v2377_v41 = vadd.f32 %v2347_v63, %v2263_v46  ;;  %v4932_v52 = vpop.f32.mrf.mxu1 }
 0x22c   : > { %v2238_v23 = vpop.f32.mrf.mxu0  ;;  %v2419_v13 = vld [vmem:[#allocation2] sm:$0xff] }
 0x22d   : > { %2410 = vst.msk [vmem:[#allocation2 + $0xe] sm:$0x3c] %vm1357_vm7, %v2401_v59  ;;  %v2393_v12 = vadd.f32 %v6111_v33, %v2377_v41  ;;  %v2264_v2 = vadd.f32 %v2238_v23, %v2150_v4  ;;  %v2352_v54 = vpop.f32.mrf.mxu1  ;;  %v2582_v58 = vld [vmem:[#allocation2 + $0x1] sm:$0xff] }
 0x22e   : > { %v4913_v61 = vpop.f32.mrf.mxu0 }
 0x22f   : > { %v2402_v22 = vmax.f32 %v2393_v12, 0.0  ;;  %v2378_v34 = vadd.f32 %v2352_v54, %v2264_v2  ;;  %v4935_v21 = vpop.f32.mrf.mxu1 }
 0x230   : > { %v2241_v40 = vpop.f32.mrf.mxu0  ;;  %v2420_v5 = vld [vmem:[#allocation2 + $0x8] sm:$0xff] }
 0x231   : > { %2411 = vst.msk [vmem:[#allocation2 + $0x12] sm:$0x78] %vm1359_vm8, %v2402_v22  ;;  %v2394_v27 = vadd.f32 %v6111_v33, %v2378_v34  ;;  %v2265_v49 = vadd.f32 %v2241_v40, %v2151_v60  ;;  %v2355_v39 = vpop.f32.mrf.mxu1  ;;  %v2424_v25 = vpack.c.bf16 %v2420_v5, %v2419_v13  ;;  %v2757_v21 = vld [vmem:[#allocation2 + $0x4d] sm:$0xff]  ;;  %v2756_v40 = vld [vmem:[#allocation2 + $0x45] sm:$0xff] }
 0x232   : > { %v4914_v51 = vpop.f32.mrf.mxu0  ;;  %v2669_v13 = vld [vmem:[#allocation2 + $0x5] sm:$0xff] }
 0x233   : > { %v2403_v26 = vmax.f32 %v2394_v27, 0.0  ;;  %v2379_v6 = vadd.f32 %v2355_v39, %v2265_v49  ;;  %v4936_v42 = vpop.f32.mrf.mxu1  ;;  %4962 = vmatmul.mubr.msk.bf16.vlgmr.msra.gmra.mxu1 %vm278_vm4, %v2424_v25  ;;  %v5193_v5 = vld [vmem:[%s6569_s2 + $0x28] sm:$0xff]   ;;  %v2761_v49 = vpack.c.bf16 %v2757_v21, %v2756_v40  ;;  %v2759_v51 = vld [vmem:[#allocation2 + $0x5d] sm:$0xff]  ;;  %v5198_v40 = vld [vmem:[%s6570_s3 + $0x10] sm:$0xff]  }
 0x234   : > { %v2246_v37 = vpop.f32.mrf.mxu0  ;;  %v2583_v50 = vld [vmem:[#allocation2 + $0x9] sm:$0xff]  ;;  %4988 = vmatpush3.bf16.msra.mxu1 %v5191_v20  ;;  %4965 = vmatprep.mubr.msk.bf16.mxu1 %vm5279_vm2, %v5277_v1  ;;  %v5197_v21 = vld [vmem:[%s6570_s3 + $0x18] sm:$0xff]  }
 0x235   : > { %2412 = vst.msk [vmem:[#allocation2 + $0x16] sm:$0xf0] %vm1361_vm9, %v2403_v26  ;;  %v2395_v17 = vadd.f32 %v6111_v33, %v2379_v6  ;;  %v2266_v35 = vadd.f32 %v2246_v37, %v2152_v57  ;;  %v2360_v48 = vpop.f32.mrf.mxu1  ;;  %v2587_v7 = vpack.c.bf16 %v2583_v50, %v2582_v58  ;;  %5015 = vmatprep.subr.bf16.mxu1 %v5277_v1  ;;  %v2670_v34 = vld [vmem:[#allocation2 + $0xd] sm:$0xff]  ;;  %v2758_v26 = vld [vmem:[#allocation2 + $0x55] sm:$0xff] }
 0x236   : > { %v4917_v3 = vpop.f32.mrf.mxu0  ;;  %v5194_v20 = vld [vmem:[%s6569_s2 + $0x30] sm:$0xff]   ;;  %v2674_v27 = vpack.c.bf16 %v2670_v34, %v2669_v13  ;;  %v2762_v37 = vpack.c.bf16 %v2759_v51, %v2758_v26  ;;  %v5199_v13 = vld [vmem:[%s6570_s3 + $0x38] sm:$0xff]  }
 0x237   : > { %v2404_v18 = vmax.f32 %v2395_v17, 0.0  ;;  %v2380_v8 = vadd.f32 %v2360_v48, %v2266_v35  ;;  %v4939_v28 = vpop.f32.mrf.mxu1  ;;  %4976 = vmatmul.mubr.msk.bf16.vlgmr.msra.gmra.mxu0 %vm278_vm4, %v2587_v7 }
 0x238   : > { %v2249_v14 = vpop.f32.mrf.mxu0  ;;  %5002 = vmatpush3.bf16.msra.mxu0 %v5192_v38  ;;  %4979 = vmatprep.mubr.msk.bf16.mxu0 %vm5279_vm2, %v5277_v1  ;;  %v2421_v63 = vld [vmem:[#allocation2 + $0x10] sm:$0xff]  ;;  %v2760_v38 = vld [vmem:[#allocation2 + $0x65] sm:$0xff] }
 0x239   : > { %2413 = vst.msk [vmem:[#allocation2 + $0x1a] sm:$0xe0] %vm1363_vm10, %v2404_v18  ;;  %v2396_v36 = vadd.f32 %v6111_v33, %v2380_v8  ;;  %v2267_v53 = vadd.f32 %v2249_v14, %v2153_v30  ;;  %v2363_v29 = vpop.f32.mrf.mxu1  ;;  %5029 = vmatprep.subr.bf16.mxu0 %v5277_v1  ;;  %v2584_v44 = vld [vmem:[#allocation2 + $0x11] sm:$0xff]  ;;  %v2763_v48 = vpack.c.bf16 %v2760_v38, %v2760_v38  ;;  %v2843_v28 = vld [vmem:[#allocation2 + $0x6] sm:$0xff] }
 0x23a   : > { %v4918_v32 = vpop.f32.mrf.mxu0  ;;  %v2844_v30 = vld [vmem:[#allocation2 + $0xe] sm:$0xff]  ;;  %v5195_v8 = vld [vmem:[%s6569_s2 + $0x38] sm:$0xff]  }
 0x23b   : > { %v2405_v43 = vmax.f32 %v2396_v36, 0.0  ;;  %v2381_v62 = vadd.f32 %v2363_v29, %v2267_v53  ;;  %v4940_v0 = vpop.f32.mrf.mxu1  ;;  %v2931_v10 = vld [vmem:[#allocation2 + $0x12] sm:$0xff]  ;;  %v2930_v14 = vld [vmem:[#allocation2 + $0xa] sm:$0xff]  ;;  %v5196_v36 = vld [vmem:[%s6569_s2 + $0x40] sm:$0xff]   ;;  %v2848_v29 = vpack.c.bf16 %v2844_v30, %v2843_v28 }
 0x23c   : > { %v2254_v24 = vpop.f32.mrf.mxu0  ;;  %v2671_v16 = vld [vmem:[#allocation2 + $0x15] sm:$0xff]  ;;  %v2935_v32 = vpack.c.bf16 %v2931_v10, %v2930_v14 }
 0x23d   : > { %2414 = vst.msk [vmem:[#allocation2 + $0x22] sm:$0x1] %vm1365_vm11, %v2405_v43  ;;  %v2397_v9 = vadd.f32 %v6111_v33, %v2381_v62  ;;  %v2268_v56 = vadd.f32 %v2254_v24, %v2154_v19  ;;  %v2368_v11 = vpop.f32.mrf.mxu1 }
 0x23e   : > { %2415 = vst.msk [vmem:[#allocation2 + $0x1e] sm:$0xc0] %vm1367_vm12, %v2405_v43  ;;  %v4921_v15 = vpop.f32.mrf.mxu0 }
 0x23f   : > { %v2406_v31 = vmax.f32 %v2397_v9, 0.0  ;;  %v2382_v46 = vadd.f32 %v2368_v11, %v2268_v56  ;;  %v4943_v45 = vpop.f32.mrf.mxu1  ;;  %v2845_v9 = vld [vmem:[#allocation2 + $0x16] sm:$0xff] }
 0x240   : > { %v2422_v4 = vld [vmem:[#allocation2 + $0x18] sm:$0xff]  ;;  %v2257_v59 = vpop.f32.mrf.mxu0 }
 0x241   : > { %v2585_v47 = vld [vmem:[#allocation2 + $0x19] sm:$0xff]  ;;  %2416 = vst.msk [vmem:[#allocation2 + $0x26] sm:$0x3] %vm1369_vm13, %v2406_v31  ;;  %v2398_v41 = vadd.f32 %v6111_v33, %v2382_v46  ;;  %v2425_v52 = vpack.c.bf16 %v2422_v4, %v2421_v63  ;;  %v2371_v12 = vpop.f32.mrf.mxu1  ;;  %v3104_v59 = vld [vmem:[#allocation2 + $0xb] sm:$0xff] }
 0x242   : > { %2417 = vst.msk [vmem:[#allocation2 + $0x22] sm:$0x80] %vm1371_vm14, %v2406_v31  ;;  %v2588_v23 = vpack.c.bf16 %v2585_v47, %v2584_v44  ;;  %v4922_v2 = vpop.f32.mrf.mxu0  ;;  %v2932_v56 = vld [vmem:[#allocation2 + $0x1a] sm:$0xff]  ;;  %v3018_v4 = vld [vmem:[#allocation2 + $0x52] sm:$0xff]  ;;  %v3017_v47 = vld [vmem:[#allocation2 + $0x4a] sm:$0xff] }
 0x243   : > { %v2407_v54 = vmax.f32 %v2398_v41, 0.0  ;;  %4966 = vmatmul.mubr.msk.bf16.gmra.mxu1 %vm278_vm4, %v2425_v52  ;;  %v4944_v61 = vpop.f32.mrf.mxu1  ;;  %v3105_v44 = vld [vmem:[#allocation2 + $0x13] sm:$0xff]  ;;  %v3022_v41 = vpack.c.bf16 %v3018_v4, %v3017_v47 }
 0x244   : > { %4980 = vmatmul.mubr.msk.bf16.gmra.mxu0 %vm278_vm4, %v2588_v23  ;;  %4969 = vmatprep.mubr.msk.bf16.mxu1 %vm5279_vm2, %v5277_v1  ;;  %v3109_v52 = vpack.c.bf16 %v3105_v44, %v3104_v59  ;;  %v3020_v23 = vld [vmem:[#allocation2 + $0x62] sm:$0xff]  ;;  %v3019_v2 = vld [vmem:[#allocation2 + $0x5a] sm:$0xff] }
 0x245   : > { %4983 = vmatprep.mubr.msk.bf16.mxu0 %vm5279_vm2, %v5277_v1  ;;  %2418 = vst.msk [vmem:[#allocation2 + $0x2a] sm:$0x7] %vm1373_vm15, %v2407_v54  ;;  %v2672_v25 = vld [vmem:[#allocation2 + $0x1d] sm:$0xff]  ;;  %v3023_v61 = vpack.c.bf16 %v3020_v23, %v3019_v2 }
 0x246   : > { %v2675_v42 = vpack.c.bf16 %v2672_v25, %v2671_v16  ;;  %v2846_v62 = vld [vmem:[#allocation2 + $0x1e] sm:$0xff] }
 0x247   : > { %v2849_v11 = vpack.c.bf16 %v2846_v62, %v2845_v9  ;;  %v3106_v54 = vld [vmem:[#allocation2 + $0x1b] sm:$0xff] }
 0x248   : > { %v2423_v60 = vld [vmem:[#allocation2 + $0x20] sm:$0xff] }
 0x249   : > { %v2586_v33 = vld [vmem:[#allocation2 + $0x21] sm:$0xff]  ;;  %v2426_v55 = vpack.c.bf16 %v2423_v60, %v2423_v60 }
 0x24a   : > { %v2589_v22 = vpack.c.bf16 %v2586_v33, %v2586_v33  ;;  %v2933_v0 = vld [vmem:[#allocation2 + $0x22] sm:$0xff]  ;;  %v3021_v33 = vld [vmem:[#allocation2 + $0x6a] sm:$0xff] }
 0x24b   : > { %4970 = vmatmul.mubr.msk.bf16.gmra.mxu1 %vm278_vm4, %v2426_v55  ;;  %v2936_v15 = vpack.c.bf16 %v2933_v0, %v2932_v56 }
 0x24c   : > { %4984 = vmatmul.mubr.msk.bf16.gmra.mxu0 %vm278_vm4, %v2589_v22  ;;  %4989 = vmatprep.mubr.msk.bf16.mxu1 %vm5279_vm2, %v5277_v1  ;;  %v2673_v50 = vld [vmem:[#allocation2 + $0x25] sm:$0xff]  ;;  %v3024_v22 = vpack.c.bf16 %v3021_v33, %v3021_v33 }
 0x24d   : > { %5003 = vmatprep.mubr.msk.bf16.mxu0 %vm5279_vm2, %v5277_v1  ;;  %v2676_v35 = vpack.c.bf16 %v2673_v50, %v2673_v50  ;;  %v2847_v31 = vld [vmem:[#allocation2 + $0x26] sm:$0xff] }
 0x24e   : > { %v2934_v46 = vld [vmem:[#allocation2 + $0x2a] sm:$0xff]  ;;  %v2850_v63 = vpack.c.bf16 %v2847_v31, %v2847_v31 }
 0x24f   : > { %v2937_v45 = vpack.c.bf16 %v2934_v46, %v2934_v46  ;;  %v3107_v12 = vld [vmem:[#allocation2 + $0x23] sm:$0xff]  ;;  %v3108_v55 = vld [vmem:[#allocation2 + $0x2b] sm:$0xff] }
 0x250   : > { %v3110_v60 = vpack.c.bf16 %v3107_v12, %v3106_v54  ;;  %v3111_v34 = vpack.c.bf16 %v3108_v55, %v3108_v55 }
 0x253   : > { %4990 = vmatmul.mubr.msk.bf16.vlgmr.msra.gmra.mxu1 %vm278_vm4, %v2674_v27 }
 0x254   : > { %5004 = vmatmul.mubr.msk.bf16.vlgmr.msra.gmra.mxu0 %vm278_vm4, %v2761_v49  ;;  %5016 = vmatpush3.bf16.msra.mxu1 %v5193_v5  ;;  %v5202_v5 = vld [vmem:[%s6570_s3 + $0x30] sm:$0xff]  }
 0x255   : > { %5030 = vmatpush3.bf16.msra.mxu0 %v5194_v20  ;;  %v6307_v39 = vpop.f32.mrf.mxu0  ;;  %4993 = vmatprep.mubr.msk.bf16.mxu1 %vm5279_vm2, %v5277_v1  ;;  %v6404_v20 = vld [vmem:[%s6570_s3 + $0x58] sm:$0xff]  }
 0x256   : > { %5007 = vmatprep.mubr.msk.bf16.mxu0 %vm5279_vm2, %v5277_v1  ;;  %5043 = vmatprep.subr.bf16.mxu1 %v5277_v1 }
 0x257   : > { %5057 = vmatprep.subr.bf16.mxu0 %v5277_v1  ;;  %v4949_v57 = vpop.f32.mrf.mxu0 }
 0x259   : > { %v6315_v6 = vpop.f32.mrf.mxu0 }
 0x25b   : > { %v4950_v58 = vpop.f32.mrf.mxu0  ;;  %4994 = vmatmul.mubr.msk.bf16.gmra.mxu1 %vm278_vm4, %v2675_v42 }
 0x25c   : > { %5008 = vmatmul.mubr.msk.bf16.gmra.mxu0 %vm278_vm4, %v2762_v37  ;;  %4997 = vmatprep.mubr.msk.bf16.mxu1 %vm5279_vm2, %v5277_v1 }
 0x25d   : > { %5011 = vmatprep.mubr.msk.bf16.mxu0 %vm5279_vm2, %v5277_v1 }
 0x261   : > { %v6323_v17 = vpop.f32.mrf.mxu0 }
 0x263   : > { %v4953_v7 = vpop.f32.mrf.mxu0  ;;  %4998 = vmatmul.mubr.msk.bf16.gmra.mxu1 %vm278_vm4, %v2676_v35 }
 0x264   : > { %5012 = vmatmul.mubr.msk.bf16.gmra.mxu0 %vm278_vm4, %v2763_v48  ;;  %5017 = vmatprep.mubr.msk.bf16.mxu1 %vm5279_vm2, %v5277_v1 }
 0x265   : > { %5031 = vmatprep.mubr.msk.bf16.mxu0 %vm5279_vm2, %v5277_v1  ;;  %v6331_v3 = vpop.f32.mrf.mxu0 }
 0x267   : > { %v4954_v18 = vpop.f32.mrf.mxu0 }
 0x269   : > { %v6339_v53 = vpop.f32.mrf.mxu0 }
 0x26b   : > { %v4957_v19 = vpop.f32.mrf.mxu0  ;;  %5018 = vmatmul.mubr.msk.bf16.vlgmr.msra.gmra.mxu1 %vm278_vm4, %v2848_v29 }
 0x26c   : > { %5032 = vmatmul.mubr.msk.bf16.vlgmr.msra.gmra.mxu0 %vm278_vm4, %v2935_v32  ;;  %5044 = vmatpush3.bf16.msra.mxu1 %v5195_v8 }
 0x26d   : > { %5058 = vmatpush3.bf16.msra.mxu0 %v5196_v36  ;;  %v2508_v43 = vpop.f32.mrf.mxu0  ;;  %5021 = vmatprep.mubr.msk.bf16.mxu1 %vm5279_vm2, %v5277_v1 }
 0x26e   : > { %5035 = vmatprep.mubr.msk.bf16.mxu0 %vm5279_vm2, %v5277_v1  ;;  %5071 = vmatprep.subr.bf16.mxu1 %v5197_v21 }
 0x26f   : > { %v4958_v24 = vpop.f32.mrf.mxu0  ;;  %5095 = vmatprep.subr.bf16.mxu0 %v5199_v13 }
 0x273   : > { %5022 = vmatmul.mubr.msk.bf16.gmra.mxu1 %vm278_vm4, %v2849_v11 }
 0x274   : > { %5036 = vmatmul.mubr.msk.bf16.gmra.mxu0 %vm278_vm4, %v2936_v15  ;;  %5025 = vmatprep.mubr.msk.bf16.mxu1 %vm5279_vm2, %v5277_v1 }
 0x275   : > { %5039 = vmatprep.mubr.msk.bf16.mxu0 %vm5279_vm2, %v5277_v1 }
 0x27b   : > { %5026 = vmatmul.mubr.msk.bf16.gmra.mxu1 %vm278_vm4, %v2850_v63 }
 0x27c   : > { %5040 = vmatmul.mubr.msk.bf16.gmra.mxu0 %vm278_vm4, %v2937_v45  ;;  %5045 = vmatprep.mubr.msk.bf16.mxu1 %vm5279_vm2, %v5277_v1 }
 0x27d   : > { %5059 = vmatprep.mubr.msk.bf16.mxu0 %vm5279_vm2, %v5277_v1 }
 0x283   : > { %5046 = vmatmul.mubr.msk.bf16.vlgmr.msra.gmra.mxu1 %vm278_vm4, %v3022_v41 }
 0x284   : > { %5060 = vmatmul.mubr.msk.bf16.vlgmr.msra.gmra.mxu0 %vm278_vm4, %v3109_v52  ;;  %5049 = vmatprep.mubr.msk.bf16.mxu1 %vm5279_vm2, %v5277_v1 }
 0x285   : > { %5063 = vmatprep.mubr.msk.bf16.mxu0 %vm5279_vm2, %v5277_v1  ;;  %5072 = vmatpush3.bf16.msra.mxu1 %v5197_v21 }
 0x286   : > { %5073 = vmatprep.subr.bf16.mxu1 %v5198_v40  ;;  %5096 = vmatpush3.bf16.msra.mxu0 %v5199_v13 }
 0x287   : > { %5097 = vmatprep.subr.bf16.mxu0 %v5202_v5 }
 0x289   : > { %5074 = vmatpush3.bf16.msra.mxu1 %v5198_v40 }
 0x28a   : > { %5098 = vmatpush3.bf16.msra.mxu0 %v5202_v5 }
 0x28b   : > { %5050 = vmatmul.mubr.msk.bf16.gmra.mxu1 %vm278_vm4, %v3023_v61  ;;  %5111 = vmatprep.subr.bf16.mxu0 %v6404_v20 }
 0x28c   : > { %5064 = vmatmul.mubr.msk.bf16.gmra.mxu0 %vm278_vm4, %v3110_v60  ;;  %5053 = vmatprep.mubr.msk.bf16.mxu1 %vm5279_vm2, %v5277_v1 }
 0x28d   : > { %5067 = vmatprep.mubr.msk.bf16.mxu0 %vm5279_vm2, %v5277_v1  ;;  %v6395_v1 = vld [vmem:[%s6570_s3 + $0x8] sm:$0xff]   ;;  %vm3208_vm2 = vcmask 257024  }
 0x28e   : > { %5079 = vmatprep.subr.bf16.mxu1 %v6395_v1 }
 0x293   : > { %5054 = vmatmul.mubr.msk.bf16.gmra.mxu1 %vm278_vm4, %v3024_v22 }
 0x294   : > { %5068 = vmatmul.mubr.msk.bf16.gmra.mxu0 %vm278_vm4, %v3111_v34  ;;  %vm3212_vm4 = vcmask 261124  }
 0x2f3   : > { %v2560_v27 = vpop.f32.mrf.mxu1 }
 0x2f4   : > { %v2561_v25 = vadd.f32 %v2560_v27, %v6307_v39 }
 0x2f5   : > { %v4963_v49 = vpop.f32.mrf.mxu1 }
 0x2f7   : > { %v2563_v51 = vpop.f32.mrf.mxu1  ;;  %v2642_v57 = vpop.f32.mrf.mxu0 }
 0x2f8   : > { %v2664_v16 = vadd.f32 %v2642_v57, %v2561_v25  ;;  %v2564_v37 = vadd.f32 %v2563_v51, %v6315_v6 }
 0x2f9   : > { %v4964_v26 = vpop.f32.mrf.mxu1  ;;  %v4977_v42 = vpop.f32.mrf.mxu0 }
 0x2fb   : > { %v2645_v58 = vpop.f32.mrf.mxu0 }
 0x2fc   : > { %v6409_v50 = vadd.f32 %v2645_v58, %v2564_v37 }
 0x2fd   : > { %v4978_v38 = vpop.f32.mrf.mxu0 }
 0x303   : > { %v2568_v35 = vpop.f32.mrf.mxu1 }
 0x304   : > { %v6411_v48 = vpop.f32.mrf.mxu0 }
 0x305   : > { %v4967_v7 = vpop.f32.mrf.mxu1 }
 0x306   : > { %v4981_v30 = vpop.f32.mrf.mxu0  ;;  %v2569_v7 = vadd.f32 %v2568_v35, %v6323_v17 }
 0x307   : > { %v2571_v10 = vpop.f32.mrf.mxu1 }
 0x308   : > { %v6413_v18 = vpop.f32.mrf.mxu0 }
 0x309   : > { %v4968_v39 = vpop.f32.mrf.mxu1 }
 0x30a   : > { %v4982_v8 = vpop.f32.mrf.mxu0 }
 0x30b   : > { %v6415_v28 = vpop.f32.mrf.mxu1 }
 0x30c   : > { %v6417_v14 = vpop.f32.mrf.mxu0  ;;  %v2577_v35 = vadd.f32 %v6415_v28, %v6339_v53 }
 0x30d   : > { %v4971_v36 = vpop.f32.mrf.mxu1 }
 0x30e   : > { %v4985_v6 = vpop.f32.mrf.mxu0 }
 0x30f   : > { %v2579_v29 = vpop.f32.mrf.mxu1 }
 0x310   : > { %v2661_v32 = vpop.f32.mrf.mxu0 }
 0x311   : > { %v4972_v19 = vpop.f32.mrf.mxu1  ;;  %v2666_v32 = vadd.f32 %v6411_v48, %v2569_v7 }
 0x312   : > { %v4986_v43 = vpop.f32.mrf.mxu0  ;;  %v2572_v19 = vadd.f32 %v2571_v10, %v6331_v3  ;;  %v4289_v3 = vld [vmem:[%s6572_s5] ss:$0 sm:$0xff] }
 0x313   : > { %v2729_v62 = vpop.f32.mrf.mxu1 }
 0x314   : > { %v2816_v0 = vpop.f32.mrf.mxu0  ;;  %v2751_v37 = vadd.f32 %v2729_v62, %v2664_v16  ;;  %v2667_v17 = vadd.f32 %v6413_v18, %v2572_v19 }
 0x315   : > { %v4991_v24 = vpop.f32.mrf.mxu1 }
 0x316   : > { %v5005_v9 = vpop.f32.mrf.mxu0  ;;  %v2838_v8 = vadd.f32 %v2816_v0, %v2751_v37 }
 0x317   : > { %v2732_v56 = vpop.f32.mrf.mxu1 }
 0x318   : > { %v2819_v11 = vpop.f32.mrf.mxu0  ;;  %v2752_v36 = vadd.f32 %v2732_v56, %v6409_v50 }
 0x319   : > { %v4992_v15 = vpop.f32.mrf.mxu1 }
 0x31a   : > { %v5006_v31 = vpop.f32.mrf.mxu0  ;;  %v2839_v16 = vadd.f32 %v2819_v11, %v2752_v36 }
 0x31b   : > { %v2737_v46 = vpop.f32.mrf.mxu1 }
 0x31c   : > { %v2824_v63 = vpop.f32.mrf.mxu0  ;;  %v2753_v62 = vadd.f32 %v2737_v46, %v2666_v32  ;;  %v2668_v46 = vadd.f32 %v6417_v14, %v2577_v35 }
 0x31d   : > { %v4995_v45 = vpop.f32.mrf.mxu1 }
 0x31e   : > { %v5009_v4 = vpop.f32.mrf.mxu0 }
 0x31f   : > { %v2740_v44 = vpop.f32.mrf.mxu1  ;;  %v2840_v4 = vadd.f32 %v2824_v63, %v2753_v62 }
 0x320   : > { %v2827_v47 = vpop.f32.mrf.mxu0  ;;  %v2754_v48 = vadd.f32 %v2740_v44, %v2667_v17 }
 0x321   : > { %v4996_v59 = vpop.f32.mrf.mxu1 }
 0x322   : > { %v5010_v41 = vpop.f32.mrf.mxu0  ;;  %v2841_v28 = vadd.f32 %v2827_v47, %v2754_v48 }
 0x323   : > { %v2745_v52 = vpop.f32.mrf.mxu1 }
 0x324   : > { %v6419_v23 = vpop.f32.mrf.mxu0 }
 0x325   : > { %v4999_v12 = vpop.f32.mrf.mxu1 }
 0x326   : > { %v5013_v2 = vpop.f32.mrf.mxu0 }
 0x327   : > { %v2748_v54 = vpop.f32.mrf.mxu1 }
 0x328   : > { %v2835_v61 = vpop.f32.mrf.mxu0  ;;  %v2755_v54 = vadd.f32 %v2745_v52, %v2668_v46  ;;  %v5203_v46 = vld [vmem:[%s6570_s3 + $0x28] sm:$0xff]  }
 0x329   : > { %v5000_v60 = vpop.f32.mrf.mxu1 }
 0x32a   : > { %v5014_v33 = vpop.f32.mrf.mxu0  ;;  %v2842_v14 = vadd.f32 %v6419_v23, %v2755_v54 }
 0x32b   : > { %v2903_v55 = vpop.f32.mrf.mxu1 }
 0x32c   : > { %v2990_v22 = vpop.f32.mrf.mxu0  ;;  %v2925_v43 = vadd.f32 %v2903_v55, %v2838_v8 }
 0x32d   : > { %v5019_v34 = vpop.f32.mrf.mxu1 }
 0x32e   : > { %v5033_v21 = vpop.f32.mrf.mxu0  ;;  %v3012_v0 = vadd.f32 %v2990_v22, %v2925_v43 }
 0x32f   : > { %v2906_v40 = vpop.f32.mrf.mxu1 }
 0x330   : > { %v2993_v13 = vpop.f32.mrf.mxu0  ;;  %v2926_v50 = vadd.f32 %v2906_v40, %v2839_v16 }
 0x331   : > { %v5020_v5 = vpop.f32.mrf.mxu1 }
 0x332   : > { %v5034_v27 = vpop.f32.mrf.mxu0  ;;  %v3013_v41 = vadd.f32 %v2993_v13, %v2926_v50 }
 0x333   : > { %v2911_v49 = vpop.f32.mrf.mxu1 }
 0x334   : > { %v2998_v25 = vpop.f32.mrf.mxu0  ;;  %v2927_v18 = vadd.f32 %v2911_v49, %v2840_v4 }
 0x335   : > { %v5023_v51 = vpop.f32.mrf.mxu1 }
 0x336   : > { %v5037_v57 = vpop.f32.mrf.mxu0  ;;  %v3014_v33 = vadd.f32 %v2998_v25, %v2927_v18 }
 0x337   : > { %v2914_v26 = vpop.f32.mrf.mxu1 }
 0x338   : > { %v3001_v42 = vpop.f32.mrf.mxu0  ;;  %v2928_v55 = vadd.f32 %v2914_v26, %v2841_v28 }
 0x339   : > { %v5024_v58 = vpop.f32.mrf.mxu1 }
 0x33a   : > { %v5038_v38 = vpop.f32.mrf.mxu0  ;;  %v3015_v27 = vadd.f32 %v3001_v42, %v2928_v55 }
 0x33b   : > { %v2919_v30 = vpop.f32.mrf.mxu1 }
 0x33c   : > { %v6422_v39 = vpop.f32.mrf.mxu0  ;;  %v2929_v49 = vadd.f32 %v2919_v30, %v2842_v14 }
 0x33d   : > { %v5027_v6 = vpop.f32.mrf.mxu1 }
 0x33e   : > { %v5041_v29 = vpop.f32.mrf.mxu0  ;;  %v3016_v7 = vadd.f32 %v6422_v39, %v2929_v49 }
 0x33f   : > { %v2922_v24 = vpop.f32.mrf.mxu1 }
 0x340   : > { %v3009_v9 = vpop.f32.mrf.mxu0 }
 0x341   : > { %v5028_v15 = vpop.f32.mrf.mxu1 }
 0x342   : > { %v5042_v31 = vpop.f32.mrf.mxu0 }
 0x343   : > { %v3077_v56 = vpop.f32.mrf.mxu1 }
 0x344   : > { %v3164_v45 = vpop.f32.mrf.mxu0  ;;  %v3099_v59 = vadd.f32 %v3077_v56, %v3012_v0 }
 0x345   : > { %v5047_v10 = vpop.f32.mrf.mxu1 }
 0x346   : > { %v5061_v11 = vpop.f32.mrf.mxu0  ;;  %v3186_v12 = vadd.f32 %v3164_v45, %v3099_v59 }
 0x347   : > { %v3080_v2 = vpop.f32.mrf.mxu1 }
 0x348   : > { %v3167_v53 = vpop.f32.mrf.mxu0  ;;  %v3198_v61 = vadd.f32 %v4289_v3, %v3186_v12  ;;  %v3100_v60 = vadd.f32 %v3080_v2, %v3013_v41 }
 0x349   : > { %v5048_v63 = vpop.f32.mrf.mxu1 }
 0x34a   : > { %v5062_v44 = vpop.f32.mrf.mxu0  ;;  %v3203_v22 = vmax.f32 %v3198_v61, 0.0  ;;  %v3187_v34 = vadd.f32 %v3167_v53, %v3100_v60  ;;  %v5206_v61 = vld [vmem:[%s6570_s3 + $0x50] sm:$0xff]   ;;  %v5207_v63 = vld [vmem:[%s6570_s3 + $0x48] sm:$0xff]  }
 0x34b   : > { %v3085_v21 = vpop.f32.mrf.mxu1 }
 0x34c   : > { %v3172_v40 = vpop.f32.mrf.mxu0  ;;  %3209 = vst.msk [vmem:[#allocation3 + $0x7] sm:$0xf] %vm3208_vm2, %v3203_v22  ;;  %v3199_v13 = vadd.f32 %v4289_v3, %v3187_v34  ;;  %v3101_v5 = vadd.f32 %v3085_v21, %v3014_v33  ;;  %v5210_v33 = vld [vmem:[%s6570_s3 + $0x78] sm:$0xff]  }
 0x34d   : > { %v5051_v47 = vpop.f32.mrf.mxu1 }
 0x34e   : > { %v5065_v52 = vpop.f32.mrf.mxu0  ;;  %v3204_v51 = vmax.f32 %v3199_v13, 0.0  ;;  %v3188_v57 = vadd.f32 %v3172_v40, %v3101_v5  ;;  %v5208_v13 = vld [vmem:[%s6570_s3 + $0x40] sm:$0xff]  }
 0x34f   : > { %v3088_v37 = vpop.f32.mrf.mxu1  ;;  %v5212_v52 = vld [vmem:[%s6570_s3 + $0x70] sm:$0xff]  }
 0x350   : > { %v3175_v25 = vpop.f32.mrf.mxu0  ;;  %3211 = vst.msk [vmem:[#allocation3 + $0xb] sm:$0x3c] %vm3210_vm3, %v3204_v51  ;;  %v3200_v26 = vadd.f32 %v4289_v3, %v3188_v57  ;;  %v3102_v58 = vadd.f32 %v3088_v37, %v3015_v27  ;;  %v5209_v27 = vld [vmem:[%s6570_s3 + $0x68] sm:$0xff]   ;;  %v3765_v51 = vld [vmem:[#allocation3 + $0x1d] sm:$0xff] }
 0x351   : > { %v5052_v38 = vpop.f32.mrf.mxu1 }
 0x352   : > { %v5066_v23 = vpop.f32.mrf.mxu0  ;;  %v3205_v8 = vmax.f32 %v3200_v26, 0.0  ;;  %v3189_v36 = vadd.f32 %v3175_v25, %v3102_v58  ;;  %v5211_v26 = vld [vmem:[%s6570_s3 + $0x60] sm:$0xff]   ;;  %v3767_v58 = vpack.c.bf16 %v3765_v51, %v3765_v51 }
 0x353   : > { %v3093_v6 = vpop.f32.mrf.mxu1  ;;  %v3226_v62 = vld [vmem:[#allocation3 + $0x1] sm:$0xff]  ;;  %v4358_v51 = vld [vmem:[%s6573_s6] ss:$0 sm:$0xff] }
 0x354   : > { %v3180_v29 = vpop.f32.mrf.mxu0  ;;  %3213 = vst.msk [vmem:[#allocation3 + $0xf] sm:$0xf0] %vm3212_vm4, %v3205_v8  ;;  %v3201_v42 = vadd.f32 %v4289_v3, %v3189_v36  ;;  %v3103_v30 = vadd.f32 %v3093_v6, %v3016_v7  ;;  %v3217_v10 = vld [vmem:[#allocation3] sm:$0xff]  ;;  %v5213_v23 = vld [vmem:[%s6570_s3 + $0x88] sm:$0xff]  }
 0x355   : > { %v5055_v32 = vpop.f32.mrf.mxu1  ;;  %v3368_v28 = vld [vmem:[#allocation3 + $0x2] sm:$0xff] }
 0x356   : > { %v5069_v19 = vpop.f32.mrf.mxu0  ;;  %v3206_v43 = vmax.f32 %v3201_v42, 0.0  ;;  %v3190_v24 = vadd.f32 %v3180_v29, %v3103_v30  ;;  %v5214_v36 = vld [vmem:[%s6570_s3 + $0x80] sm:$0xff]  }
 0x357   : > { %v3096_v9 = vpop.f32.mrf.mxu1  ;;  %v3227_v15 = vld [vmem:[#allocation3 + $0x9] sm:$0xff]  ;;  %v3844_v29 = vld [vmem:[#allocation3 + $0x1e] sm:$0xff] }
 0x358   : > { %v3183_v16 = vpop.f32.mrf.mxu0  ;;  %3215 = vst.msk [vmem:[#allocation3 + $0x13] sm:$0xc0] %vm3214_vm5, %v3206_v43  ;;  %v3202_v39 = vadd.f32 %v4289_v3, %v3190_v24  ;;  %v3229_v31 = vpack.c.bf16 %v3227_v15, %v3226_v62  ;;  %v3218_v50 = vld [vmem:[#allocation3 + $0x8] sm:$0xff]  ;;  %v5201_v3 = vld [vmem:[%s6570_s3] sm:$0xff]   ;;  %v3846_v42 = vpack.c.bf16 %v3844_v29, %v3844_v29 }
 0x359   : > { %v5056_v17 = vpop.f32.mrf.mxu1  ;;  %v3447_v45 = vld [vmem:[#allocation3 + $0x6] sm:$0xff]  ;;  %v3220_v11 = vpack.c.bf16 %v3218_v50, %v3217_v10 }
 0x35a   : > { %v5070_v35 = vpop.f32.mrf.mxu0  ;;  %v3207_v0 = vmax.f32 %v3202_v39, 0.0  ;;  %5075 = vmatprep.mubr.msk.bf16.mxu1 %vm296_vm0, %v3229_v31  ;;  %v3369_v18 = vld [vmem:[#allocation3 + $0xa] sm:$0xff] }
 0x35b   : > { %v3228_v56 = vld [vmem:[#allocation3 + $0x11] sm:$0xff]  ;;  %v3371_v54 = vpack.c.bf16 %v3369_v18, %v3368_v28  ;;  %v3526_v40 = vld [vmem:[#allocation3 + $0x7] sm:$0xff] }
 0x35c   : > { %v6441_v4 = vld [vmem:[#allocation3 + $0xe] sm:$0xff]  ;;  %3216 = vst.msk [vmem:[#allocation3 + $0x1b] sm:$0x3] %vm302_vm1, %v3207_v0  ;;  %v3230_v48 = vpack.c.bf16 %v3228_v56, %v3228_v56 }
 0x35d   : > { %v3450_v59 = vpack.c.bf16 %v6441_v4, %v3447_v45  ;;  %v3219_v41 = vld [vmem:[#allocation3 + $0x10] sm:$0xff] }
 0x35e   : > { %5076 = vmatmul.mubr.msk.bf16.vlgmr.msra.gmra.mxu1 %vm296_vm0, %v3230_v48  ;;  %v3221_v2 = vpack.c.bf16 %v3219_v41, %v3219_v41  ;;  %v3608_v60 = vpack.c.bf16 %v3219_v41, %v3218_v50  ;;  %v3527_v22 = vld [vmem:[#allocation3 + $0xf] sm:$0xff] }
 0x35f   : > { %5099 = vmatprep.mubr.msk.bf16.mxu0 %vm296_vm0, %v3450_v59  ;;  %5080 = vmatpush3.bf16.msra.mxu1 %v6395_v1  ;;  %v5205_v1 = vld [vmem:[%s6570_s3 + $0x20] sm:$0xff]   ;;  %v3370_v44 = vld [vmem:[#allocation3 + $0x12] sm:$0xff]  ;;  %v3529_v5 = vpack.c.bf16 %v3527_v22, %v3526_v40 }
 0x360   : > { %5083 = vmatprep.mubr.msk.bf16.mxu1 %vm296_vm0, %v3220_v11  ;;  %5081 = vmatprep.subr.bf16.mxu1 %v5201_v3  ;;  %v3763_v14 = vld [vmem:[#allocation3 + $0xd] sm:$0xff] }
 0x361   : > { %v3684_v25 = vld [vmem:[#allocation3 + $0xc] sm:$0xff] }
 0x363   : > { %5082 = vmatpush3.bf16.msra.mxu1 %v5201_v3  ;;  %v6455_v12 = vld [vmem:[#allocation3 + $0x16] sm:$0xff] }
 0x364   : > { %5087 = vmatprep.subr.bf16.mxu1 %v5203_v46  ;;  %v3451_v53 = vpack.c.bf16 %v6455_v12, %v6455_v12  ;;  %v3607_v55 = vld [vmem:[#allocation3 + $0x18] sm:$0xff]  ;;  %v3845_v6 = vpack.c.bf16 %v6455_v12, %v6441_v4 }
 0x365   : > { %v3764_v34 = vld [vmem:[#allocation3 + $0x15] sm:$0xff]  ;;  %v3609_v21 = vpack.c.bf16 %v3607_v55, %v3607_v55 }
 0x366   : > { %5084 = vmatmul.mubr.msk.bf16.vlgmr.msra.gmra.mxu1 %vm296_vm0, %v3221_v2  ;;  %5100 = vmatmul.mubr.msk.bf16.vlgmr.msra.gmra.mxu0 %vm296_vm0, %v3451_v53  ;;  %v3766_v47 = vpack.c.bf16 %v3764_v34, %v3763_v14  ;;  %v3528_v49 = vld [vmem:[#allocation3 + $0x17] sm:$0xff] }
 0x367   : > { %5088 = vmatpush3.bf16.msra.mxu1 %v5203_v46  ;;  %5091 = vmatprep.mubr.msk.bf16.mxu1 %vm296_vm0, %v3371_v54  ;;  %v3685_v57 = vld [vmem:[#allocation3 + $0x14] sm:$0xff]  ;;  %v3530_v37 = vpack.c.bf16 %v3528_v49, %v3528_v49  ;;  %v3686_v7 = vld [vmem:[#allocation3 + $0x1c] sm:$0xff] }
 0x368   : > { %5112 = vmatpush3.bf16.msra.mxu0 %v6404_v20  ;;  %5115 = vmatprep.mubr.msk.bf16.mxu0 %vm296_vm0, %v3608_v60  ;;  %v3372_v20 = vpack.c.bf16 %v3370_v44, %v3370_v44  ;;  %v3687_v38 = vpack.c.bf16 %v3685_v57, %v3684_v25  ;;  %v3688_v8 = vpack.c.bf16 %v3686_v7, %v3686_v7 }
 0x369   : > { %5089 = vmatprep.subr.bf16.mxu1 %v5205_v1  ;;  %5113 = vmatprep.subr.bf16.mxu0 %v5206_v61 }
 0x36b   : > { %5090 = vmatpush3.bf16.msra.mxu1 %v5205_v1 }
 0x36c   : > { %5114 = vmatpush3.bf16.msra.mxu0 %v5206_v61  ;;  %5103 = vmatprep.subr.bf16.mxu1 %v5207_v63 }
 0x36d   : > { %5127 = vmatprep.subr.bf16.mxu0 %v5210_v33 }
 0x36e   : > { %5092 = vmatmul.mubr.msk.bf16.vlgmr.msra.gmra.mxu1 %vm296_vm0, %v3372_v20 }
 0x36f   : > { %5104 = vmatpush3.bf16.msra.mxu1 %v5207_v63  ;;  %5116 = vmatmul.mubr.msk.bf16.vlgmr.msra.gmra.mxu0 %vm296_vm0, %v3609_v21 }
 0x370   : > { %5107 = vmatprep.mubr.msk.bf16.mxu1 %vm296_vm0, %v3529_v5  ;;  %5131 = vmatprep.mubr.msk.bf16.mxu0 %vm296_vm0, %v3766_v47 }
 0x371   : > { %5105 = vmatprep.subr.bf16.mxu1 %v5208_v13  ;;  %5128 = vmatpush3.bf16.msra.mxu0 %v5210_v33 }
 0x372   : > { %5129 = vmatprep.subr.bf16.mxu0 %v5212_v52 }
 0x373   : > { %5106 = vmatpush3.bf16.msra.mxu1 %v5208_v13 }
 0x374   : > { %5119 = vmatprep.subr.bf16.mxu1 %v5209_v27 }
 0x375   : > { %5130 = vmatpush3.bf16.msra.mxu0 %v5212_v52 }
 0x376   : > { %5108 = vmatmul.mubr.msk.bf16.vlgmr.msra.gmra.mxu1 %vm296_vm0, %v3530_v37 }
 0x377   : > { %5120 = vmatpush3.bf16.msra.mxu1 %v5209_v27  ;;  %5123 = vmatprep.mubr.msk.bf16.mxu1 %vm296_vm0, %v3687_v38 }
 0x378   : > { %5121 = vmatprep.subr.bf16.mxu1 %v5211_v26  ;;  %5132 = vmatmul.mubr.msk.bf16.vlgmr.msra.gmra.mxu0 %vm296_vm0, %v3767_v58 }
 0x37b   : > { %5122 = vmatpush3.bf16.msra.mxu1 %v5211_v26 }
 0x37c   : > { %5135 = vmatprep.subr.bf16.mxu1 %v5213_v23 }
 0x37e   : > { %5124 = vmatmul.mubr.msk.bf16.vlgmr.msra.gmra.mxu1 %vm296_vm0, %v3688_v8 }
 0x37f   : > { %5136 = vmatpush3.bf16.msra.mxu1 %v5213_v23  ;;  %5139 = vmatprep.mubr.msk.bf16.mxu1 %vm296_vm0, %v3845_v6 }
 0x380   : > { %5137 = vmatprep.subr.bf16.mxu1 %v5214_v36 }
 0x383   : > { %5138 = vmatpush3.bf16.msra.mxu1 %v5214_v36 }
 0x386   : > { %5140 = vmatmul.mubr.msk.bf16.vlgmr.msra.gmra.mxu1 %vm296_vm0, %v3846_v42 }
 0x41e   : > { %v5077_v30 = vpop.f32.mrf.mxu1 }
 0x420   : > { %v3288_v32 = vpop.f32.mrf.mxu1 }
 0x422   : > { %v5078_v19 = vpop.f32.mrf.mxu1 }
 0x424   : > { %v3291_v43 = vpop.f32.mrf.mxu1 }
 0x426   : > { %v5085_v24 = vpop.f32.mrf.mxu1  ;;  %v5101_v9 = vpop.f32.mrf.mxu0 }
 0x427   : > { %v3363_v4 = vadd.f32 %v5085_v24, %v5077_v30 }
 0x428   : > { %v3354_v16 = vpop.f32.mrf.mxu1  ;;  %v3509_v62 = vpop.f32.mrf.mxu0 }
 0x429   : > { %v3355_v10 = vadd.f32 %v3354_v16, %v3288_v32 }
 0x42a   : > { %v5086_v15 = vpop.f32.mrf.mxu1  ;;  %v5102_v39 = vpop.f32.mrf.mxu0 }
 0x42c   : > { %v3357_v31 = vpop.f32.mrf.mxu1  ;;  %v3512_v17 = vpop.f32.mrf.mxu0 }
 0x42d   : > { %v3358_v2 = vadd.f32 %v3357_v31, %v3291_v43 }
 0x42e   : > { %v5093_v35 = vpop.f32.mrf.mxu1 }
 0x42f   : > { %v5117_v0 = vpop.f32.mrf.mxu0  ;;  %v3446_v3 = vadd.f32 %v5093_v35, %v3363_v4 }
 0x430   : > { %v3430_v50 = vpop.f32.mrf.mxu1 }
 0x431   : > { %v3667_v56 = vpop.f32.mrf.mxu0  ;;  %v3444_v41 = vadd.f32 %v3430_v50, %v3355_v10  ;;  %v3525_v53 = vadd.f32 %v5101_v9, %v3446_v3 }
 0x432   : > { %v5094_v45 = vpop.f32.mrf.mxu1 }
 0x433   : > { %v5118_v48 = vpop.f32.mrf.mxu0  ;;  %v3523_v60 = vadd.f32 %v3509_v62, %v3444_v41 }
 0x434   : > { %v3433_v59 = vpop.f32.mrf.mxu1 }
 0x435   : > { %v3670_v11 = vpop.f32.mrf.mxu0  ;;  %v3445_v1 = vadd.f32 %v3433_v59, %v3358_v2 }
 0x436   : > { %v5109_v46 = vpop.f32.mrf.mxu1 }
 0x437   : > { %v3604_v61 = vadd.f32 %v5109_v46, %v3525_v53  ;;  %v3524_v22 = vadd.f32 %v3512_v17, %v3445_v1 }
 0x438   : > { %v3588_v18 = vpop.f32.mrf.mxu1  ;;  %v5133_v12 = vpop.f32.mrf.mxu0 }
 0x439   : > { %v3602_v33 = vadd.f32 %v3588_v18, %v3523_v60  ;;  %v3683_v34 = vadd.f32 %v5117_v0, %v3604_v61 }
 0x43a   : > { %v5110_v28 = vpop.f32.mrf.mxu1  ;;  %v3825_v54 = vpop.f32.mrf.mxu0 }
 0x43b   : > { %v3681_v14 = vadd.f32 %v3667_v56, %v3602_v33 }
 0x43c   : > { %v3591_v63 = vpop.f32.mrf.mxu1  ;;  %v5134_v44 = vpop.f32.mrf.mxu0 }
 0x43d   : > { %v3603_v21 = vadd.f32 %v3591_v63, %v3524_v22 }
 0x43e   : > { %v5125_v55 = vpop.f32.mrf.mxu1  ;;  %v3828_v23 = vpop.f32.mrf.mxu0 }
 0x43f   : > { %v3762_v40 = vadd.f32 %v5125_v55, %v3683_v34  ;;  %v3682_v27 = vadd.f32 %v3670_v11, %v3603_v21 }
 0x440   : > { %v3746_v20 = vpop.f32.mrf.mxu1 }
 0x441   : > { %v3760_v5 = vadd.f32 %v3746_v20, %v3681_v14  ;;  %v3841_v52 = vadd.f32 %v5133_v12, %v3762_v40 }
 0x442   : > { %v5126_v13 = vpop.f32.mrf.mxu1 }
 0x443   : > { %v3839_v57 = vadd.f32 %v3825_v54, %v3760_v5 }
 0x444   : > { %v3749_v47 = vpop.f32.mrf.mxu1 }
 0x445   : > { %v3761_v37 = vadd.f32 %v3749_v47, %v3682_v27 }
 0x446   : > { %v5141_v49 = vpop.f32.mrf.mxu1 }
 0x447   : > { %v3920_v25 = vadd.f32 %v5141_v49, %v3841_v52  ;;  %v3840_v8 = vadd.f32 %v3828_v23, %v3761_v37 }
 0x448   : > { %v3904_v26 = vpop.f32.mrf.mxu1 }
 0x449   : > { %v3930_v58 = vadd.f32 %v4358_v51, %v3920_v25  ;;  %v3918_v38 = vadd.f32 %v3904_v26, %v3839_v57 }
 0x44a   : > { %v5142_v7 = vpop.f32.mrf.mxu1 }
 0x44b   : > { %4362 = vst.msk [vmem:[%s271_s19 + $0xa] sm:$0x3c] %vm3210_vm3, %v3930_v58  ;;  %v3928_v36 = vadd.f32 %v4358_v51, %v3918_v38 }
 0x44c   : > { %v3907_v6 = vpop.f32.mrf.mxu1 }
 0x44d   : > { %3931 = vst.msk [vmem:[%s271_s19] sm:$0xf] %vm3208_vm2, %v3928_v36  ;;  %v3919_v29 = vadd.f32 %v3907_v6, %v3840_v8 }
 0x44e   : > { %4359 = vst.msk [vmem:[%s271_s19 - $0x2] sm:$0xc0] %vm3214_vm5, %v3928_v36 }
 0x44f   : > { %v3929_v42 = vadd.f32 %v4358_v51, %v3919_v29 }
 0x451   : > { %4360 = vst.msk [vmem:[%s271_s19 + $0x6] sm:$0x3] %vm302_vm1, %v3929_v42 }
 0x452   : > { %4361 = vst.msk [vmem:[%s271_s19 + $0x4] sm:$0xf0] %vm3212_vm4, %v3929_v42 }
 0x453   : > { %5228 = shalt.err (!%p5225_p3)
}
 0x454   : > { %s5229_s16 = scalar_lea.hbm %s6519_s29, 256  ;;  %s5233_s18 = scalar_lea.hbm %s6574_s7, 512 }
 0x455   : > { %p5230_p4 = scmp.ne.s32.totalorder %s6519_s29, %s5229_s16  ;;  %p5234_p9 = scmp.lt.s32.totalorder %s6519_s29, %s6574_s7 }
 0x456   : > { %p5235_p10 = scmp.lt.s32.totalorder %s5233_s18, %s5229_s16 }
 0x457   : > { %p5231_p7 = pnand %p5230_p4, %p5361_p5 }
 0x458   : > { %p5236_p11 = por %p5235_p10, %p5234_p9 }
 0x459   : > { %p5232_p8 = pneg %p5231_p7 }
 0x45b   : > { %p5237_p12 = pnand %p5236_p11, %p5232_p8 }
 0x45d   : > { %5240 = shalt.err (!%p5237_p12)
}
 0x45e   : > { %s5281_s22 = smov 64   ;;  %s5282_s23 = smov 4  }
 0x45f   : > { %5144 = dma.vmem_to_hbm [thread:$0]  (%p5361_p5), %s6521_s21, 256, %s6519_s29, %s6527_s28, %s5281_s22, %s5281_s22, %s5282_s23  }
 0x460 PF: > { %p5150_p13 = scmp.ge.s32.totalorder %s5275_s27, 2  ;;  %s3968_s9 = sand.u32 1, %s5263_s24  }
 0x461   : > { %s3969_s13 = scalar_lea.sflag [#allocation5], %s3968_s9 }
 0x462   : > { %p5147_p0 = pnand %p5150_p13, %p5365_p6 }
 0x464   : > { %p5148_p1 = pneg %p5147_p0 }
 0x466   : > { %5258 = dma.done.wait (%p5148_p1), %s3969_s13, 256  }
 0x467   : > { %5260 = vsyncadd (%p5148_p1), %s3969_s13, 4294967040  ;;  %p17_p2 = scmp.ge.s32.totalorder %s5348_s30, 4   ;;  %s6577_s24 = smov %s5267_s25 }
 0x468   : > { %s6578_s25 = smov %s5271_s26  ;;  %s6579_s26 = smov %s5359_s10 }
 0x469   : > { %s6580_s27 = smov %s5348_s30  ;;  %19 = sbr.rel (!%p17_p2) target bundleno = 3 (0x3), region = 114 }
 0x46e   :  { %3974 = vsyncpa [#allocation5], 1 }
 0x46f   :  { %3976 = vsyncpa [#allocation5 + $0x1], 1 }

</bundles_post_ra>
